<compile_context>
chip_gen: v7x
topology: tpu7x:2x2x1
jax: 0.10.0
libtpu: 0.0.40
codegen_flags: <defaults>
</compile_context>

<pallas_src>
import jax
import jax.numpy as jnp
import numpy as np
from jax.experimental import pallas as pl
from jax.experimental.pallas import tpu as pltpu

D_MODEL = 32
NHEAD = 4
DIM_FF = 64
NUM_LAYERS = 2
LN_EPS = 1e-5

PARAM_NAMES = ['sa_w', 'sa_b', 'sa_ow', 'sa_ob',
               'ca_w', 'ca_b', 'ca_ow', 'ca_ob',
               'w1', 'b1', 'w2', 'b2',
               'g1', 'be1', 'g2', 'be2', 'g3', 'be3']


# ---------------- math shared by the kernel body and the pure-JAX reference ----------------

def _linear(x2d, w, b):
    # w stored pre-transposed as (in, out): y = x @ W + b
    return jnp.dot(x2d, w, preferred_element_type=jnp.float32) + b


def _layernorm(x2d, gamma, beta, eps=LN_EPS):
    mu = jnp.mean(x2d, axis=-1, keepdims=True)
    var = jnp.mean((x2d - mu) ** 2, axis=-1, keepdims=True)
    return (x2d - mu) * jax.lax.rsqrt(var + eps) * gamma + beta


def _attn_core(q, k, v, B, T, S, wo, bo, *, use_approx_recip, nhead=NHEAD):
    """Multi-head attention core on flattened, already-projected q/k/v.

    q: (B*T, D) (already scaled by 1/sqrt(hd)), k/v: (B*S, D),
    wo: (D, D) pre-transposed, bo: (1, D).  Returns (B*T, D).
    """
    D = q.shape[-1]
    H = nhead
    hd = D // H

    # head-batched layout: merge (B, H) into one leading batch axis -> (B*H, seq, hd)
    qh = q.reshape(B, T, H, hd).transpose(0, 2, 1, 3).reshape(B * H, T, hd)
    kh = k.reshape(B, S, H, hd).transpose(0, 2, 1, 3).reshape(B * H, S, hd)
    vh = v.reshape(B, S, H, hd).transpose(0, 2, 1, 3).reshape(B * H, S, hd)

    s = jnp.einsum('gtd,gsd->gts', qh, kh, preferred_element_type=jnp.float32)  # (B*H, T, S)
    s = s - jnp.max(s, axis=-1, keepdims=True)
    p = jnp.exp(s)
    denom = jnp.sum(p, axis=-1, keepdims=True)
    if use_approx_recip:
        p = p * pl.reciprocal(denom, approx=True)   # EUP slot, nearly free
    else:
        p = p / denom
    ctx = jnp.einsum('gts,gsd->gtd', p, vh, preferred_element_type=jnp.float32)  # (B*H, T, hd)

    o = ctx.reshape(B, H, T, hd).transpose(0, 2, 1, 3).reshape(B * T, D)
    return jnp.dot(o, wo, preferred_element_type=jnp.float32) + bo


def _self_mha(xf, B, T, wqkv, bqkv, wo, bo, *, use_approx_recip):
    """Self-attention: single packed QKV matmul (x is both query and key/value source)."""
    D = xf.shape[-1]
    scale = 1.0 / float(np.sqrt(D // NHEAD))
    qkv = jnp.dot(xf, wqkv, preferred_element_type=jnp.float32) + bqkv   # (B*T, 3D)
    q = qkv[:, 0:D] * scale
    k = qkv[:, D:2 * D]
    v = qkv[:, 2 * D:3 * D]
    return _attn_core(q, k, v, B, T, T, wo, bo, use_approx_recip=use_approx_recip)


def _cross_mha(xf, memf, B, T, S, wqkv, bqkv, wo, bo, *, use_approx_recip):
    """Cross-attention: Q from x (one matmul), packed K/V from memory (one matmul)."""
    D = xf.shape[-1]
    scale = 1.0 / float(np.sqrt(D // NHEAD))
    q = (jnp.dot(xf, wqkv[:, 0:D], preferred_element_type=jnp.float32)
         + bqkv[:, 0:D]) * scale                                          # (B*T, D)
    kv = (jnp.dot(memf, wqkv[:, D:3 * D], preferred_element_type=jnp.float32)
          + bqkv[:, D:3 * D])                                             # (B*S, 2D)
    k = kv[:, 0:D]
    v = kv[:, D:2 * D]
    return _attn_core(q, k, v, B, T, S, wo, bo, use_approx_recip=use_approx_recip)


def _decoder_layer_math(xf, memf, B, T, S, p, *, use_approx_recip):
    # TODO(synk): dropout layers are identity at inference, so they are omitted.
    sa = _self_mha(xf, B, T, p['sa_w'], p['sa_b'], p['sa_ow'], p['sa_ob'],
                   use_approx_recip=use_approx_recip)
    xf = _layernorm(xf + sa, p['g1'], p['be1'])
    ca = _cross_mha(xf, memf, B, T, S, p['ca_w'], p['ca_b'], p['ca_ow'], p['ca_ob'],
                    use_approx_recip=use_approx_recip)
    xf = _layernorm(xf + ca, p['g2'], p['be2'])
    ff = _linear(jnp.maximum(_linear(xf, p['w1'], p['b1']), 0.0), p['w2'], p['b2'])
    xf = _layernorm(xf + ff, p['g3'], p['be3'])
    return xf


# ---------------- fused Pallas kernel: whole stack + whole batch in one call ----------------

def fused_decoder_kernel(tgt_ref, mem_ref, *rest):
    param_refs = rest[:len(PARAM_NAMES)]
    out_ref = rest[len(PARAM_NAMES)]
    num_layers = param_refs[0].shape[0]

    T, B, D = tgt_ref.shape
    S = mem_ref.shape[0]

    # fold the (T,B,D)/(S,B,D) -> flattened (B*seq, D) layout changes into the kernel,
    # done exactly once (tiny, VMEM-resident)
    xf = jnp.transpose(tgt_ref[...].astype(jnp.float32), (1, 0, 2)).reshape(B * T, D)
    memf = jnp.transpose(mem_ref[...].astype(jnp.float32), (1, 0, 2)).reshape(B * S, D)

    for l in range(num_layers):   # static unroll; params sliced from VMEM-resident stacks
        p = {name: ref[l] for name, ref in zip(PARAM_NAMES, param_refs)}
        xf = _decoder_layer_math(xf, memf, B, T, S, p, use_approx_recip=True)

    # back to (T, B, D)
    out_ref[...] = jnp.transpose(xf.reshape(B, T, D), (1, 0, 2)).astype(out_ref.dtype)


def transformer_decoder_forward(tgt_tbd, mem_sbd, stacked_params):
    """tgt: (T, B, D), memory: (S, B, D); stacked_params: dict of (L, ...) arrays."""
    param_arrays = [stacked_params[name] for name in PARAM_NAMES]
    n_inputs = 2 + len(param_arrays)
    return pl.pallas_call(
        fused_decoder_kernel,
        out_shape=jax.ShapeDtypeStruct(tgt_tbd.shape, jnp.float32),
        # no grid: single invocation, everything (activations + all layer weights) in VMEM
        in_specs=[pl.BlockSpec(memory_space=pltpu.MemorySpace.VMEM)] * n_inputs,
        out_specs=pl.BlockSpec(memory_space=pltpu.MemorySpace.VMEM),
    )(tgt_tbd, mem_sbd, *param_arrays)


# ---------------- pure-JAX reference (exact division softmax) ----------------

def reference_forward(tgt_tbd, mem_sbd, stacked_params):
    T, B, D = tgt_tbd.shape
    S = mem_sbd.shape[0]
    xf = jnp.transpose(tgt_tbd, (1, 0, 2)).reshape(B * T, D)
    memf = jnp.transpose(mem_sbd, (1, 0, 2)).reshape(B * S, D)
    L = stacked_params[PARAM_NAMES[0]].shape[0]
    for l in range(L):
        p = {name: stacked_params[name][l] for name in PARAM_NAMES}
        xf = _decoder_layer_math(xf, memf, B, T, S, p, use_approx_recip=False)
    return jnp.transpose(xf.reshape(B, T, D), (1, 0, 2))


# ---------------- deterministic parameter init (weights stored pre-transposed) ----------------

def init_layer_params(key):
    keys = jax.random.split(key, 10)

    def xavier_t(k, out_in):
        fan_out, fan_in = out_in
        lim = float(np.sqrt(6.0 / (fan_in + fan_out)))
        w = jax.random.uniform(k, (fan_out, fan_in), jnp.float32, -lim, lim)  # PyTorch (out,in)
        return w.T  # stored as (in, out) so the kernel computes x @ W (no in-kernel transpose)

    p = {
        'sa_w': xavier_t(keys[0], (3 * D_MODEL, D_MODEL)),        # (D, 3D)
        'sa_b': jnp.zeros((1, 3 * D_MODEL), jnp.float32),
        'sa_ow': xavier_t(keys[1], (D_MODEL, D_MODEL)),           # (D, D)
        'sa_ob': jnp.zeros((1, D_MODEL), jnp.float32),
        'ca_w': xavier_t(keys[2], (3 * D_MODEL, D_MODEL)),
        'ca_b': jnp.zeros((1, 3 * D_MODEL), jnp.float32),
        'ca_ow': xavier_t(keys[3], (D_MODEL, D_MODEL)),
        'ca_ob': jnp.zeros((1, D_MODEL), jnp.float32),
        'w1': xavier_t(keys[4], (DIM_FF, D_MODEL)),               # (D, FF)
        'b1': jax.random.uniform(keys[5], (1, DIM_FF), jnp.float32, -0.1, 0.1),
        'w2': xavier_t(keys[6], (D_MODEL, DIM_FF)),               # (FF, D)
        'b2': jax.random.uniform(keys[7], (1, D_MODEL), jnp.float32, -0.1, 0.1),
        'g1': 1.0 + 0.05 * jax.random.normal(keys[8], (1, D_MODEL), jnp.float32),
        'be1': 0.05 * jax.random.normal(keys[9], (1, D_MODEL), jnp.float32),
    }
    p['g2'] = p['g1'] + 0.01
    p['be2'] = p['be1'] - 0.01
    p['g3'] = p['g1'] - 0.02
    p['be3'] = p['be1'] + 0.02
    return p


if __name__ == "__main__":
    key = jax.random.PRNGKey(0)
    k_tgt, k_mem, k_par = jax.random.split(key, 3)

    T, S, B = 8, 16, 2
    tgt = jax.random.normal(k_tgt, (T, B, D_MODEL), jnp.float32)
    mem = jax.random.normal(k_mem, (S, B, D_MODEL), jnp.float32)

    # _get_clones deep-copies one layer => identical weights in every layer; stack with L axis
    shared = init_layer_params(k_par)
    stacked = {name: jnp.stack([shared[name]] * NUM_LAYERS) for name in PARAM_NAMES}

    out = transformer_decoder_forward(tgt, mem, stacked)
    out = jax.block_until_ready(out)

    ref = reference_forward(tgt, mem, stacked)
    # tolerance loosened slightly because the kernel uses the EUP approximate reciprocal
    # for softmax normalization (pl.reciprocal(approx=True)); reference uses exact division.
    np.testing.assert_allclose(np.asarray(out), np.asarray(ref), rtol=2e-2, atol=2e-2)

    print("KERNEL_OK")
</pallas_src>

<mosaic_0001>
module attributes {stable_mosaic.version = 11 : i64} {
  func.func @fused_decoder_kernel(%arg0: memref<8x2x32xf32, #tpu.memory_space<vmem>>, %arg1: memref<16x2x32xf32, #tpu.memory_space<vmem>>, %arg2: memref<2x32x96xf32, #tpu.memory_space<vmem>>, %arg3: memref<2x1x96xf32, #tpu.memory_space<vmem>>, %arg4: memref<2x32x32xf32, #tpu.memory_space<vmem>>, %arg5: memref<2x1x32xf32, #tpu.memory_space<vmem>>, %arg6: memref<2x32x96xf32, #tpu.memory_space<vmem>>, %arg7: memref<2x1x96xf32, #tpu.memory_space<vmem>>, %arg8: memref<2x32x32xf32, #tpu.memory_space<vmem>>, %arg9: memref<2x1x32xf32, #tpu.memory_space<vmem>>, %arg10: memref<2x32x64xf32, #tpu.memory_space<vmem>>, %arg11: memref<2x1x64xf32, #tpu.memory_space<vmem>>, %arg12: memref<2x64x32xf32, #tpu.memory_space<vmem>>, %arg13: memref<2x1x32xf32, #tpu.memory_space<vmem>>, %arg14: memref<2x1x32xf32, #tpu.memory_space<vmem>>, %arg15: memref<2x1x32xf32, #tpu.memory_space<vmem>>, %arg16: memref<2x1x32xf32, #tpu.memory_space<vmem>>, %arg17: memref<2x1x32xf32, #tpu.memory_space<vmem>>, %arg18: memref<2x1x32xf32, #tpu.memory_space<vmem>>, %arg19: memref<2x1x32xf32, #tpu.memory_space<vmem>>, %arg20: memref<8x2x32xf32, #tpu.memory_space<vmem>>) attributes {dimension_semantics = [], scalar_prefetch = 0 : i64, scratch_operands = 0 : i64, tpu.core_type = #tpu.core_type<tc>} {
    %c0 = arith.constant 0 : index
    %c0_0 = arith.constant 0 : index
    %c0_1 = arith.constant 0 : index
    %0 = vector.load %arg0[%c0, %c0_0, %c0_1] : memref<8x2x32xf32, #tpu.memory_space<vmem>>, vector<8x2x32xf32>
    %1 = tpu.transpose %0, [1, 0, 2] : vector<8x2x32xf32> -> vector<2x8x32xf32>
    %2 = vector.shape_cast %1 : vector<2x8x32xf32> to vector<16x32xf32>
    %c0_2 = arith.constant 0 : index
    %c0_3 = arith.constant 0 : index
    %c0_4 = arith.constant 0 : index
    %3 = vector.load %arg1[%c0_2, %c0_3, %c0_4] : memref<16x2x32xf32, #tpu.memory_space<vmem>>, vector<16x2x32xf32>
    %4 = tpu.transpose %3, [1, 0, 2] : vector<16x2x32xf32> -> vector<2x16x32xf32>
    %5 = vector.shape_cast %4 : vector<2x16x32xf32> to vector<32x32xf32>
    %c0_5 = arith.constant 0 : index
    %c0_6 = arith.constant 0 : index
    %c0_7 = arith.constant 0 : index
    %6 = vector.load %arg2[%c0_5, %c0_6, %c0_7] : memref<2x32x96xf32, #tpu.memory_space<vmem>>, vector<1x32x96xf32>
    %7 = vector.shape_cast %6 : vector<1x32x96xf32> to vector<32x96xf32>
    %c0_8 = arith.constant 0 : index
    %c0_9 = arith.constant 0 : index
    %c0_10 = arith.constant 0 : index
    %8 = vector.load %arg3[%c0_8, %c0_9, %c0_10] : memref<2x1x96xf32, #tpu.memory_space<vmem>>, vector<1x1x96xf32>
    %9 = vector.shape_cast %8 : vector<1x1x96xf32> to vector<1x96xf32>
    %c0_11 = arith.constant 0 : index
    %c0_12 = arith.constant 0 : index
    %c0_13 = arith.constant 0 : index
    %10 = vector.load %arg4[%c0_11, %c0_12, %c0_13] : memref<2x32x32xf32, #tpu.memory_space<vmem>>, vector<1x32x32xf32>
    %11 = vector.shape_cast %10 : vector<1x32x32xf32> to vector<32x32xf32>
    %c0_14 = arith.constant 0 : index
    %c0_15 = arith.constant 0 : index
    %c0_16 = arith.constant 0 : index
    %12 = vector.load %arg5[%c0_14, %c0_15, %c0_16] : memref<2x1x32xf32, #tpu.memory_space<vmem>>, vector<1x1x32xf32>
    %13 = vector.shape_cast %12 : vector<1x1x32xf32> to vector<1x32xf32>
    %c0_17 = arith.constant 0 : index
    %c0_18 = arith.constant 0 : index
    %c0_19 = arith.constant 0 : index
    %14 = vector.load %arg6[%c0_17, %c0_18, %c0_19] : memref<2x32x96xf32, #tpu.memory_space<vmem>>, vector<1x32x96xf32>
    %15 = vector.shape_cast %14 : vector<1x32x96xf32> to vector<32x96xf32>
    %c0_20 = arith.constant 0 : index
    %c0_21 = arith.constant 0 : index
    %c0_22 = arith.constant 0 : index
    %16 = vector.load %arg7[%c0_20, %c0_21, %c0_22] : memref<2x1x96xf32, #tpu.memory_space<vmem>>, vector<1x1x96xf32>
    %17 = vector.shape_cast %16 : vector<1x1x96xf32> to vector<1x96xf32>
    %c0_23 = arith.constant 0 : index
    %c0_24 = arith.constant 0 : index
    %c0_25 = arith.constant 0 : index
    %18 = vector.load %arg8[%c0_23, %c0_24, %c0_25] : memref<2x32x32xf32, #tpu.memory_space<vmem>>, vector<1x32x32xf32>
    %19 = vector.shape_cast %18 : vector<1x32x32xf32> to vector<32x32xf32>
    %c0_26 = arith.constant 0 : index
    %c0_27 = arith.constant 0 : index
    %c0_28 = arith.constant 0 : index
    %20 = vector.load %arg9[%c0_26, %c0_27, %c0_28] : memref<2x1x32xf32, #tpu.memory_space<vmem>>, vector<1x1x32xf32>
    %21 = vector.shape_cast %20 : vector<1x1x32xf32> to vector<1x32xf32>
    %c0_29 = arith.constant 0 : index
    %c0_30 = arith.constant 0 : index
    %c0_31 = arith.constant 0 : index
    %22 = vector.load %arg10[%c0_29, %c0_30, %c0_31] : memref<2x32x64xf32, #tpu.memory_space<vmem>>, vector<1x32x64xf32>
    %23 = vector.shape_cast %22 : vector<1x32x64xf32> to vector<32x64xf32>
    %c0_32 = arith.constant 0 : index
    %c0_33 = arith.constant 0 : index
    %c0_34 = arith.constant 0 : index
    %24 = vector.load %arg11[%c0_32, %c0_33, %c0_34] : memref<2x1x64xf32, #tpu.memory_space<vmem>>, vector<1x1x64xf32>
    %25 = vector.shape_cast %24 : vector<1x1x64xf32> to vector<1x64xf32>
    %c0_35 = arith.constant 0 : index
    %c0_36 = arith.constant 0 : index
    %c0_37 = arith.constant 0 : index
    %26 = vector.load %arg12[%c0_35, %c0_36, %c0_37] : memref<2x64x32xf32, #tpu.memory_space<vmem>>, vector<1x64x32xf32>
    %27 = vector.shape_cast %26 : vector<1x64x32xf32> to vector<64x32xf32>
    %c0_38 = arith.constant 0 : index
    %c0_39 = arith.constant 0 : index
    %c0_40 = arith.constant 0 : index
    %28 = vector.load %arg13[%c0_38, %c0_39, %c0_40] : memref<2x1x32xf32, #tpu.memory_space<vmem>>, vector<1x1x32xf32>
    %29 = vector.shape_cast %28 : vector<1x1x32xf32> to vector<1x32xf32>
    %c0_41 = arith.constant 0 : index
    %c0_42 = arith.constant 0 : index
    %c0_43 = arith.constant 0 : index
    %30 = vector.load %arg14[%c0_41, %c0_42, %c0_43] : memref<2x1x32xf32, #tpu.memory_space<vmem>>, vector<1x1x32xf32>
    %31 = vector.shape_cast %30 : vector<1x1x32xf32> to vector<1x32xf32>
    %c0_44 = arith.constant 0 : index
    %c0_45 = arith.constant 0 : index
    %c0_46 = arith.constant 0 : index
    %32 = vector.load %arg15[%c0_44, %c0_45, %c0_46] : memref<2x1x32xf32, #tpu.memory_space<vmem>>, vector<1x1x32xf32>
    %33 = vector.shape_cast %32 : vector<1x1x32xf32> to vector<1x32xf32>
    %c0_47 = arith.constant 0 : index
    %c0_48 = arith.constant 0 : index
    %c0_49 = arith.constant 0 : index
    %34 = vector.load %arg16[%c0_47, %c0_48, %c0_49] : memref<2x1x32xf32, #tpu.memory_space<vmem>>, vector<1x1x32xf32>
    %35 = vector.shape_cast %34 : vector<1x1x32xf32> to vector<1x32xf32>
    %c0_50 = arith.constant 0 : index
    %c0_51 = arith.constant 0 : index
    %c0_52 = arith.constant 0 : index
    %36 = vector.load %arg17[%c0_50, %c0_51, %c0_52] : memref<2x1x32xf32, #tpu.memory_space<vmem>>, vector<1x1x32xf32>
    %37 = vector.shape_cast %36 : vector<1x1x32xf32> to vector<1x32xf32>
    %c0_53 = arith.constant 0 : index
    %c0_54 = arith.constant 0 : index
    %c0_55 = arith.constant 0 : index
    %38 = vector.load %arg18[%c0_53, %c0_54, %c0_55] : memref<2x1x32xf32, #tpu.memory_space<vmem>>, vector<1x1x32xf32>
    %39 = vector.shape_cast %38 : vector<1x1x32xf32> to vector<1x32xf32>
    %c0_56 = arith.constant 0 : index
    %c0_57 = arith.constant 0 : index
    %c0_58 = arith.constant 0 : index
    %40 = vector.load %arg19[%c0_56, %c0_57, %c0_58] : memref<2x1x32xf32, #tpu.memory_space<vmem>>, vector<1x1x32xf32>
    %41 = vector.shape_cast %40 : vector<1x1x32xf32> to vector<1x32xf32>
    %cst = arith.constant dense<0.000000e+00> : vector<16x96xf32>
    %42 = tpu.matmul %2, %7, %cst {dimension_numbers = #tpu.dot_dimension_numbers<[1], [0], [0], [1], [0, 0, 1, 1], [], []>} : vector<16x32xf32>, vector<32x96xf32>, vector<16x96xf32> -> vector<16x96xf32>
    %43 = vector.broadcast %9 : vector<1x96xf32> to vector<16x96xf32>
    %44 = arith.addf %42, %43 : vector<16x96xf32>
    %45 = vector.extract_strided_slice %44 {offsets = [0, 0], sizes = [16, 32], strides = [1, 1]} : vector<16x96xf32> to vector<16x32xf32>
    %cst_59 = arith.constant 0.353553385 : f32
    %46 = vector.broadcast %cst_59 : f32 to vector<16x32xf32>
    %47 = arith.mulf %45, %46 : vector<16x32xf32>
    %48 = vector.extract_strided_slice %44 {offsets = [0, 32], sizes = [16, 32], strides = [1, 1]} : vector<16x96xf32> to vector<16x32xf32>
    %49 = vector.extract_strided_slice %44 {offsets = [0, 64], sizes = [16, 32], strides = [1, 1]} : vector<16x96xf32> to vector<16x32xf32>
    %50 = vector.shape_cast %47 : vector<16x32xf32> to vector<2x8x4x8xf32>
    %51 = tpu.transpose %50, [0, 2, 1, 3] : vector<2x8x4x8xf32> -> vector<2x4x8x8xf32>
    %52 = vector.shape_cast %51 : vector<2x4x8x8xf32> to vector<8x8x8xf32>
    %53 = vector.shape_cast %48 : vector<16x32xf32> to vector<2x8x4x8xf32>
    %54 = tpu.transpose %53, [0, 2, 1, 3] : vector<2x8x4x8xf32> -> vector<2x4x8x8xf32>
    %55 = vector.shape_cast %54 : vector<2x4x8x8xf32> to vector<8x8x8xf32>
    %56 = vector.shape_cast %49 : vector<16x32xf32> to vector<2x8x4x8xf32>
    %57 = tpu.transpose %56, [0, 2, 1, 3] : vector<2x8x4x8xf32> -> vector<2x4x8x8xf32>
    %58 = vector.shape_cast %57 : vector<2x4x8x8xf32> to vector<8x8x8xf32>
    "tpu.trace_start"() <{level = 10 : i32, message = "gtd,gsd->gts"}> : () -> ()
    %cst_60 = arith.constant dense<0.000000e+00> : vector<8x8x8xf32>
    %59 = tpu.matmul %52, %55, %cst_60 {dimension_numbers = #tpu.dot_dimension_numbers<[2], [2], [1], [1], [0, 0, 0, 1, 1, 1], [0], [0]>} : vector<8x8x8xf32>, vector<8x8x8xf32>, vector<8x8x8xf32> -> vector<8x8x8xf32>
    "tpu.trace_stop"() : () -> ()
    %cst_61 = arith.constant dense<0xFF800000> : vector<8x8xf32>
    %60 = vector.multi_reduction <maximumf>, %59, %cst_61 [2] : vector<8x8x8xf32> to vector<8x8xf32>
    %61 = vector.shape_cast %60 : vector<8x8xf32> to vector<8x8x1xf32>
    %62 = vector.broadcast %61 : vector<8x8x1xf32> to vector<8x8x8xf32>
    %63 = arith.subf %59, %62 : vector<8x8x8xf32>
    %64 = math.exp %63 : vector<8x8x8xf32>
    %cst_62 = arith.constant dense<0.000000e+00> : vector<8x8xf32>
    %65 = vector.multi_reduction <add>, %64, %cst_62 [2] : vector<8x8x8xf32> to vector<8x8xf32>
    %66 = vector.shape_cast %65 : vector<8x8xf32> to vector<8x8x1xf32>
    %67 = tpu.reciprocal %66 {approx = true} : vector<8x8x1xf32> -> vector<8x8x1xf32>
    %68 = vector.broadcast %67 : vector<8x8x1xf32> to vector<8x8x8xf32>
    %69 = arith.mulf %64, %68 : vector<8x8x8xf32>
    "tpu.trace_start"() <{level = 10 : i32, message = "gts,gsd->gtd"}> : () -> ()
    %cst_63 = arith.constant dense<0.000000e+00> : vector<8x8x8xf32>
    %70 = tpu.matmul %69, %58, %cst_63 {dimension_numbers = #tpu.dot_dimension_numbers<[2], [1], [1], [2], [0, 0, 0, 1, 1, 2], [0], [0]>} : vector<8x8x8xf32>, vector<8x8x8xf32>, vector<8x8x8xf32> -> vector<8x8x8xf32>
    "tpu.trace_stop"() : () -> ()
    %71 = vector.shape_cast %70 : vector<8x8x8xf32> to vector<2x4x8x8xf32>
    %72 = tpu.transpose %71, [0, 2, 1, 3] : vector<2x4x8x8xf32> -> vector<2x8x4x8xf32>
    %73 = vector.shape_cast %72 : vector<2x8x4x8xf32> to vector<16x32xf32>
    %cst_64 = arith.constant dense<0.000000e+00> : vector<16x32xf32>
    %74 = tpu.matmul %73, %11, %cst_64 {dimension_numbers = #tpu.dot_dimension_numbers<[1], [0], [0], [1], [0, 0, 1, 1], [], []>} : vector<16x32xf32>, vector<32x32xf32>, vector<16x32xf32> -> vector<16x32xf32>
    %75 = vector.broadcast %13 : vector<1x32xf32> to vector<16x32xf32>
    %76 = arith.addf %74, %75 : vector<16x32xf32>
    %77 = arith.addf %2, %76 : vector<16x32xf32>
    %cst_65 = arith.constant dense<0.000000e+00> : vector<16xf32>
    %78 = vector.multi_reduction <add>, %77, %cst_65 [1] : vector<16x32xf32> to vector<16xf32>
    %79 = vector.shape_cast %78 : vector<16xf32> to vector<16x1xf32>
    %cst_66 = arith.constant 3.200000e+01 : f32
    %80 = vector.broadcast %cst_66 : f32 to vector<16x1xf32>
    %81 = arith.divf %79, %80 : vector<16x1xf32>
    %82 = vector.broadcast %81 : vector<16x1xf32> to vector<16x32xf32>
    %83 = arith.subf %77, %82 : vector<16x32xf32>
    %84 = arith.mulf %83, %83 : vector<16x32xf32>
    %cst_67 = arith.constant dense<0.000000e+00> : vector<16xf32>
    %85 = vector.multi_reduction <add>, %84, %cst_67 [1] : vector<16x32xf32> to vector<16xf32>
    %86 = vector.shape_cast %85 : vector<16xf32> to vector<16x1xf32>
    %cst_68 = arith.constant 3.200000e+01 : f32
    %87 = vector.broadcast %cst_68 : f32 to vector<16x1xf32>
    %88 = arith.divf %86, %87 : vector<16x1xf32>
    %89 = vector.broadcast %81 : vector<16x1xf32> to vector<16x32xf32>
    %90 = arith.subf %77, %89 : vector<16x32xf32>
    %cst_69 = arith.constant 9.99999974E-6 : f32
    %91 = vector.broadcast %cst_69 : f32 to vector<16x1xf32>
    %92 = arith.addf %88, %91 : vector<16x1xf32>
    %93 = math.rsqrt %92 : vector<16x1xf32>
    %94 = vector.broadcast %93 : vector<16x1xf32> to vector<16x32xf32>
    %95 = arith.mulf %90, %94 : vector<16x32xf32>
    %96 = vector.broadcast %31 : vector<1x32xf32> to vector<16x32xf32>
    %97 = arith.mulf %95, %96 : vector<16x32xf32>
    %98 = vector.broadcast %33 : vector<1x32xf32> to vector<16x32xf32>
    %99 = arith.addf %97, %98 : vector<16x32xf32>
    %100 = vector.extract_strided_slice %15 {offsets = [0, 0], sizes = [32, 32], strides = [1, 1]} : vector<32x96xf32> to vector<32x32xf32>
    %cst_70 = arith.constant dense<0.000000e+00> : vector<16x32xf32>
    %101 = tpu.matmul %99, %100, %cst_70 {dimension_numbers = #tpu.dot_dimension_numbers<[1], [0], [0], [1], [0, 0, 1, 1], [], []>} : vector<16x32xf32>, vector<32x32xf32>, vector<16x32xf32> -> vector<16x32xf32>
    %102 = vector.extract_strided_slice %17 {offsets = [0, 0], sizes = [1, 32], strides = [1, 1]} : vector<1x96xf32> to vector<1x32xf32>
    %103 = vector.broadcast %102 : vector<1x32xf32> to vector<16x32xf32>
    %104 = arith.addf %101, %103 : vector<16x32xf32>
    %cst_71 = arith.constant 0.353553385 : f32
    %105 = vector.broadcast %cst_71 : f32 to vector<16x32xf32>
    %106 = arith.mulf %104, %105 : vector<16x32xf32>
    %107 = vector.extract_strided_slice %15 {offsets = [0, 32], sizes = [32, 64], strides = [1, 1]} : vector<32x96xf32> to vector<32x64xf32>
    %cst_72 = arith.constant dense<0.000000e+00> : vector<32x64xf32>
    %108 = tpu.matmul %5, %107, %cst_72 {dimension_numbers = #tpu.dot_dimension_numbers<[1], [0], [0], [1], [0, 0, 1, 1], [], []>} : vector<32x32xf32>, vector<32x64xf32>, vector<32x64xf32> -> vector<32x64xf32>
    %109 = vector.extract_strided_slice %17 {offsets = [0, 32], sizes = [1, 64], strides = [1, 1]} : vector<1x96xf32> to vector<1x64xf32>
    %110 = vector.broadcast %109 : vector<1x64xf32> to vector<32x64xf32>
    %111 = arith.addf %108, %110 : vector<32x64xf32>
    %112 = vector.extract_strided_slice %111 {offsets = [0, 0], sizes = [32, 32], strides = [1, 1]} : vector<32x64xf32> to vector<32x32xf32>
    %113 = vector.extract_strided_slice %111 {offsets = [0, 32], sizes = [32, 32], strides = [1, 1]} : vector<32x64xf32> to vector<32x32xf32>
    %114 = vector.shape_cast %106 : vector<16x32xf32> to vector<2x8x4x8xf32>
    %115 = tpu.transpose %114, [0, 2, 1, 3] : vector<2x8x4x8xf32> -> vector<2x4x8x8xf32>
    %116 = vector.shape_cast %115 : vector<2x4x8x8xf32> to vector<8x8x8xf32>
    %117 = vector.shape_cast %112 : vector<32x32xf32> to vector<2x16x4x8xf32>
    %118 = tpu.transpose %117, [0, 2, 1, 3] : vector<2x16x4x8xf32> -> vector<2x4x16x8xf32>
    %119 = vector.shape_cast %118 : vector<2x4x16x8xf32> to vector<8x16x8xf32>
    %120 = vector.shape_cast %113 : vector<32x32xf32> to vector<2x16x4x8xf32>
    %121 = tpu.transpose %120, [0, 2, 1, 3] : vector<2x16x4x8xf32> -> vector<2x4x16x8xf32>
    %122 = vector.shape_cast %121 : vector<2x4x16x8xf32> to vector<8x16x8xf32>
    "tpu.trace_start"() <{level = 10 : i32, message = "gtd,gsd->gts"}> : () -> ()
    %cst_73 = arith.constant dense<0.000000e+00> : vector<8x8x16xf32>
    %123 = tpu.matmul %116, %119, %cst_73 {dimension_numbers = #tpu.dot_dimension_numbers<[2], [2], [1], [1], [0, 0, 0, 1, 1, 1], [0], [0]>} : vector<8x8x8xf32>, vector<8x16x8xf32>, vector<8x8x16xf32> -> vector<8x8x16xf32>
    "tpu.trace_stop"() : () -> ()
    %cst_74 = arith.constant dense<0xFF800000> : vector<8x8xf32>
    %124 = vector.multi_reduction <maximumf>, %123, %cst_74 [2] : vector<8x8x16xf32> to vector<8x8xf32>
    %125 = vector.shape_cast %124 : vector<8x8xf32> to vector<8x8x1xf32>
    %126 = vector.broadcast %125 : vector<8x8x1xf32> to vector<8x8x16xf32>
    %127 = arith.subf %123, %126 : vector<8x8x16xf32>
    %128 = math.exp %127 : vector<8x8x16xf32>
    %cst_75 = arith.constant dense<0.000000e+00> : vector<8x8xf32>
    %129 = vector.multi_reduction <add>, %128, %cst_75 [2] : vector<8x8x16xf32> to vector<8x8xf32>
    %130 = vector.shape_cast %129 : vector<8x8xf32> to vector<8x8x1xf32>
    %131 = tpu.reciprocal %130 {approx = true} : vector<8x8x1xf32> -> vector<8x8x1xf32>
    %132 = vector.broadcast %131 : vector<8x8x1xf32> to vector<8x8x16xf32>
    %133 = arith.mulf %128, %132 : vector<8x8x16xf32>
    "tpu.trace_start"() <{level = 10 : i32, message = "gts,gsd->gtd"}> : () -> ()
    %cst_76 = arith.constant dense<0.000000e+00> : vector<8x8x8xf32>
    %134 = tpu.matmul %133, %122, %cst_76 {dimension_numbers = #tpu.dot_dimension_numbers<[2], [1], [1], [2], [0, 0, 0, 1, 1, 2], [0], [0]>} : vector<8x8x16xf32>, vector<8x16x8xf32>, vector<8x8x8xf32> -> vector<8x8x8xf32>
    "tpu.trace_stop"() : () -> ()
    %135 = vector.shape_cast %134 : vector<8x8x8xf32> to vector<2x4x8x8xf32>
    %136 = tpu.transpose %135, [0, 2, 1, 3] : vector<2x4x8x8xf32> -> vector<2x8x4x8xf32>
    %137 = vector.shape_cast %136 : vector<2x8x4x8xf32> to vector<16x32xf32>
    %cst_77 = arith.constant dense<0.000000e+00> : vector<16x32xf32>
    %138 = tpu.matmul %137, %19, %cst_77 {dimension_numbers = #tpu.dot_dimension_numbers<[1], [0], [0], [1], [0, 0, 1, 1], [], []>} : vector<16x32xf32>, vector<32x32xf32>, vector<16x32xf32> -> vector<16x32xf32>
    %139 = vector.broadcast %21 : vector<1x32xf32> to vector<16x32xf32>
    %140 = arith.addf %138, %139 : vector<16x32xf32>
    %141 = arith.addf %99, %140 : vector<16x32xf32>
    %cst_78 = arith.constant dense<0.000000e+00> : vector<16xf32>
    %142 = vector.multi_reduction <add>, %141, %cst_78 [1] : vector<16x32xf32> to vector<16xf32>
    %143 = vector.shape_cast %142 : vector<16xf32> to vector<16x1xf32>
    %cst_79 = arith.constant 3.200000e+01 : f32
    %144 = vector.broadcast %cst_79 : f32 to vector<16x1xf32>
    %145 = arith.divf %143, %144 : vector<16x1xf32>
    %146 = vector.broadcast %145 : vector<16x1xf32> to vector<16x32xf32>
    %147 = arith.subf %141, %146 : vector<16x32xf32>
    %148 = arith.mulf %147, %147 : vector<16x32xf32>
    %cst_80 = arith.constant dense<0.000000e+00> : vector<16xf32>
    %149 = vector.multi_reduction <add>, %148, %cst_80 [1] : vector<16x32xf32> to vector<16xf32>
    %150 = vector.shape_cast %149 : vector<16xf32> to vector<16x1xf32>
    %cst_81 = arith.constant 3.200000e+01 : f32
    %151 = vector.broadcast %cst_81 : f32 to vector<16x1xf32>
    %152 = arith.divf %150, %151 : vector<16x1xf32>
    %153 = vector.broadcast %145 : vector<16x1xf32> to vector<16x32xf32>
    %154 = arith.subf %141, %153 : vector<16x32xf32>
    %cst_82 = arith.constant 9.99999974E-6 : f32
    %155 = vector.broadcast %cst_82 : f32 to vector<16x1xf32>
    %156 = arith.addf %152, %155 : vector<16x1xf32>
    %157 = math.rsqrt %156 : vector<16x1xf32>
    %158 = vector.broadcast %157 : vector<16x1xf32> to vector<16x32xf32>
    %159 = arith.mulf %154, %158 : vector<16x32xf32>
    %160 = vector.broadcast %35 : vector<1x32xf32> to vector<16x32xf32>
    %161 = arith.mulf %159, %160 : vector<16x32xf32>
    %162 = vector.broadcast %37 : vector<1x32xf32> to vector<16x32xf32>
    %163 = arith.addf %161, %162 : vector<16x32xf32>
    %cst_83 = arith.constant dense<0.000000e+00> : vector<16x64xf32>
    %164 = tpu.matmul %163, %23, %cst_83 {dimension_numbers = #tpu.dot_dimension_numbers<[1], [0], [0], [1], [0, 0, 1, 1], [], []>} : vector<16x32xf32>, vector<32x64xf32>, vector<16x64xf32> -> vector<16x64xf32>
    %165 = vector.broadcast %25 : vector<1x64xf32> to vector<16x64xf32>
    %166 = arith.addf %164, %165 : vector<16x64xf32>
    %cst_84 = arith.constant 0.000000e+00 : f32
    %167 = vector.broadcast %cst_84 : f32 to vector<16x64xf32>
    %168 = arith.maximumf %166, %167 : vector<16x64xf32>
    %cst_85 = arith.constant dense<0.000000e+00> : vector<16x32xf32>
    %169 = tpu.matmul %168, %27, %cst_85 {dimension_numbers = #tpu.dot_dimension_numbers<[1], [0], [0], [1], [0, 0, 1, 1], [], []>} : vector<16x64xf32>, vector<64x32xf32>, vector<16x32xf32> -> vector<16x32xf32>
    %170 = vector.broadcast %29 : vector<1x32xf32> to vector<16x32xf32>
    %171 = arith.addf %169, %170 : vector<16x32xf32>
    %172 = arith.addf %163, %171 : vector<16x32xf32>
    %cst_86 = arith.constant dense<0.000000e+00> : vector<16xf32>
    %173 = vector.multi_reduction <add>, %172, %cst_86 [1] : vector<16x32xf32> to vector<16xf32>
    %174 = vector.shape_cast %173 : vector<16xf32> to vector<16x1xf32>
    %cst_87 = arith.constant 3.200000e+01 : f32
    %175 = vector.broadcast %cst_87 : f32 to vector<16x1xf32>
    %176 = arith.divf %174, %175 : vector<16x1xf32>
    %177 = vector.broadcast %176 : vector<16x1xf32> to vector<16x32xf32>
    %178 = arith.subf %172, %177 : vector<16x32xf32>
    %179 = arith.mulf %178, %178 : vector<16x32xf32>
    %cst_88 = arith.constant dense<0.000000e+00> : vector<16xf32>
    %180 = vector.multi_reduction <add>, %179, %cst_88 [1] : vector<16x32xf32> to vector<16xf32>
    %181 = vector.shape_cast %180 : vector<16xf32> to vector<16x1xf32>
    %cst_89 = arith.constant 3.200000e+01 : f32
    %182 = vector.broadcast %cst_89 : f32 to vector<16x1xf32>
    %183 = arith.divf %181, %182 : vector<16x1xf32>
    %184 = vector.broadcast %176 : vector<16x1xf32> to vector<16x32xf32>
    %185 = arith.subf %172, %184 : vector<16x32xf32>
    %cst_90 = arith.constant 9.99999974E-6 : f32
    %186 = vector.broadcast %cst_90 : f32 to vector<16x1xf32>
    %187 = arith.addf %183, %186 : vector<16x1xf32>
    %188 = math.rsqrt %187 : vector<16x1xf32>
    %189 = vector.broadcast %188 : vector<16x1xf32> to vector<16x32xf32>
    %190 = arith.mulf %185, %189 : vector<16x32xf32>
    %191 = vector.broadcast %39 : vector<1x32xf32> to vector<16x32xf32>
    %192 = arith.mulf %190, %191 : vector<16x32xf32>
    %193 = vector.broadcast %41 : vector<1x32xf32> to vector<16x32xf32>
    %194 = arith.addf %192, %193 : vector<16x32xf32>
    %c1 = arith.constant 1 : index
    %c0_91 = arith.constant 0 : index
    %c0_92 = arith.constant 0 : index
    %195 = vector.load %arg2[%c1, %c0_91, %c0_92] : memref<2x32x96xf32, #tpu.memory_space<vmem>>, vector<1x32x96xf32>
    %196 = vector.shape_cast %195 : vector<1x32x96xf32> to vector<32x96xf32>
    %c1_93 = arith.constant 1 : index
    %c0_94 = arith.constant 0 : index
    %c0_95 = arith.constant 0 : index
    %197 = vector.load %arg3[%c1_93, %c0_94, %c0_95] : memref<2x1x96xf32, #tpu.memory_space<vmem>>, vector<1x1x96xf32>
    %198 = vector.shape_cast %197 : vector<1x1x96xf32> to vector<1x96xf32>
    %c1_96 = arith.constant 1 : index
    %c0_97 = arith.constant 0 : index
    %c0_98 = arith.constant 0 : index
    %199 = vector.load %arg4[%c1_96, %c0_97, %c0_98] : memref<2x32x32xf32, #tpu.memory_space<vmem>>, vector<1x32x32xf32>
    %200 = vector.shape_cast %199 : vector<1x32x32xf32> to vector<32x32xf32>
    %c1_99 = arith.constant 1 : index
    %c0_100 = arith.constant 0 : index
    %c0_101 = arith.constant 0 : index
    %201 = vector.load %arg5[%c1_99, %c0_100, %c0_101] : memref<2x1x32xf32, #tpu.memory_space<vmem>>, vector<1x1x32xf32>
    %202 = vector.shape_cast %201 : vector<1x1x32xf32> to vector<1x32xf32>
    %c1_102 = arith.constant 1 : index
    %c0_103 = arith.constant 0 : index
    %c0_104 = arith.constant 0 : index
    %203 = vector.load %arg6[%c1_102, %c0_103, %c0_104] : memref<2x32x96xf32, #tpu.memory_space<vmem>>, vector<1x32x96xf32>
    %204 = vector.shape_cast %203 : vector<1x32x96xf32> to vector<32x96xf32>
    %c1_105 = arith.constant 1 : index
    %c0_106 = arith.constant 0 : index
    %c0_107 = arith.constant 0 : index
    %205 = vector.load %arg7[%c1_105, %c0_106, %c0_107] : memref<2x1x96xf32, #tpu.memory_space<vmem>>, vector<1x1x96xf32>
    %206 = vector.shape_cast %205 : vector<1x1x96xf32> to vector<1x96xf32>
    %c1_108 = arith.constant 1 : index
    %c0_109 = arith.constant 0 : index
    %c0_110 = arith.constant 0 : index
    %207 = vector.load %arg8[%c1_108, %c0_109, %c0_110] : memref<2x32x32xf32, #tpu.memory_space<vmem>>, vector<1x32x32xf32>
    %208 = vector.shape_cast %207 : vector<1x32x32xf32> to vector<32x32xf32>
    %c1_111 = arith.constant 1 : index
    %c0_112 = arith.constant 0 : index
    %c0_113 = arith.constant 0 : index
    %209 = vector.load %arg9[%c1_111, %c0_112, %c0_113] : memref<2x1x32xf32, #tpu.memory_space<vmem>>, vector<1x1x32xf32>
    %210 = vector.shape_cast %209 : vector<1x1x32xf32> to vector<1x32xf32>
    %c1_114 = arith.constant 1 : index
    %c0_115 = arith.constant 0 : index
    %c0_116 = arith.constant 0 : index
    %211 = vector.load %arg10[%c1_114, %c0_115, %c0_116] : memref<2x32x64xf32, #tpu.memory_space<vmem>>, vector<1x32x64xf32>
    %212 = vector.shape_cast %211 : vector<1x32x64xf32> to vector<32x64xf32>
    %c1_117 = arith.constant 1 : index
    %c0_118 = arith.constant 0 : index
    %c0_119 = arith.constant 0 : index
    %213 = vector.load %arg11[%c1_117, %c0_118, %c0_119] : memref<2x1x64xf32, #tpu.memory_space<vmem>>, vector<1x1x64xf32>
    %214 = vector.shape_cast %213 : vector<1x1x64xf32> to vector<1x64xf32>
    %c1_120 = arith.constant 1 : index
    %c0_121 = arith.constant 0 : index
    %c0_122 = arith.constant 0 : index
    %215 = vector.load %arg12[%c1_120, %c0_121, %c0_122] : memref<2x64x32xf32, #tpu.memory_space<vmem>>, vector<1x64x32xf32>
    %216 = vector.shape_cast %215 : vector<1x64x32xf32> to vector<64x32xf32>
    %c1_123 = arith.constant 1 : index
    %c0_124 = arith.constant 0 : index
    %c0_125 = arith.constant 0 : index
    %217 = vector.load %arg13[%c1_123, %c0_124, %c0_125] : memref<2x1x32xf32, #tpu.memory_space<vmem>>, vector<1x1x32xf32>
    %218 = vector.shape_cast %217 : vector<1x1x32xf32> to vector<1x32xf32>
    %c1_126 = arith.constant 1 : index
    %c0_127 = arith.constant 0 : index
    %c0_128 = arith.constant 0 : index
    %219 = vector.load %arg14[%c1_126, %c0_127, %c0_128] : memref<2x1x32xf32, #tpu.memory_space<vmem>>, vector<1x1x32xf32>
    %220 = vector.shape_cast %219 : vector<1x1x32xf32> to vector<1x32xf32>
    %c1_129 = arith.constant 1 : index
    %c0_130 = arith.constant 0 : index
    %c0_131 = arith.constant 0 : index
    %221 = vector.load %arg15[%c1_129, %c0_130, %c0_131] : memref<2x1x32xf32, #tpu.memory_space<vmem>>, vector<1x1x32xf32>
    %222 = vector.shape_cast %221 : vector<1x1x32xf32> to vector<1x32xf32>
    %c1_132 = arith.constant 1 : index
    %c0_133 = arith.constant 0 : index
    %c0_134 = arith.constant 0 : index
    %223 = vector.load %arg16[%c1_132, %c0_133, %c0_134] : memref<2x1x32xf32, #tpu.memory_space<vmem>>, vector<1x1x32xf32>
    %224 = vector.shape_cast %223 : vector<1x1x32xf32> to vector<1x32xf32>
    %c1_135 = arith.constant 1 : index
    %c0_136 = arith.constant 0 : index
    %c0_137 = arith.constant 0 : index
    %225 = vector.load %arg17[%c1_135, %c0_136, %c0_137] : memref<2x1x32xf32, #tpu.memory_space<vmem>>, vector<1x1x32xf32>
    %226 = vector.shape_cast %225 : vector<1x1x32xf32> to vector<1x32xf32>
    %c1_138 = arith.constant 1 : index
    %c0_139 = arith.constant 0 : index
    %c0_140 = arith.constant 0 : index
    %227 = vector.load %arg18[%c1_138, %c0_139, %c0_140] : memref<2x1x32xf32, #tpu.memory_space<vmem>>, vector<1x1x32xf32>
    %228 = vector.shape_cast %227 : vector<1x1x32xf32> to vector<1x32xf32>
    %c1_141 = arith.constant 1 : index
    %c0_142 = arith.constant 0 : index
    %c0_143 = arith.constant 0 : index
    %229 = vector.load %arg19[%c1_141, %c0_142, %c0_143] : memref<2x1x32xf32, #tpu.memory_space<vmem>>, vector<1x1x32xf32>
    %230 = vector.shape_cast %229 : vector<1x1x32xf32> to vector<1x32xf32>
    %cst_144 = arith.constant dense<0.000000e+00> : vector<16x96xf32>
    %231 = tpu.matmul %194, %196, %cst_144 {dimension_numbers = #tpu.dot_dimension_numbers<[1], [0], [0], [1], [0, 0, 1, 1], [], []>} : vector<16x32xf32>, vector<32x96xf32>, vector<16x96xf32> -> vector<16x96xf32>
    %232 = vector.broadcast %198 : vector<1x96xf32> to vector<16x96xf32>
    %233 = arith.addf %231, %232 : vector<16x96xf32>
    %234 = vector.extract_strided_slice %233 {offsets = [0, 0], sizes = [16, 32], strides = [1, 1]} : vector<16x96xf32> to vector<16x32xf32>
    %cst_145 = arith.constant 0.353553385 : f32
    %235 = vector.broadcast %cst_145 : f32 to vector<16x32xf32>
    %236 = arith.mulf %234, %235 : vector<16x32xf32>
    %237 = vector.extract_strided_slice %233 {offsets = [0, 32], sizes = [16, 32], strides = [1, 1]} : vector<16x96xf32> to vector<16x32xf32>
    %238 = vector.extract_strided_slice %233 {offsets = [0, 64], sizes = [16, 32], strides = [1, 1]} : vector<16x96xf32> to vector<16x32xf32>
    %239 = vector.shape_cast %236 : vector<16x32xf32> to vector<2x8x4x8xf32>
    %240 = tpu.transpose %239, [0, 2, 1, 3] : vector<2x8x4x8xf32> -> vector<2x4x8x8xf32>
    %241 = vector.shape_cast %240 : vector<2x4x8x8xf32> to vector<8x8x8xf32>
    %242 = vector.shape_cast %237 : vector<16x32xf32> to vector<2x8x4x8xf32>
    %243 = tpu.transpose %242, [0, 2, 1, 3] : vector<2x8x4x8xf32> -> vector<2x4x8x8xf32>
    %244 = vector.shape_cast %243 : vector<2x4x8x8xf32> to vector<8x8x8xf32>
    %245 = vector.shape_cast %238 : vector<16x32xf32> to vector<2x8x4x8xf32>
    %246 = tpu.transpose %245, [0, 2, 1, 3] : vector<2x8x4x8xf32> -> vector<2x4x8x8xf32>
    %247 = vector.shape_cast %246 : vector<2x4x8x8xf32> to vector<8x8x8xf32>
    "tpu.trace_start"() <{level = 10 : i32, message = "gtd,gsd->gts"}> : () -> ()
    %cst_146 = arith.constant dense<0.000000e+00> : vector<8x8x8xf32>
    %248 = tpu.matmul %241, %244, %cst_146 {dimension_numbers = #tpu.dot_dimension_numbers<[2], [2], [1], [1], [0, 0, 0, 1, 1, 1], [0], [0]>} : vector<8x8x8xf32>, vector<8x8x8xf32>, vector<8x8x8xf32> -> vector<8x8x8xf32>
    "tpu.trace_stop"() : () -> ()
    %cst_147 = arith.constant dense<0xFF800000> : vector<8x8xf32>
    %249 = vector.multi_reduction <maximumf>, %248, %cst_147 [2] : vector<8x8x8xf32> to vector<8x8xf32>
    %250 = vector.shape_cast %249 : vector<8x8xf32> to vector<8x8x1xf32>
    %251 = vector.broadcast %250 : vector<8x8x1xf32> to vector<8x8x8xf32>
    %252 = arith.subf %248, %251 : vector<8x8x8xf32>
    %253 = math.exp %252 : vector<8x8x8xf32>
    %cst_148 = arith.constant dense<0.000000e+00> : vector<8x8xf32>
    %254 = vector.multi_reduction <add>, %253, %cst_148 [2] : vector<8x8x8xf32> to vector<8x8xf32>
    %255 = vector.shape_cast %254 : vector<8x8xf32> to vector<8x8x1xf32>
    %256 = tpu.reciprocal %255 {approx = true} : vector<8x8x1xf32> -> vector<8x8x1xf32>
    %257 = vector.broadcast %256 : vector<8x8x1xf32> to vector<8x8x8xf32>
    %258 = arith.mulf %253, %257 : vector<8x8x8xf32>
    "tpu.trace_start"() <{level = 10 : i32, message = "gts,gsd->gtd"}> : () -> ()
    %cst_149 = arith.constant dense<0.000000e+00> : vector<8x8x8xf32>
    %259 = tpu.matmul %258, %247, %cst_149 {dimension_numbers = #tpu.dot_dimension_numbers<[2], [1], [1], [2], [0, 0, 0, 1, 1, 2], [0], [0]>} : vector<8x8x8xf32>, vector<8x8x8xf32>, vector<8x8x8xf32> -> vector<8x8x8xf32>
    "tpu.trace_stop"() : () -> ()
    %260 = vector.shape_cast %259 : vector<8x8x8xf32> to vector<2x4x8x8xf32>
    %261 = tpu.transpose %260, [0, 2, 1, 3] : vector<2x4x8x8xf32> -> vector<2x8x4x8xf32>
    %262 = vector.shape_cast %261 : vector<2x8x4x8xf32> to vector<16x32xf32>
    %cst_150 = arith.constant dense<0.000000e+00> : vector<16x32xf32>
    %263 = tpu.matmul %262, %200, %cst_150 {dimension_numbers = #tpu.dot_dimension_numbers<[1], [0], [0], [1], [0, 0, 1, 1], [], []>} : vector<16x32xf32>, vector<32x32xf32>, vector<16x32xf32> -> vector<16x32xf32>
    %264 = vector.broadcast %202 : vector<1x32xf32> to vector<16x32xf32>
    %265 = arith.addf %263, %264 : vector<16x32xf32>
    %266 = arith.addf %194, %265 : vector<16x32xf32>
    %cst_151 = arith.constant dense<0.000000e+00> : vector<16xf32>
    %267 = vector.multi_reduction <add>, %266, %cst_151 [1] : vector<16x32xf32> to vector<16xf32>
    %268 = vector.shape_cast %267 : vector<16xf32> to vector<16x1xf32>
    %cst_152 = arith.constant 3.200000e+01 : f32
    %269 = vector.broadcast %cst_152 : f32 to vector<16x1xf32>
    %270 = arith.divf %268, %269 : vector<16x1xf32>
    %271 = vector.broadcast %270 : vector<16x1xf32> to vector<16x32xf32>
    %272 = arith.subf %266, %271 : vector<16x32xf32>
    %273 = arith.mulf %272, %272 : vector<16x32xf32>
    %cst_153 = arith.constant dense<0.000000e+00> : vector<16xf32>
    %274 = vector.multi_reduction <add>, %273, %cst_153 [1] : vector<16x32xf32> to vector<16xf32>
    %275 = vector.shape_cast %274 : vector<16xf32> to vector<16x1xf32>
    %cst_154 = arith.constant 3.200000e+01 : f32
    %276 = vector.broadcast %cst_154 : f32 to vector<16x1xf32>
    %277 = arith.divf %275, %276 : vector<16x1xf32>
    %278 = vector.broadcast %270 : vector<16x1xf32> to vector<16x32xf32>
    %279 = arith.subf %266, %278 : vector<16x32xf32>
    %cst_155 = arith.constant 9.99999974E-6 : f32
    %280 = vector.broadcast %cst_155 : f32 to vector<16x1xf32>
    %281 = arith.addf %277, %280 : vector<16x1xf32>
    %282 = math.rsqrt %281 : vector<16x1xf32>
    %283 = vector.broadcast %282 : vector<16x1xf32> to vector<16x32xf32>
    %284 = arith.mulf %279, %283 : vector<16x32xf32>
    %285 = vector.broadcast %220 : vector<1x32xf32> to vector<16x32xf32>
    %286 = arith.mulf %284, %285 : vector<16x32xf32>
    %287 = vector.broadcast %222 : vector<1x32xf32> to vector<16x32xf32>
    %288 = arith.addf %286, %287 : vector<16x32xf32>
    %289 = vector.extract_strided_slice %204 {offsets = [0, 0], sizes = [32, 32], strides = [1, 1]} : vector<32x96xf32> to vector<32x32xf32>
    %cst_156 = arith.constant dense<0.000000e+00> : vector<16x32xf32>
    %290 = tpu.matmul %288, %289, %cst_156 {dimension_numbers = #tpu.dot_dimension_numbers<[1], [0], [0], [1], [0, 0, 1, 1], [], []>} : vector<16x32xf32>, vector<32x32xf32>, vector<16x32xf32> -> vector<16x32xf32>
    %291 = vector.extract_strided_slice %206 {offsets = [0, 0], sizes = [1, 32], strides = [1, 1]} : vector<1x96xf32> to vector<1x32xf32>
    %292 = vector.broadcast %291 : vector<1x32xf32> to vector<16x32xf32>
    %293 = arith.addf %290, %292 : vector<16x32xf32>
    %cst_157 = arith.constant 0.353553385 : f32
    %294 = vector.broadcast %cst_157 : f32 to vector<16x32xf32>
    %295 = arith.mulf %293, %294 : vector<16x32xf32>
    %296 = vector.extract_strided_slice %204 {offsets = [0, 32], sizes = [32, 64], strides = [1, 1]} : vector<32x96xf32> to vector<32x64xf32>
    %cst_158 = arith.constant dense<0.000000e+00> : vector<32x64xf32>
    %297 = tpu.matmul %5, %296, %cst_158 {dimension_numbers = #tpu.dot_dimension_numbers<[1], [0], [0], [1], [0, 0, 1, 1], [], []>} : vector<32x32xf32>, vector<32x64xf32>, vector<32x64xf32> -> vector<32x64xf32>
    %298 = vector.extract_strided_slice %206 {offsets = [0, 32], sizes = [1, 64], strides = [1, 1]} : vector<1x96xf32> to vector<1x64xf32>
    %299 = vector.broadcast %298 : vector<1x64xf32> to vector<32x64xf32>
    %300 = arith.addf %297, %299 : vector<32x64xf32>
    %301 = vector.extract_strided_slice %300 {offsets = [0, 0], sizes = [32, 32], strides = [1, 1]} : vector<32x64xf32> to vector<32x32xf32>
    %302 = vector.extract_strided_slice %300 {offsets = [0, 32], sizes = [32, 32], strides = [1, 1]} : vector<32x64xf32> to vector<32x32xf32>
    %303 = vector.shape_cast %295 : vector<16x32xf32> to vector<2x8x4x8xf32>
    %304 = tpu.transpose %303, [0, 2, 1, 3] : vector<2x8x4x8xf32> -> vector<2x4x8x8xf32>
    %305 = vector.shape_cast %304 : vector<2x4x8x8xf32> to vector<8x8x8xf32>
    %306 = vector.shape_cast %301 : vector<32x32xf32> to vector<2x16x4x8xf32>
    %307 = tpu.transpose %306, [0, 2, 1, 3] : vector<2x16x4x8xf32> -> vector<2x4x16x8xf32>
    %308 = vector.shape_cast %307 : vector<2x4x16x8xf32> to vector<8x16x8xf32>
    %309 = vector.shape_cast %302 : vector<32x32xf32> to vector<2x16x4x8xf32>
    %310 = tpu.transpose %309, [0, 2, 1, 3] : vector<2x16x4x8xf32> -> vector<2x4x16x8xf32>
    %311 = vector.shape_cast %310 : vector<2x4x16x8xf32> to vector<8x16x8xf32>
    "tpu.trace_start"() <{level = 10 : i32, message = "gtd,gsd->gts"}> : () -> ()
    %cst_159 = arith.constant dense<0.000000e+00> : vector<8x8x16xf32>
    %312 = tpu.matmul %305, %308, %cst_159 {dimension_numbers = #tpu.dot_dimension_numbers<[2], [2], [1], [1], [0, 0, 0, 1, 1, 1], [0], [0]>} : vector<8x8x8xf32>, vector<8x16x8xf32>, vector<8x8x16xf32> -> vector<8x8x16xf32>
    "tpu.trace_stop"() : () -> ()
    %cst_160 = arith.constant dense<0xFF800000> : vector<8x8xf32>
    %313 = vector.multi_reduction <maximumf>, %312, %cst_160 [2] : vector<8x8x16xf32> to vector<8x8xf32>
    %314 = vector.shape_cast %313 : vector<8x8xf32> to vector<8x8x1xf32>
    %315 = vector.broadcast %314 : vector<8x8x1xf32> to vector<8x8x16xf32>
    %316 = arith.subf %312, %315 : vector<8x8x16xf32>
    %317 = math.exp %316 : vector<8x8x16xf32>
    %cst_161 = arith.constant dense<0.000000e+00> : vector<8x8xf32>
    %318 = vector.multi_reduction <add>, %317, %cst_161 [2] : vector<8x8x16xf32> to vector<8x8xf32>
    %319 = vector.shape_cast %318 : vector<8x8xf32> to vector<8x8x1xf32>
    %320 = tpu.reciprocal %319 {approx = true} : vector<8x8x1xf32> -> vector<8x8x1xf32>
    %321 = vector.broadcast %320 : vector<8x8x1xf32> to vector<8x8x16xf32>
    %322 = arith.mulf %317, %321 : vector<8x8x16xf32>
    "tpu.trace_start"() <{level = 10 : i32, message = "gts,gsd->gtd"}> : () -> ()
    %cst_162 = arith.constant dense<0.000000e+00> : vector<8x8x8xf32>
    %323 = tpu.matmul %322, %311, %cst_162 {dimension_numbers = #tpu.dot_dimension_numbers<[2], [1], [1], [2], [0, 0, 0, 1, 1, 2], [0], [0]>} : vector<8x8x16xf32>, vector<8x16x8xf32>, vector<8x8x8xf32> -> vector<8x8x8xf32>
    "tpu.trace_stop"() : () -> ()
    %324 = vector.shape_cast %323 : vector<8x8x8xf32> to vector<2x4x8x8xf32>
    %325 = tpu.transpose %324, [0, 2, 1, 3] : vector<2x4x8x8xf32> -> vector<2x8x4x8xf32>
    %326 = vector.shape_cast %325 : vector<2x8x4x8xf32> to vector<16x32xf32>
    %cst_163 = arith.constant dense<0.000000e+00> : vector<16x32xf32>
    %327 = tpu.matmul %326, %208, %cst_163 {dimension_numbers = #tpu.dot_dimension_numbers<[1], [0], [0], [1], [0, 0, 1, 1], [], []>} : vector<16x32xf32>, vector<32x32xf32>, vector<16x32xf32> -> vector<16x32xf32>
    %328 = vector.broadcast %210 : vector<1x32xf32> to vector<16x32xf32>
    %329 = arith.addf %327, %328 : vector<16x32xf32>
    %330 = arith.addf %288, %329 : vector<16x32xf32>
    %cst_164 = arith.constant dense<0.000000e+00> : vector<16xf32>
    %331 = vector.multi_reduction <add>, %330, %cst_164 [1] : vector<16x32xf32> to vector<16xf32>
    %332 = vector.shape_cast %331 : vector<16xf32> to vector<16x1xf32>
    %cst_165 = arith.constant 3.200000e+01 : f32
    %333 = vector.broadcast %cst_165 : f32 to vector<16x1xf32>
    %334 = arith.divf %332, %333 : vector<16x1xf32>
    %335 = vector.broadcast %334 : vector<16x1xf32> to vector<16x32xf32>
    %336 = arith.subf %330, %335 : vector<16x32xf32>
    %337 = arith.mulf %336, %336 : vector<16x32xf32>
    %cst_166 = arith.constant dense<0.000000e+00> : vector<16xf32>
    %338 = vector.multi_reduction <add>, %337, %cst_166 [1] : vector<16x32xf32> to vector<16xf32>
    %339 = vector.shape_cast %338 : vector<16xf32> to vector<16x1xf32>
    %cst_167 = arith.constant 3.200000e+01 : f32
    %340 = vector.broadcast %cst_167 : f32 to vector<16x1xf32>
    %341 = arith.divf %339, %340 : vector<16x1xf32>
    %342 = vector.broadcast %334 : vector<16x1xf32> to vector<16x32xf32>
    %343 = arith.subf %330, %342 : vector<16x32xf32>
    %cst_168 = arith.constant 9.99999974E-6 : f32
    %344 = vector.broadcast %cst_168 : f32 to vector<16x1xf32>
    %345 = arith.addf %341, %344 : vector<16x1xf32>
    %346 = math.rsqrt %345 : vector<16x1xf32>
    %347 = vector.broadcast %346 : vector<16x1xf32> to vector<16x32xf32>
    %348 = arith.mulf %343, %347 : vector<16x32xf32>
    %349 = vector.broadcast %224 : vector<1x32xf32> to vector<16x32xf32>
    %350 = arith.mulf %348, %349 : vector<16x32xf32>
    %351 = vector.broadcast %226 : vector<1x32xf32> to vector<16x32xf32>
    %352 = arith.addf %350, %351 : vector<16x32xf32>
    %cst_169 = arith.constant dense<0.000000e+00> : vector<16x64xf32>
    %353 = tpu.matmul %352, %212, %cst_169 {dimension_numbers = #tpu.dot_dimension_numbers<[1], [0], [0], [1], [0, 0, 1, 1], [], []>} : vector<16x32xf32>, vector<32x64xf32>, vector<16x64xf32> -> vector<16x64xf32>
    %354 = vector.broadcast %214 : vector<1x64xf32> to vector<16x64xf32>
    %355 = arith.addf %353, %354 : vector<16x64xf32>
    %cst_170 = arith.constant 0.000000e+00 : f32
    %356 = vector.broadcast %cst_170 : f32 to vector<16x64xf32>
    %357 = arith.maximumf %355, %356 : vector<16x64xf32>
    %cst_171 = arith.constant dense<0.000000e+00> : vector<16x32xf32>
    %358 = tpu.matmul %357, %216, %cst_171 {dimension_numbers = #tpu.dot_dimension_numbers<[1], [0], [0], [1], [0, 0, 1, 1], [], []>} : vector<16x64xf32>, vector<64x32xf32>, vector<16x32xf32> -> vector<16x32xf32>
    %359 = vector.broadcast %218 : vector<1x32xf32> to vector<16x32xf32>
    %360 = arith.addf %358, %359 : vector<16x32xf32>
    %361 = arith.addf %352, %360 : vector<16x32xf32>
    %cst_172 = arith.constant dense<0.000000e+00> : vector<16xf32>
    %362 = vector.multi_reduction <add>, %361, %cst_172 [1] : vector<16x32xf32> to vector<16xf32>
    %363 = vector.shape_cast %362 : vector<16xf32> to vector<16x1xf32>
    %cst_173 = arith.constant 3.200000e+01 : f32
    %364 = vector.broadcast %cst_173 : f32 to vector<16x1xf32>
    %365 = arith.divf %363, %364 : vector<16x1xf32>
    %366 = vector.broadcast %365 : vector<16x1xf32> to vector<16x32xf32>
    %367 = arith.subf %361, %366 : vector<16x32xf32>
    %368 = arith.mulf %367, %367 : vector<16x32xf32>
    %cst_174 = arith.constant dense<0.000000e+00> : vector<16xf32>
    %369 = vector.multi_reduction <add>, %368, %cst_174 [1] : vector<16x32xf32> to vector<16xf32>
    %370 = vector.shape_cast %369 : vector<16xf32> to vector<16x1xf32>
    %cst_175 = arith.constant 3.200000e+01 : f32
    %371 = vector.broadcast %cst_175 : f32 to vector<16x1xf32>
    %372 = arith.divf %370, %371 : vector<16x1xf32>
    %373 = vector.broadcast %365 : vector<16x1xf32> to vector<16x32xf32>
    %374 = arith.subf %361, %373 : vector<16x32xf32>
    %cst_176 = arith.constant 9.99999974E-6 : f32
    %375 = vector.broadcast %cst_176 : f32 to vector<16x1xf32>
    %376 = arith.addf %372, %375 : vector<16x1xf32>
    %377 = math.rsqrt %376 : vector<16x1xf32>
    %378 = vector.broadcast %377 : vector<16x1xf32> to vector<16x32xf32>
    %379 = arith.mulf %374, %378 : vector<16x32xf32>
    %380 = vector.broadcast %228 : vector<1x32xf32> to vector<16x32xf32>
    %381 = arith.mulf %379, %380 : vector<16x32xf32>
    %382 = vector.broadcast %230 : vector<1x32xf32> to vector<16x32xf32>
    %383 = arith.addf %381, %382 : vector<16x32xf32>
    %384 = vector.shape_cast %383 : vector<16x32xf32> to vector<2x8x32xf32>
    %385 = tpu.transpose %384, [1, 0, 2] : vector<2x8x32xf32> -> vector<8x2x32xf32>
    %c0_177 = arith.constant 0 : index
    %c0_178 = arith.constant 0 : index
    %c0_179 = arith.constant 0 : index
    %386 = vector.load %arg20[%c0_177, %c0_178, %c0_179] : memref<8x2x32xf32, #tpu.memory_space<vmem>>, vector<8x2x32xf32>
    tpu.vector_store %arg20[%c0_177, %c0_178, %c0_179], %385 {strides = array<i32>} : memref<8x2x32xf32, #tpu.memory_space<vmem>>, vector<8x2x32xf32>,
    return
  }
}

</mosaic_0001>

<bundles_post_ra>
// kernel: tpu_custom_call.1
= control target key start
LH: loop header
LB: loop body
LE: loop exit
PB: predicated region body
PF: predicated region fallthrough
CT: control target
= control target key end

     0   :  { %s17360_s0 = inlined_call_operand.hbm [shape: f32[8,2,32], index: 0, kind: input, shape index: {}]   ;;  %s17361_s1 = inlined_call_operand.hbm [shape: f32[16,2,32], index: 1, kind: input, shape index: {}]   ;;  %s17362_s2 = inlined_call_operand.vmem [shape: f32[2,32,96], index: 2, kind: input, shape index: {}]   ;;  %s17363_s3 = inlined_call_operand.vmem [shape: f32[2,1,96], index: 3, kind: input, shape index: {}]   ;;  %s17364_s4 = inlined_call_operand.vmem [shape: f32[2,32,32], index: 4, kind: input, shape index: {}]   ;;  %s17365_s5 = inlined_call_operand.vmem [shape: f32[2,1,32], index: 5, kind: input, shape index: {}]   ;;  %s17366_s6 = inlined_call_operand.vmem [shape: f32[2,32,96], index: 6, kind: input, shape index: {}]   ;;  %s17367_s7 = inlined_call_operand.vmem [shape: f32[2,1,96], index: 7, kind: input, shape index: {}]   ;;  %s17368_s8 = inlined_call_operand.hbm [shape: f32[2,32,32], index: 8, kind: input, shape index: {}]   ;;  %s17369_s9 = inlined_call_operand.vmem [shape: f32[2,1,32], index: 9, kind: input, shape index: {}]   ;;  %s17370_s10 = inlined_call_operand.hbm [shape: f32[2,32,64], index: 10, kind: input, shape index: {}]   ;;  %s17371_s11 = inlined_call_operand.vmem [shape: f32[2,1,64], index: 11, kind: input, shape index: {}]   ;;  %s17372_s12 = inlined_call_operand.vmem [shape: f32[2,64,32], index: 12, kind: input, shape index: {}]   ;;  %s17373_s13 = inlined_call_operand.vmem [shape: f32[2,1,32], index: 13, kind: input, shape index: {}]   ;;  %s17374_s14 = inlined_call_operand.vmem [shape: f32[2,1,32], index: 14, kind: input, shape index: {}]   ;;  %s17375_s15 = inlined_call_operand.vmem [shape: f32[2,1,32], index: 15, kind: input, shape index: {}]   ;;  %s17376_s16 = inlined_call_operand.vmem [shape: f32[2,1,32], index: 16, kind: input, shape index: {}]   ;;  %s17377_s17 = inlined_call_operand.vmem [shape: f32[2,1,32], index: 17, kind: input, shape index: {}]   ;;  %s17378_s18 = inlined_call_operand.vmem [shape: f32[2,1,32], index: 18, kind: input, shape index: {}]   ;;  %s17379_s19 = inlined_call_operand.vmem [shape: f32[2,1,32], index: 19, kind: input, shape index: {}]   ;;  %s17380_s20 = inlined_call_operand.hbm [shape: f32[8,2,32], index: 20, kind: output, shape index: {}]  }
   0x1   :  { %17407 = sst [smem:[#allocation19_spill]] %s17360_s0 }
   0x2   :  { %17408 = sst [smem:[#allocation20_spill]] %s17361_s1 }
   0x3   :  { %17409 = sst [smem:[#allocation21_spill]] %s17362_s2 }
   0x4   :  { %17410 = sst [smem:[#allocation22_spill]] %s17363_s3 }
   0x5   :  { %17411 = sst [smem:[#allocation23_spill]] %s17364_s4 }
   0x6   :  { %17412 = sst [smem:[#allocation24_spill]] %s17380_s20 }
   0x7   :  { %25 = vsyncpa [#allocation3], 0 }
   0x8   :  { %26 = vsyncpa [#allocation6], 0 }
   0x9   :  { %27 = vsyncpa [#allocation9], 0 }
   0xa   :  { %28 = vsyncpa [#allocation4], 0  ;;  %s14812_s1 = smov [#allocation5]   ;;  %s14813_s23 = smov [#allocation2]  }
   0xb   :  { %s46_s22 = sshll.u32 %s14812_s1, 4  ;;  %s34_s24 = sshll.u32 %s14813_s23, 4  ;;  %s47_s22 = int_to_ptr.vmem [resolvable:$true] %s46_s22  ;;  %s14938_s24 = int_to_ptr.vmem [resolvable:$true] %s34_s24 }
   0xc   :  { %s17413_s3 = sld [smem:[#allocation20_spill]] }
  0x12   :  { %s14694_s26 = scalar_lea.hbm %s17413_s3, 512 }
  0x13   :  { %p14695_p0 = scmp.ne.s32.totalorder %s17413_s3, %s14694_s26  ;;  %p14698_p1 = scmp.lt.u32.totalorder %s14694_s26, %s17413_s3 }
  0x15   :  { %p14700_p2 = pnand %p14698_p1, %p14695_p0 }
  0x17   :  { %14703 = shalt.err (!%p14700_p2)
}
  0x18   :  { %s14704_s30 = scalar_lea.vmem %s47_s22, 512  ;;  %p14709_p4 = scmp.lt.s32.totalorder %s47_s22, %s47_s22 }
  0x19   :  { %p14705_p3 = scmp.ne.s32.totalorder %s47_s22, %s14704_s30  ;;  %p14710_p5 = scmp.lt.s32.totalorder %s14704_s30, %s14704_s30 }
  0x1b   :  { %p14711_p6 = por %p14710_p5, %p14709_p4 }
  0x1d   :  { %p14712_p7 = pnand %p14711_p6, %p14705_p3 }
  0x1f   :  { %14715 = shalt.err (!%p14712_p7)
}
  0x20   :  { %s17387_s0 = smov 32   ;;  %s17396_s21 = smov 2  }
  0x21   :  { %52 = dma.hbm_to_vmem [thread:$0]  %s17413_s3, 512, %s47_s22, [#allocation6], %s17387_s0, %s17387_s0, %s17396_s21  }
  0x22   :  { %s17414_s26 = sld [smem:[#allocation19_spill]] }
  0x28   :  { %s14716_s27 = scalar_lea.hbm %s17414_s26, 256 }
  0x29   :  { %p14717_p8 = scmp.ne.s32.totalorder %s17414_s26, %s14716_s27  ;;  %p14720_p9 = scmp.lt.u32.totalorder %s14716_s27, %s17414_s26 }
  0x2b   :  { %p14722_p10 = pnand %p14720_p9, %p14717_p8 }
  0x2d   :  { %14725 = shalt.err (!%p14722_p10)
}
  0x2e   :  { %s14726_s20 = scalar_lea.vmem %s14938_s24, 256  ;;  %p14731_p12 = scmp.lt.s32.totalorder %s14938_s24, %s14938_s24 }
  0x2f   :  { %p14727_p11 = scmp.ne.s32.totalorder %s14938_s24, %s14726_s20  ;;  %p14732_p13 = scmp.lt.s32.totalorder %s14726_s20, %s14726_s20 }
  0x31   :  { %p14733_p0 = por %p14732_p13, %p14731_p12 }
  0x33   :  { %p14734_p1 = pnand %p14733_p0, %p14727_p11 }
  0x35   :  { %14737 = shalt.err (!%p14734_p1)
}
  0x36   :  { %40 = dma.hbm_to_vmem [thread:$0]  %s17414_s26, 256, %s14938_s24, [#allocation3], %s17387_s0, %s17387_s0, %s17396_s21  }
  0x37   :  { %s14816_s1 = smov [#allocation7]   ;;  %s14738_s27 = scalar_lea.hbm %s17368_s8, 1024 }
  0x38   :  { %s70_s23 = sshll.u32 %s14816_s1, 4  ;;  %p14739_p2 = scmp.ne.s32.totalorder %s17368_s8, %s14738_s27  ;;  %s71_s23 = int_to_ptr.vmem [resolvable:$true] %s70_s23 }
  0x39   :  { %p14742_p3 = scmp.lt.u32.totalorder %s14738_s27, %s17368_s8 }
  0x3b   :  { %p14744_p4 = pnand %p14742_p3, %p14739_p2 }
  0x3d   :  { %14747 = shalt.err (!%p14744_p4)
}
  0x3e   :  { %s14748_s30 = scalar_lea.vmem %s71_s23, 1024  ;;  %p14753_p6 = scmp.lt.s32.totalorder %s71_s23, %s71_s23 }
  0x3f   :  { %p14749_p5 = scmp.ne.s32.totalorder %s71_s23, %s14748_s30  ;;  %p14754_p7 = scmp.lt.s32.totalorder %s14748_s30, %s14748_s30 }
  0x41   :  { %p14755_p8 = por %p14754_p7, %p14753_p6 }
  0x43   :  { %p14756_p9 = pnand %p14755_p8, %p14749_p5 }
  0x45   :  { %14759 = shalt.err (!%p14756_p9)
}
  0x46   :  { %s14817_s24 = smov 128   ;;  %s17401_s26 = smov 8  }
  0x47   :  { %76 = dma.hbm_to_vmem [thread:$0]  %s17368_s8, 1024, %s71_s23, [#allocation6], %s14817_s24, %s14817_s24, %s17401_s26  }
  0x48   :  { %s14819_s1 = smov [#allocation8]   ;;  %s14760_s28 = scalar_lea.hbm %s17370_s10, 1024 }
  0x49   :  { %s84_s2 = sshll.u32 %s14819_s1, 4  ;;  %p14761_p10 = scmp.ne.s32.totalorder %s17370_s10, %s14760_s28  ;;  %s85_s2 = int_to_ptr.vmem [resolvable:$true] %s84_s2 }
  0x4a   :  { %p14764_p11 = scmp.lt.u32.totalorder %s14760_s28, %s17370_s10 }
  0x4c   :  { %p14766_p12 = pnand %p14764_p11, %p14761_p10 }
  0x4e   :  { %14769 = shalt.err (!%p14766_p12)
}
  0x4f   :  { %s14770_s0 = scalar_lea.vmem %s85_s2, 1024  ;;  %p14775_p0 = scmp.lt.s32.totalorder %s85_s2, %s85_s2 }
  0x50   :  { %p14771_p13 = scmp.ne.s32.totalorder %s85_s2, %s14770_s0  ;;  %p14776_p1 = scmp.lt.s32.totalorder %s14770_s0, %s14770_s0 }
  0x52   :  { %p14777_p2 = por %p14776_p1, %p14775_p0 }
  0x54   :  { %p14778_p3 = pnand %p14777_p2, %p14771_p13 }
  0x56   :  { %14781 = shalt.err (!%p14778_p3)
}
  0x57   :  { %90 = dma.hbm_to_vmem [thread:$0]  %s17370_s10, 1024, %s85_s2, [#allocation9], %s14817_s24, %s14817_s24, %s17401_s26  }
  0x58   :  { %14804 = dma.done.wait [#allocation3], 256  }
  0x59   :  { %14805 = vsyncadd [#allocation3], 4294967040 }
  0x5a   :  { %14806 = dma.done.wait [#allocation6], 1536  }
  0x5b   :  { %14807 = vsyncadd [#allocation6], 4294965760 }
  0x5c   :  { %14808 = dma.done.wait [#allocation9], 1024  }
  0x5d   :  { %14809 = vsyncadd [#allocation9], 4294966272  ;;  %v14820_v0 = vmov 1983009808   ;;  %v133_v2 = vlaneseq  ;;  %v14821_v5 = vmov 1934713408  }
  0x5e   :  { %v131_v1 = vunpack.c.l.s4 %v14820_v0  ;;  %v163_v6 = vunpack.c.l.s4 %v14821_v5  ;;  %s17415_s3 = sld [smem:[#allocation21_spill]]  ;;  %v14682_v15 = vld.sshfl [vmem:[#allocation2] sm:$0xf pattern:$0x76325410]  ;;  %vm341_vm0 = vcmask 261120  }
  0x5f   :  { %v134_v4 = vshrl.u32 %v133_v2, 7  ;;  %v14683_v16 = vld.sshfl [vmem:[#allocation2 + $0x2] sm:$0xf pattern:$0x76325410]  ;;  %s17416_s4 = sld [smem:[#allocation22_spill]] }
  0x60   :  { %v132_v3 = vunpack.c.0.s8 %v131_v1  ;;  %v164_v14 = vunpack.c.0.s8 %v163_v6  ;;  %v14684_v17 = vld.sshfl [vmem:[#allocation2 + $0x8] sm:$0xf pattern:$0x76325410]  ;;  %v161_v20 = vcombine.low %v14682_v15, %v14683_v16  ;;  %s14822_s29 = smov 104   ;;  %s14823_s30 = smov 120  }
  0x61   :  { %v14685_v18 = vld.sshfl [vmem:[#allocation2 + $0xa] sm:$0xf pattern:$0x76325410]  ;;  %s14824_s8 = smov 112   ;;  %s14825_s23 = smov 96  }
  0x62   :  { %v15013_v13 = vsub.s32 %v132_v3, %v134_v4  ;;  %v15015_v19 = vsub.s32 %v164_v14, %v134_v4  ;;  %v169_v21 = vcombine.low %v14684_v17, %v14685_v18  ;;  %v17388_v37 = vmov 0.0   ;;  %s14827_s0 = smov 64   ;;  %s17399_s22 = smov 16  }
  0x63   :  { %13698 = vmatprep.subr.mxu0 %v17388_v37  ;;  %vm14828_vm1 = vmmov 0   ;;  %vm1323_vm2 = vcmask 64512   ;;  %s17397_s1 = smov 24   ;;  %s17417_s24 = sld [smem:[#allocation23_spill]]  ;;  %vm2902_vm3 = vcmask 130048   ;;  %vm2905_vm4 = vcmask 195584  }
  0x64   :  { %v295_v7 = vld [vmem:[%s17415_s3] sm:$0xff]  ;;  %v296_v8 = vld [vmem:[%s17415_s3 + $0x8] sm:$0xff]  ;;  %v297_v9 = vld [vmem:[%s17415_s3 + $0x10] sm:$0xff]  ;;  %v168_v22 = vrot.slane %v161_v20, %v15015_v19  ;;  %v176_v23 = vrot.slane %v169_v21, %v15015_v19  ;;  %13700 = vmatprep.mubr.msk.f32.mxu0 %vm14828_vm1, %v17388_v37  ;;  %vm6545_vm6 = vcmask 523264   ;;  %s17431_s27 = smov 24   ;;  %vm13113_vm7 = vcmask 254976  }
  0x65   :  { %v14237_v10 = vpack.c.bf16 %v296_v8, %v295_v7  ;;  %v298_v11 = vld [vmem:[%s17415_s3 + $0x18] sm:$0xff]  ;;  %v13141_v26 = vld [vmem:[%s17416_s4] ss:$0 sm:$0xff]  ;;  %vm15708_vm5 = vmpackc.low %vm1323_vm2, %vm1323_vm2 }
  0x66   :  { %v14241_v12 = vpack.c.bf16 %v298_v11, %v297_v9  ;;  %v15019_v24 = vcombine.low %v168_v22, %v176_v23  ;;  %v15021_v25 = vcombine.high %v168_v22, %v176_v23 }
  0x67   :  { %14238 = vmatprep.subr.bf16.mxu1 %v14237_v10 }
  0x68   :  { %14240 = vmatpush3.bf16.msra.mxu1 %v14237_v10  ;;  %13685 = vmatprep.mubr.msk.f32.mxu1 %vm341_vm0, %v15019_v24 }
  0x69   :  { %14242 = vmatprep.subr.bf16.mxu1 %v14241_v12 }
  0x6c   :  { %14244 = vmatpush3.bf16.msra.mxu1 %v14241_v12 }
  0x6d   :  { %13688 = vmatprep.subr.mxu1 %v17388_v37 }
  0x6f   :  { %13686 = vmatmul.mubr.msk.f32.vlgmr.msra.gmra.mrb[0].mxu1 %vm341_vm0, %v15021_v25 }
  0x70   :  { %13690 = vmatprep.mubr.msk.f32.mxu1 %vm14828_vm1, %v17388_v37 }
 0x142   :  { %v13687_v27 = vpop.f32.mrb[0].mxu1 }
 0x143   :  { %v414_v28 = vpop.f32.mrb[1].mxu1  ;;  %v15032_v30 = vadd.f32 %v13687_v27, %v13141_v26 }
 0x144   :  { %v415_v29 = vadd.f32 %v13141_v26, %v414_v28 }
 0x145   :  { %v15070_v38 = vmul.f32 0.35355338, %v15032_v30 }
 0x146   :  { %727 = vrot.lane.b32.xlu1 %v415_v29, %s14822_s29  ;;  %719 = vrot.lane.b32.xlu0 %v415_v29, %s14823_s30  ;;  %v423_v31 = vmul.f32 0.35355338, %v415_v29 }
 0x14a   :  { %721 = vrot.lane.b32.xlu1 %v15032_v30, %s14823_s30  ;;  %723 = vrot.lane.b32.xlu0 %v415_v29, %s14824_s8 }
 0x14e   :  { %729 = vrot.lane.b32.xlu1 %v15032_v30, %s14822_s29  ;;  %725 = vrot.lane.b32.xlu0 %v15032_v30, %s14824_s8 }
 0x152   :  { %731 = vrot.lane.b32.xlu0 %v415_v29, %s14825_s23  ;;  %433 = vrot.lane.b32.xlu1 %v423_v31, %s14824_s8 }
 0x156   :  { %427 = vrot.lane.b32.xlu0 %v423_v31, %s14823_s30 }
 0x1b8   :  { %v15044_v32 = vpop.permute.xlu0 %719  ;;  %v15048_v33 = vpop.permute.xlu1 %727 }
 0x1b9   :  { %735 = vrot.lane.b32.xlu1 %v15044_v32, %s14825_s23 }
 0x1bc   :  { %v15050_v34 = vpop.permute.xlu0 %723  ;;  %v15059_v35 = vpop.permute.xlu1 %721 }
 0x1bd   :  { %743 = vrot.lane.b32.xlu1 %v15048_v33, %s14825_s23  ;;  %739 = vrot.lane.b32.xlu0 %v15050_v34, %s14825_s23 }
 0x1c0   :  { %v15061_v36 = vpop.permute.xlu0 %725  ;;  %v15072_v39 = vpop.permute.xlu1 %729 }
 0x1c1   :  { %733 = vrot.lane.b32.xlu1 %v15032_v30, %s14825_s23  ;;  %439 = vrot.lane.b32.xlu0 %v423_v31, %s14822_s29 }
 0x1c4   :  { %v732_v40 = vpop.permute.xlu0 %731  ;;  %v434_v41 = vpop.permute.xlu1 %433 }
 0x1c5   :  { %741 = vrot.lane.b32.xlu1 %v15061_v36, %s14825_s23  ;;  %737 = vrot.lane.b32.xlu0 %v15059_v35, %s14825_s23  ;;  %v445_v54 = vcombine.low %v423_v31, %v434_v41  ;;  %v446_v55 = vcombine.high %v423_v31, %v434_v41 }
 0x1c7   :  { %v453_v4 = vrot.slane %v445_v54, %v15013_v13  ;;  %v460_v5 = vrot.slane %v446_v55, %v15013_v13 }
 0x1c8   :  { %v428_v42 = vpop.permute.xlu0 %427 }
 0x1c9   :  { %429 = vrot.lane.b32.xlu1 %v15070_v38, %s14823_s30  ;;  %745 = vrot.lane.b32.xlu0 %v15072_v39, %s14825_s23 }
 0x1cd   :  { %441 = vrot.lane.b32.xlu1 %v15070_v38, %s14822_s29  ;;  %435 = vrot.lane.b32.xlu0 %v15070_v38, %s14824_s8 }
 0x1d1   :  { %1027 = vrot.lane.b32.xlu1 %v415_v29, %s14827_s0 }
 0x22b   :  { %v736_v43 = vpop.permute.xlu1 %735 }
 0x22f   :  { %v744_v44 = vpop.permute.xlu1 %743  ;;  %v740_v45 = vpop.permute.xlu0 %739 }
 0x230   :  { %v771_v46 = vcombine.low %v736_v43, %v744_v44  ;;  %v772_v47 = vcombine.high %v736_v43, %v744_v44  ;;  %v755_v48 = vcombine.low %v732_v40, %v740_v45  ;;  %v756_v49 = vcombine.high %v732_v40, %v740_v45 }
 0x232   :  { %v779_v50 = vrot.slane %v771_v46, %v15013_v13  ;;  %v786_v51 = vrot.slane %v772_v47, %v15013_v13  ;;  %v763_v52 = vrot.slane %v755_v48, %v15013_v13  ;;  %v770_v53 = vrot.slane %v756_v49, %v15013_v13 }
 0x233   :  { %v734_v56 = vpop.permute.xlu1 %733  ;;  %v440_v57 = vpop.permute.xlu0 %439 }
 0x234   :  { %v787_v58 = vcombine.low %v763_v52, %v779_v50  ;;  %v788_v59 = vcombine.high %v763_v52, %v779_v50  ;;  %v803_v60 = vcombine.low %v770_v53, %v786_v51  ;;  %v804_v61 = vcombine.high %v770_v53, %v786_v51 }
 0x235   :  { %v461_v62 = vcombine.low %v428_v42, %v440_v57  ;;  %v462_v63 = vcombine.high %v428_v42, %v440_v57 }
 0x236   :  { %v795_v0 = vrot.slane %v787_v58, %v15015_v19  ;;  %v802_v1 = vrot.slane %v788_v59, %v15015_v19  ;;  %v811_v2 = vrot.slane %v803_v60, %v15015_v19  ;;  %v818_v3 = vrot.slane %v804_v61, %v15015_v19 }
 0x237   :  { %v469_v6 = vrot.slane %v461_v62, %v15013_v13  ;;  %v476_v7 = vrot.slane %v462_v63, %v15013_v13  ;;  %v742_v8 = vpop.permute.xlu1 %741  ;;  %v738_v9 = vpop.permute.xlu0 %737 }
 0x238   :  { %v891_v10 = vcombine.low %v795_v0, %v802_v1  ;;  %v13148_v11 = vcombine.high %v795_v0, %v802_v1  ;;  %v907_v12 = vcombine.low %v811_v2, %v818_v3  ;;  %v13149_v14 = vcombine.high %v811_v2, %v818_v3 }
 0x239   :  { %v477_v15 = vcombine.low %v453_v4, %v469_v6  ;;  %v478_v16 = vcombine.high %v453_v4, %v469_v6  ;;  %v493_v17 = vcombine.low %v460_v5, %v476_v7  ;;  %v494_v18 = vcombine.high %v460_v5, %v476_v7 }
 0x23a   :  { %v15100_v20 = vrot.slane %v891_v10, %v15013_v13  ;;  %v15103_v21 = vrot.slane %v13148_v11, %v15013_v13  ;;  %v15106_v22 = vrot.slane %v907_v12, %v15013_v13  ;;  %v15109_v23 = vrot.slane %v13149_v14, %v15013_v13 }
 0x23b   :  { %v485_v26 = vrot.slane %v477_v15, %v15015_v19  ;;  %v492_v27 = vrot.slane %v478_v16, %v15015_v19  ;;  %v501_v28 = vrot.slane %v493_v17, %v15015_v19  ;;  %v508_v29 = vrot.slane %v494_v18, %v15015_v19  ;;  %v430_v31 = vpop.permute.xlu1 %429  ;;  %v746_v40 = vpop.permute.xlu0 %745 }
 0x23c   :  { %v823_v41 = vcombine.low %v734_v56, %v742_v8  ;;  %v824_v42 = vcombine.high %v734_v56, %v742_v8  ;;  %v923_v47 = vcombine.low %v15100_v20, %v15103_v21  ;;  %v939_v48 = vcombine.low %v15106_v22, %v15109_v23 }
 0x23d   :  { %v581_v43 = vcombine.low %v485_v26, %v492_v27  ;;  %v13144_v44 = vcombine.high %v485_v26, %v492_v27  ;;  %v597_v45 = vcombine.low %v501_v28, %v508_v29  ;;  %v13145_v46 = vcombine.high %v501_v28, %v508_v29 }
 0x23e   :  { %v839_v49 = vcombine.low %v738_v9, %v746_v40  ;;  %v840_v50 = vcombine.high %v738_v9, %v746_v40  ;;  %v831_v53 = vrot.slane %v823_v41, %v15013_v13  ;;  %v838_v54 = vrot.slane %v824_v42, %v15013_v13 }
 0x23f   :  { %v15120_v51 = vrot.slane %v581_v43, %v15013_v13  ;;  %v15123_v52 = vrot.slane %v13144_v44, %v15013_v13  ;;  %v442_v55 = vpop.permute.xlu1 %441  ;;  %v436_v56 = vpop.permute.xlu0 %435  ;;  %v15130_v61 = vrot.slane %v597_v45, %v15013_v13  ;;  %v15133_v62 = vrot.slane %v13145_v46, %v15013_v13 }
 0x240   :  { %v847_v57 = vrot.slane %v839_v49, %v15013_v13  ;;  %v854_v58 = vrot.slane %v840_v50, %v15013_v13  ;;  %v529_v59 = vcombine.low %v430_v31, %v442_v55  ;;  %v530_v60 = vcombine.high %v430_v31, %v442_v55 }
 0x241   :  { %v513_v63 = vcombine.low %v15070_v38, %v436_v56  ;;  %v514_v0 = vcombine.high %v15070_v38, %v436_v56 }
 0x242   :  { %v855_v1 = vcombine.low %v831_v53, %v847_v57  ;;  %v856_v2 = vcombine.high %v831_v53, %v847_v57  ;;  %v871_v3 = vcombine.low %v838_v54, %v854_v58  ;;  %v872_v4 = vcombine.high %v838_v54, %v854_v58 }
 0x243   :  { %v537_v5 = vrot.slane %v529_v59, %v15013_v13  ;;  %v544_v6 = vrot.slane %v530_v60, %v15013_v13  ;;  %v521_v7 = vrot.slane %v513_v63, %v15013_v13  ;;  %v528_v8 = vrot.slane %v514_v0, %v15013_v13 }
 0x244   :  { %v863_v9 = vrot.slane %v855_v1, %v15015_v19  ;;  %v870_v10 = vrot.slane %v856_v2, %v15015_v19  ;;  %v879_v11 = vrot.slane %v871_v3, %v15015_v19  ;;  %v886_v38 = vrot.slane %v872_v4, %v15015_v19 }
 0x245   :  { %v545_v12 = vcombine.low %v521_v7, %v537_v5  ;;  %v546_v14 = vcombine.high %v521_v7, %v537_v5  ;;  %v561_v15 = vcombine.low %v528_v8, %v544_v6  ;;  %v562_v16 = vcombine.high %v528_v8, %v544_v6 }
 0x246   :  { %v959_v17 = vcombine.low %v863_v9, %v870_v10  ;;  %v13150_v18 = vcombine.high %v863_v9, %v870_v10  ;;  %v975_v26 = vcombine.low %v879_v11, %v886_v38  ;;  %v13151_v27 = vcombine.high %v879_v11, %v886_v38 }
 0x247   :  { %v553_v28 = vrot.slane %v545_v12, %v15015_v19  ;;  %v560_v29 = vrot.slane %v546_v14, %v15015_v19  ;;  %v569_v31 = vrot.slane %v561_v15, %v15015_v19  ;;  %v576_v40 = vrot.slane %v562_v16, %v15015_v19 }
 0x248   :  { %v966_v41 = vrot.slane %v959_v17, %v15013_v13  ;;  %v974_v42 = vrot.slane %v13150_v18, %v15013_v13  ;;  %v982_v43 = vrot.slane %v975_v26, %v15013_v13  ;;  %v990_v44 = vrot.slane %v13151_v27, %v15013_v13 }
 0x249   :  { %v649_v45 = vcombine.low %v553_v28, %v560_v29  ;;  %v13146_v46 = vcombine.high %v553_v28, %v560_v29  ;;  %v665_v49 = vcombine.low %v569_v31, %v576_v40  ;;  %v13147_v50 = vcombine.high %v569_v31, %v576_v40 }
 0x24a   :  { %v613_v53 = vcombine.low %v15120_v51, %v15123_v52  ;;  %v629_v54 = vcombine.low %v15130_v61, %v15133_v62  ;;  %v991_v55 = vcombine.low %v966_v41, %v974_v42  ;;  %v1007_v56 = vcombine.low %v982_v43, %v990_v44 }
 0x24b   :  { %v656_v57 = vrot.slane %v649_v45, %v15013_v13  ;;  %v664_v58 = vrot.slane %v13146_v46, %v15013_v13  ;;  %v672_v59 = vrot.slane %v665_v49, %v15013_v13  ;;  %v680_v60 = vrot.slane %v13147_v50, %v15013_v13 }
 0x24c   :  { %v931_v63 = vrot.slane %v923_v47, %v15015_v19  ;;  %v947_v0 = vrot.slane %v939_v48, %v15015_v19  ;;  %v924_v1 = vcombine.high %v15100_v20, %v15103_v21  ;;  %v940_v2 = vcombine.high %v15106_v22, %v15109_v23 }
 0x24d   :  { %v681_v3 = vcombine.low %v656_v57, %v664_v58  ;;  %v697_v4 = vcombine.low %v672_v59, %v680_v60  ;;  %v621_v8 = vrot.slane %v613_v53, %v15015_v19  ;;  %v992_v9 = vcombine.high %v966_v41, %v974_v42 }
 0x24e   :  { %v955_v5 = vcombine.low %v931_v63, %v947_v0  ;;  %v938_v6 = vrot.slane %v924_v1, %v15015_v19  ;;  %v954_v7 = vrot.slane %v940_v2, %v15015_v19  ;;  %v637_v47 = vrot.slane %v629_v54, %v15015_v19 }
 0x24f   :  { %v614_v48 = vcombine.high %v15120_v51, %v15123_v52  ;;  %v630_v20 = vcombine.high %v15130_v61, %v15133_v62  ;;  %v1008_v21 = vcombine.high %v982_v43, %v990_v44  ;;  %v999_v23 = vrot.slane %v991_v55, %v15015_v19 }
 0x250   :  { %13689 = vmatpush3.xpose.msk.msra.mxu1 %vm1323_vm2, %v955_v5  ;;  %v957_v22 = vcombine.low %v938_v6, %v954_v7  ;;  %v1015_v10 = vrot.slane %v1007_v56, %v15015_v19  ;;  %v645_v11 = vcombine.low %v621_v8, %v637_v47  ;;  %v956_v51 = vcombine.high %v931_v63, %v947_v0 }
 0x251   :  { %13693 = vmatprep.subr.mxu1 %v17388_v37  ;;  %v628_v38 = vrot.slane %v614_v48, %v15015_v19  ;;  %v644_v12 = vrot.slane %v630_v20, %v15015_v19  ;;  %v689_v61 = vrot.slane %v681_v3, %v15015_v19  ;;  %v705_v62 = vrot.slane %v697_v4, %v15015_v19 }
 0x252   :  { %13699 = vmatpush3.xpose.msk.msra.mxu0 %vm1323_vm2, %v957_v22  ;;  %v1023_v52 = vcombine.low %v999_v23, %v1015_v10  ;;  %v682_v14 = vcombine.high %v656_v57, %v664_v58  ;;  %v698_v15 = vcombine.high %v672_v59, %v680_v60  ;;  %v1006_v17 = vrot.slane %v992_v9, %v15015_v19 }
 0x253   :  { %13691 = vmatmul.mubr.msk.f32.vlgmr.msra.gmra.mrb[2].mxu1 %vm1323_vm2, %v645_v11  ;;  %v647_v16 = vcombine.low %v628_v38, %v644_v12  ;;  %13708 = vmatprep.subr.mxu0 %v17388_v37  ;;  %v1022_v18 = vrot.slane %v1008_v21, %v15015_v19  ;;  %v646_v26 = vcombine.high %v621_v8, %v637_v47  ;;  %v1028_v21 = vpop.permute.xlu1 %1027 }
 0x254   :  { %13694 = vmatpush3.xpose.msk.msra.mxu1 %vm1323_vm2, %v956_v51  ;;  %13695 = vmatprep.mubr.msk.f32.mxu1 %vm14828_vm1, %v17388_v37  ;;  %v713_v27 = vcombine.low %v689_v61, %v705_v62  ;;  %v958_v28 = vcombine.high %v938_v6, %v954_v7  ;;  %v696_v29 = vrot.slane %v682_v14, %v15015_v19 }
 0x255   :  { %13701 = vmatmul.mubr.msk.f32.vlgmr.msra.gmra.mrb[0].mxu0 %vm1323_vm2, %v647_v16  ;;  %13703 = vmatprep.subr.mxu1 %v17388_v37  ;;  %v712_v31 = vrot.slane %v698_v15, %v15015_v19  ;;  %v1024_v40 = vcombine.high %v999_v23, %v1015_v10  ;;  %v1025_v41 = vcombine.low %v1006_v17, %v1022_v18 }
 0x256   :  { %13709 = vmatpush3.xpose.msk.msra.mxu0 %vm1323_vm2, %v1023_v52  ;;  %13710 = vmatprep.mubr.msk.f32.mxu0 %vm14828_vm1, %v17388_v37  ;;  %v648_v42 = vcombine.high %v628_v38, %v644_v12  ;;  %v714_v43 = vcombine.high %v689_v61, %v705_v62  ;;  %v1026_v45 = vcombine.high %v1006_v17, %v1022_v18 }
 0x257   :  { %13696 = vmatmul.mubr.msk.f32.vlgmr.msra.gmra.mrb[4].mxu1 %vm1323_vm2, %v646_v26  ;;  %13718 = vmatprep.subr.mxu0 %v17388_v37  ;;  %v715_v44 = vcombine.low %v696_v29, %v712_v31  ;;  %v716_v46 = vcombine.high %v696_v29, %v712_v31 }
 0x258   :  { %13704 = vmatpush3.xpose.msk.msra.mxu1 %vm1323_vm2, %v958_v28  ;;  %13705 = vmatprep.mubr.msk.f32.mxu1 %vm14828_vm1, %v17388_v37 }
 0x259   :  { %13713 = vmatprep.subr.mxu1 %v17388_v37  ;;  %13711 = vmatmul.mubr.msk.f32.vlgmr.msra.gmra.mrb[2].mxu0 %vm1323_vm2, %v713_v27 }
 0x25a   :  { %13719 = vmatpush3.xpose.msk.msra.mxu0 %vm1323_vm2, %v1025_v41  ;;  %13720 = vmatprep.mubr.msk.f32.mxu0 %vm14828_vm1, %v17388_v37 }
 0x25b   :  { %13706 = vmatmul.mubr.msk.f32.vlgmr.msra.gmra.mrb[6].mxu1 %vm1323_vm2, %v648_v42  ;;  %13728 = vmatprep.subr.mxu0 %v17388_v37 }
 0x25c   :  { %13714 = vmatpush3.xpose.msk.msra.mxu1 %vm1323_vm2, %v1024_v40  ;;  %13715 = vmatprep.mubr.msk.f32.mxu1 %vm14828_vm1, %v17388_v37 }
 0x25d   :  { %13723 = vmatprep.subr.mxu1 %v17388_v37  ;;  %13721 = vmatmul.mubr.msk.f32.vlgmr.msra.gmra.mrb[4].mxu0 %vm1323_vm2, %v715_v44 }
 0x25e   :  { %13730 = vmatprep.mubr.msk.f32.mxu0 %vm14828_vm1, %v17388_v37 }
 0x25f   :  { %13716 = vmatmul.mubr.msk.f32.vlgmr.msra.gmra.mrb[8].mxu1 %vm1323_vm2, %v714_v43 }
 0x260   :  { %13724 = vmatpush3.xpose.msk.msra.mxu1 %vm1323_vm2, %v1026_v45  ;;  %13725 = vmatprep.mubr.msk.f32.mxu1 %vm14828_vm1, %v17388_v37 }
 0x261   :  { %13733 = vmatprep.subr.mxu1 %v17388_v37 }
 0x263   :  { %13726 = vmatmul.mubr.msk.f32.vlgmr.msra.gmra.mrb[10].mxu1 %vm1323_vm2, %v716_v46 }
 0x264   :  { %13735 = vmatprep.mubr.msk.f32.mxu1 %vm14828_vm1, %v17388_v37 }
 0x326   :  { %v1396_v49 = vpop.f32.mrb[2].mxu1 }
 0x327   :  { %v13692_v50 = vpop.f32.mrb[3].mxu1  ;;  %v1932_v53 = vsel %vm1323_vm2, %v1396_v49, -inf }
 0x328   :  { %v1548_v54 = vpop.f32.mrb[0].mxu0  ;;  %1933 = vmax.xlane.f32.xlu0 %v1932_v53 }
 0x329   :  { %v13702_v55 = vpop.f32.mrb[1].mxu0  ;;  %v1938_v58 = vsel %vm1323_vm2, %v1548_v54, -inf }
 0x32a   :  { %v1472_v56 = vpop.f32.mrb[4].mxu1 }
 0x32b   :  { %v13697_v57 = vpop.f32.mrb[5].mxu1  ;;  %v1935_v59 = vsel %vm1323_vm2, %v1472_v56, -inf }
 0x32c   :  { %1939 = vmax.xlane.f32.xlu0 %v1938_v58  ;;  %1936 = vmax.xlane.f32.xlu1 %v1935_v59  ;;  %v1700_v60 = vpop.f32.mrb[2].mxu0 }
 0x32d   :  { %v13712_v63 = vpop.f32.mrb[3].mxu0  ;;  %v1944_v0 = vsel %vm1323_vm2, %v1700_v60, -inf }
 0x32e   :  { %v1624_v1 = vpop.f32.mrb[6].mxu1 }
 0x32f   :  { %v13707_v2 = vpop.f32.mrb[7].mxu1  ;;  %v1941_v3 = vsel %vm1323_vm2, %v1624_v1, -inf }
 0x330   :  { %1942 = vmax.xlane.f32.xlu0 %v1941_v3  ;;  %1945 = vmax.xlane.f32.xlu1 %v1944_v0  ;;  %v1852_v4 = vpop.f32.mrb[4].mxu0 }
 0x331   :  { %v13722_v5 = vpop.f32.mrb[5].mxu0  ;;  %v1950_v6 = vsel %vm1323_vm2, %v1852_v4, -inf }
 0x332   :  { %v1776_v7 = vpop.f32.mrb[8].mxu1 }
 0x333   :  { %v13717_v8 = vpop.f32.mrb[9].mxu1  ;;  %v1947_v9 = vsel %vm1323_vm2, %v1776_v7, -inf }
 0x334   :  { %1948 = vmax.xlane.f32.xlu0 %v1947_v9  ;;  %1951 = vmax.xlane.f32.xlu1 %v1950_v6 }
 0x336   :  { %v1928_v47 = vpop.f32.mrb[10].mxu1 }
 0x337   :  { %v13727_v48 = vpop.f32.mrb[11].mxu1  ;;  %v1953_v20 = vsel %vm1323_vm2, %v1928_v47, -inf }
 0x338   :  { %1954 = vmax.xlane.f32.xlu0 %v1953_v20 }
 0x345   :  { %1035 = vrot.lane.b32.xlu1 %v15050_v34, %s14827_s0 }
 0x349   :  { %1039 = vrot.lane.b32.xlu1 %v15048_v33, %s14827_s0 }
 0x34d   :  { %1029 = vrot.lane.b32.xlu1 %v15032_v30, %s14827_s0 }
 0x34e   :  { %1031 = vrot.lane.b32.xlu0 %v15044_v32, %s14827_s0 }
 0x3b5   :  { %v1934_v22 = vpop.xlane.xlu0 %1933 }
 0x3b6   :  { %v1956_v23 = vsub.f32 %v1396_v49, %v1934_v22 }
 0x3b8   :  { %v1964_v10 = vmul.f32 1.442695, %v1956_v23 }
 0x3b9   :  { %v1937_v11 = vpop.xlane.xlu1 %1936  ;;  %v1940_v38 = vpop.xlane.xlu0 %1939 }
 0x3ba   :  { %14530 = vpow2.f32 %v1964_v10  ;;  %v1957_v12 = vsub.f32 %v1472_v56, %v1937_v11  ;;  %v1958_v51 = vsub.f32 %v1548_v54, %v1940_v38 }
 0x3bc   :  { %v1966_v52 = vmul.f32 1.442695, %v1957_v12  ;;  %v1968_v34 = vmul.f32 1.442695, %v1958_v51 }
 0x3bd   :  { %v1943_v61 = vpop.xlane.xlu0 %1942  ;;  %v1946_v62 = vpop.xlane.xlu1 %1945 }
 0x3be   :  { %14532 = vpow2.f32 %v1966_v52  ;;  %v1959_v33 = vsub.f32 %v1624_v1, %v1943_v61  ;;  %v1960_v14 = vsub.f32 %v1700_v60, %v1946_v62 }
 0x3bf   :  { %14534 = vpow2.f32 %v1968_v34 }
 0x3c0   :  { %v1972_v30 = vmul.f32 1.442695, %v1960_v14  ;;  %v1970_v15 = vmul.f32 1.442695, %v1959_v33 }
 0x3c1   :  { %v1949_v32 = vpop.xlane.xlu0 %1948  ;;  %v1952_v16 = vpop.xlane.xlu1 %1951 }
 0x3c2   :  { %v1961_v17 = vsub.f32 %v1776_v7, %v1949_v32  ;;  %v1962_v18 = vsub.f32 %v1852_v4, %v1952_v16  ;;  %14536 = vpow2.f32 %v1972_v30 }
 0x3c3   :  { %14538 = vpow2.f32 %v1970_v15 }
 0x3c4   :  { %v15241_v26 = vpop.eup %14530  ;;  %v1974_v27 = vmul.f32 1.442695, %v1961_v17  ;;  %v1976_v40 = vmul.f32 1.442695, %v1962_v18 }
 0x3c5   :  { %v1955_v28 = vpop.xlane.xlu0 %1954  ;;  %v1980_v29 = vsel %vm1323_vm2, %v15241_v26, 0.0  ;;  %v1036_v31 = vpop.permute.xlu1 %1035 }
 0x3c6   :  { %14540 = vpow2.f32 %v1974_v27  ;;  %v1963_v41 = vsub.f32 %v1928_v47, %v1955_v28  ;;  %1981 = vadd.xlane.f32.xlu1 %v1980_v29  ;;  %v1051_v43 = vcombine.low %v1028_v21, %v1036_v31  ;;  %v1052_v44 = vcombine.high %v1028_v21, %v1036_v31 }
 0x3c7   :  { %14542 = vpow2.f32 %v1976_v40 }
 0x3c8   :  { %v15245_v42 = vpop.eup %14532  ;;  %v1978_v46 = vmul.f32 1.442695, %v1963_v41  ;;  %v1059_v57 = vrot.slane %v1051_v43, %v15013_v13  ;;  %v1066_v58 = vrot.slane %v1052_v44, %v15013_v13 }
 0x3c9   :  { %v15247_v45 = vpop.eup %14534  ;;  %v1032_v49 = vpop.permute.xlu0 %1031  ;;  %v1983_v50 = vsel %vm1323_vm2, %v15245_v42, 0.0 }
 0x3ca   :  { %v1040_v53 = vpop.permute.xlu1 %1039  ;;  %1984 = vadd.xlane.f32.xlu0 %v1983_v50  ;;  %v1986_v54 = vsel %vm1323_vm2, %v15247_v45, 0.0  ;;  %14544 = vpow2.f32 %v1978_v46 }
 0x3cb   :  { %v1067_v55 = vcombine.low %v1032_v49, %v1040_v53  ;;  %v1068_v56 = vcombine.high %v1032_v49, %v1040_v53  ;;  %1987 = vadd.xlane.f32.xlu1 %v1986_v54 }
 0x3cc   :  { %v15257_v63 = vpop.eup %14536 }
 0x3cd   :  { %v1075_v59 = vrot.slane %v1067_v55, %v15013_v13  ;;  %v1082_v60 = vrot.slane %v1068_v56, %v15013_v13  ;;  %v15259_v4 = vpop.eup %14538  ;;  %v1992_v5 = vsel %vm1323_vm2, %v15257_v63, 0.0 }
 0x3ce   :  { %1993 = vadd.xlane.f32.xlu0 %v1992_v5  ;;  %v1989_v10 = vsel %vm1323_vm2, %v15259_v4, 0.0  ;;  %v1030_v40 = vpop.permute.xlu1 %1029 }
 0x3cf   :  { %v1083_v0 = vcombine.low %v1059_v57, %v1075_v59  ;;  %v1084_v1 = vcombine.high %v1059_v57, %v1075_v59  ;;  %v1099_v2 = vcombine.low %v1066_v58, %v1082_v60  ;;  %v1100_v3 = vcombine.high %v1066_v58, %v1082_v60 }
 0x3d0   :  { %v15263_v6 = vpop.eup %14540 }
 0x3d1   :  { %v1091_v7 = vrot.slane %v1083_v0, %v15015_v19  ;;  %v1098_v8 = vrot.slane %v1084_v1, %v15015_v19  ;;  %v1107_v9 = vrot.slane %v1099_v2, %v15015_v19  ;;  %v1114_v47 = vrot.slane %v1100_v3, %v15015_v19  ;;  %v15273_v11 = vpop.eup %14542 }
 0x3d2   :  { %v1995_v48 = vsel %vm1323_vm2, %v15263_v6, 0.0  ;;  %1990 = vadd.xlane.f32.xlu0 %v1989_v10  ;;  %v1998_v30 = vsel %vm1323_vm2, %v15273_v11, 0.0 }
 0x3d3   :  { %v1187_v20 = vcombine.low %v1091_v7, %v1098_v8  ;;  %v13152_v21 = vcombine.high %v1091_v7, %v1098_v8  ;;  %v1203_v22 = vcombine.low %v1107_v9, %v1114_v47  ;;  %v13153_v23 = vcombine.high %v1107_v9, %v1114_v47  ;;  %1996 = vadd.xlane.f32.xlu1 %v1995_v48 }
 0x3d4   :  { %v15279_v14 = vpop.eup %14544 }
 0x3d5   :  { %v1194_v38 = vrot.slane %v1187_v20, %v15013_v13  ;;  %v1202_v12 = vrot.slane %v13152_v21, %v15013_v13  ;;  %v1210_v51 = vrot.slane %v1203_v22, %v15013_v13  ;;  %v1218_v52 = vrot.slane %v13153_v23, %v15013_v13 }
 0x3d6   :  { %1999 = vadd.xlane.f32.xlu0 %v1998_v30  ;;  %v2001_v31 = vsel %vm1323_vm2, %v15279_v14, 0.0 }
 0x3d7   :  { %v1219_v34 = vcombine.low %v1194_v38, %v1202_v12  ;;  %v1235_v61 = vcombine.low %v1210_v51, %v1218_v52  ;;  %v1220_v62 = vcombine.high %v1194_v38, %v1202_v12  ;;  %v1236_v33 = vcombine.high %v1210_v51, %v1218_v52 }
 0x3d9   :  { %v1227_v15 = vrot.slane %v1219_v34, %v15015_v19  ;;  %v1243_v32 = vrot.slane %v1235_v61, %v15015_v19  ;;  %v1234_v16 = vrot.slane %v1220_v62, %v15015_v19  ;;  %v1250_v17 = vrot.slane %v1236_v33, %v15015_v19 }
 0x3da   :  { %2002 = vadd.xlane.f32.xlu0 %v2001_v31 }
 0x3db   :  { %v1251_v18 = vcombine.low %v1227_v15, %v1243_v32  ;;  %v1252_v27 = vcombine.high %v1227_v15, %v1243_v32  ;;  %v1253_v28 = vcombine.low %v1234_v16, %v1250_v17  ;;  %v1254_v29 = vcombine.high %v1234_v16, %v1250_v17 }
 0x3dd   :  { %13729 = vmatpush3.msra.mxu0 %v1251_v18  ;;  %13734 = vmatpush3.msra.mxu1 %v1252_v27 }
 0x3de   :  { %13738 = vmatprep.subr.mxu0 %v17388_v37  ;;  %13743 = vmatprep.subr.mxu1 %v17388_v37 }
 0x3e4   :  { %1037 = vrot.lane.b32.xlu1 %v15061_v36, %s14827_s0 }
 0x3e8   :  { %1041 = vrot.lane.b32.xlu1 %v15072_v39, %s14827_s0 }
 0x3f0   :  { %1033 = vrot.lane.b32.xlu0 %v15059_v35, %s14827_s0 }
 0x453   :  { %v1982_v41 = vpop.xlane.xlu1 %1981 }
 0x454   :  { %14546 = vrcp.f32 %v1982_v41 }
 0x457   :  { %v1985_v43 = vpop.xlane.xlu0 %1984 }
 0x458   :  { %v1988_v44 = vpop.xlane.xlu1 %1987  ;;  %14548 = vrcp.f32 %v1985_v43 }
 0x459   :  { %14550 = vrcp.f32 %v1988_v44 }
 0x45b   :  { %v1994_v46 = vpop.xlane.xlu0 %1993 }
 0x45e   :  { %v14547_v49 = vpop.eup %14546 }
 0x45f   :  { %v2012_v50 = vmul.f32 %v14547_v49, %v15241_v26  ;;  %v1991_v36 = vpop.xlane.xlu0 %1990 }
 0x460   :  { %v1997_v53 = vpop.xlane.xlu1 %1996  ;;  %14552 = vrcp.f32 %v1991_v36 }
 0x461   :  { %13731 = vmatmul.mubr.msk.f32.vlgmr.msra.gmra.mrb[6].mxu0 %vm1323_vm2, %v2012_v50  ;;  %14554 = vrcp.f32 %v1994_v46 }
 0x462   :  { %v14549_v54 = vpop.eup %14548  ;;  %13739 = vmatpush3.msra.mxu0 %v1253_v28  ;;  %13740 = vmatprep.mubr.msk.f32.mxu0 %vm14828_vm1, %v17388_v37  ;;  %14556 = vrcp.f32 %v1997_v53 }
 0x463   :  { %v14551_v35 = vpop.eup %14550  ;;  %v2013_v39 = vmul.f32 %v14549_v54, %v15245_v42  ;;  %13748 = vmatprep.subr.mxu0 %v17388_v37  ;;  %v2000_v26 = vpop.xlane.xlu0 %1999 }
 0x464   :  { %v2014_v55 = vmul.f32 %v14551_v35, %v15247_v45  ;;  %v1038_v56 = vpop.permute.xlu1 %1037  ;;  %14558 = vrcp.f32 %v2000_v26 }
 0x465   :  { %13736 = vmatmul.mubr.msk.f32.vlgmr.msra.gmra.mrb[12].mxu1 %vm1323_vm2, %v2013_v39  ;;  %v1119_v58 = vcombine.low %v1030_v40, %v1038_v56  ;;  %v1120_v59 = vcombine.high %v1030_v40, %v1038_v56 }
 0x466   :  { %13741 = vmatmul.mubr.msk.f32.vlgmr.msra.gmra.mrb[8].mxu0 %vm1323_vm2, %v2014_v55  ;;  %13744 = vmatpush3.msra.mxu1 %v1254_v29 }
 0x467   :  { %13745 = vmatprep.mubr.msk.f32.mxu1 %vm14828_vm1, %v17388_v37  ;;  %13753 = vmatprep.subr.mxu1 %v17388_v37  ;;  %v2003_v42 = vpop.xlane.xlu0 %2002  ;;  %v1127_v3 = vrot.slane %v1119_v58, %v15013_v13  ;;  %v1134_v5 = vrot.slane %v1120_v59, %v15013_v13 }
 0x468   :  { %13750 = vmatprep.mubr.msk.f32.mxu0 %vm14828_vm1, %v17388_v37  ;;  %v1042_v45 = vpop.permute.xlu1 %1041  ;;  %14560 = vrcp.f32 %v2003_v42 }
 0x46a   :  { %v14553_v57 = vpop.eup %14552 }
 0x46b   :  { %v1034_v60 = vpop.permute.xlu0 %1033  ;;  %v2015_v0 = vmul.f32 %v14553_v57, %v15259_v4  ;;  %v14555_v33 = vpop.eup %14554 }
 0x46c   :  { %v1135_v1 = vcombine.low %v1034_v60, %v1042_v45  ;;  %v1136_v2 = vcombine.high %v1034_v60, %v1042_v45  ;;  %v14557_v17 = vpop.eup %14556  ;;  %v2016_v44 = vmul.f32 %v14555_v33, %v15257_v63 }
 0x46d   :  { %13746 = vmatmul.mubr.msk.f32.vlgmr.msra.gmra.mrb[14].mxu1 %vm1323_vm2, %v2015_v0  ;;  %v2017_v46 = vmul.f32 %v14557_v17, %v15263_v6 }
 0x46e   :  { %v1143_v7 = vrot.slane %v1135_v1, %v15013_v13  ;;  %v1150_v8 = vrot.slane %v1136_v2, %v15013_v13  ;;  %13755 = vmatprep.mubr.msk.f32.mxu1 %vm14828_vm1, %v17388_v37  ;;  %v14559_v28 = vpop.eup %14558 }
 0x46f   :  { %v2018_v53 = vmul.f32 %v14559_v28, %v15273_v11 }
 0x470   :  { %v1151_v9 = vcombine.low %v1127_v3, %v1143_v7  ;;  %v1152_v47 = vcombine.high %v1127_v3, %v1143_v7  ;;  %v1167_v4 = vcombine.low %v1134_v5, %v1150_v8  ;;  %v1168_v48 = vcombine.high %v1134_v5, %v1150_v8 }
 0x472   :  { %v1159_v20 = vrot.slane %v1151_v9, %v15015_v19  ;;  %v1166_v21 = vrot.slane %v1152_v47, %v15015_v19  ;;  %v1175_v22 = vrot.slane %v1167_v4, %v15015_v19  ;;  %v1182_v23 = vrot.slane %v1168_v48, %v15015_v19  ;;  %v14561_v43 = vpop.eup %14560 }
 0x473   :  { %v2019_v63 = vmul.f32 %v14561_v43, %v15279_v14 }
 0x474   :  { %v1255_v10 = vcombine.low %v1159_v20, %v1166_v21  ;;  %v13154_v38 = vcombine.high %v1159_v20, %v1166_v21  ;;  %v1271_v12 = vcombine.low %v1175_v22, %v1182_v23  ;;  %v13155_v51 = vcombine.high %v1175_v22, %v1182_v23 }
 0x476   :  { %v1262_v52 = vrot.slane %v1255_v10, %v15013_v13  ;;  %v1270_v34 = vrot.slane %v13154_v38, %v15013_v13  ;;  %v1278_v61 = vrot.slane %v1271_v12, %v15013_v13  ;;  %v1286_v62 = vrot.slane %v13155_v51, %v15013_v13 }
 0x478   :  { %v1287_v30 = vcombine.low %v1262_v52, %v1270_v34  ;;  %v1303_v15 = vcombine.low %v1278_v61, %v1286_v62  ;;  %v1288_v32 = vcombine.high %v1262_v52, %v1270_v34  ;;  %v1304_v16 = vcombine.high %v1278_v61, %v1286_v62 }
 0x47a   :  { %v1295_v18 = vrot.slane %v1287_v30, %v15015_v19  ;;  %v1311_v27 = vrot.slane %v1303_v15, %v15015_v19  ;;  %v1302_v29 = vrot.slane %v1288_v32, %v15015_v19  ;;  %v1318_v31 = vrot.slane %v1304_v16, %v15015_v19 }
 0x47c   :  { %v1319_v40 = vcombine.low %v1295_v18, %v1311_v27  ;;  %v1320_v41 = vcombine.high %v1295_v18, %v1311_v27  ;;  %v1321_v49 = vcombine.low %v1302_v29, %v1318_v31  ;;  %v1322_v50 = vcombine.high %v1302_v29, %v1318_v31 }
 0x47e   :  { %13749 = vmatpush3.msra.mxu0 %v1319_v40  ;;  %13754 = vmatpush3.msra.mxu1 %v1320_v41 }
 0x47f   :  { %13751 = vmatmul.mubr.msk.f32.vlgmr.msra.gmra.mrb[10].mxu0 %vm1323_vm2, %v2016_v44  ;;  %13756 = vmatmul.mubr.msk.f32.vlgmr.msra.gmra.mrb[16].mxu1 %vm1323_vm2, %v2017_v46 }
 0x480   :  { %13758 = vmatprep.subr.mxu0 %v17388_v37  ;;  %13763 = vmatprep.subr.mxu1 %v17388_v37 }
 0x481   :  { %13759 = vmatpush3.msra.mxu0 %v1321_v49  ;;  %13764 = vmatpush3.msra.mxu1 %v1322_v50 }
 0x482   :  { %13760 = vmatprep.mubr.msk.f32.mxu0 %vm14828_vm1, %v17388_v37  ;;  %13765 = vmatprep.mubr.msk.f32.mxu1 %vm14828_vm1, %v17388_v37 }
 0x483   :  { %13761 = vmatmul.mubr.msk.f32.vlgmr.msra.gmra.mrb[12].mxu0 %vm1323_vm2, %v2018_v53  ;;  %13766 = vmatmul.mubr.msk.f32.vlgmr.msra.gmra.mrb[18].mxu1 %vm1323_vm2, %v2019_v63 }
 0x534   :  { %v2089_v6 = vpop.f32.mrb[6].mxu0 }
 0x535   :  { %v13732_v36 = vpop.f32.mrb[7].mxu0 }
 0x538   :  { %v2162_v54 = vpop.f32.mrb[12].mxu1 }
 0x539   :  { %v2235_v35 = vpop.f32.mrb[8].mxu0  ;;  %v13737_v39 = vpop.f32.mrb[13].mxu1 }
 0x53a   :  { %v2604_v55 = vcombine.low %v2089_v6, %v2235_v35  ;;  %v2605_v26 = vcombine.high %v2089_v6, %v2235_v35  ;;  %v13742_v11 = vpop.f32.mrb[9].mxu0 }
 0x53c   :  { %v2612_v58 = vrot.slane %v2604_v55, %v15013_v13  ;;  %v2619_v59 = vrot.slane %v2605_v26, %v15013_v13  ;;  %v300_v55 = vld [vmem:[%s17417_s24] sm:$0xff]  ;;  %v301_v26 = vld [vmem:[%s17417_s24 + $0x8] sm:$0xff] }
 0x540   :  { %v2308_v56 = vpop.f32.mrb[14].mxu1 }
 0x541   :  { %v2620_v14 = vcombine.low %v2162_v54, %v2308_v56  ;;  %v2621_v42 = vcombine.high %v2162_v54, %v2308_v56  ;;  %v13747_v57 = vpop.f32.mrb[15].mxu1 }
 0x542   :  { %v14245_v57 = vpack.c.bf16 %v301_v26, %v300_v55 }
 0x543   :  { %v2628_v45 = vrot.slane %v2620_v14, %v15013_v13  ;;  %v2635_v60 = vrot.slane %v2621_v42, %v15013_v13 }
 0x544   :  { %14246 = vmatprep.subr.bf16.mxu0 %v14245_v57 }
 0x545   :  { %v2636_v0 = vcombine.low %v2612_v58, %v2628_v45  ;;  %v2637_v1 = vcombine.high %v2612_v58, %v2628_v45  ;;  %v2652_v2 = vcombine.low %v2619_v59, %v2635_v60  ;;  %v2653_v3 = vcombine.high %v2619_v59, %v2635_v60  ;;  %14248 = vmatpush3.bf16.msra.mxu0 %v14245_v57 }
 0x547   :  { %v2644_v5 = vrot.slane %v2636_v0, %v15015_v19  ;;  %v2651_v7 = vrot.slane %v2637_v1, %v15015_v19  ;;  %v2660_v8 = vrot.slane %v2652_v2, %v15015_v19  ;;  %v2667_v9 = vrot.slane %v2653_v3, %v15015_v19  ;;  %v302_v0 = vld [vmem:[%s17417_s24 + $0x10] sm:$0xff]  ;;  %v303_v1 = vld [vmem:[%s17417_s24 + $0x18] sm:$0xff] }
 0x549   :  { %v2740_v47 = vcombine.low %v2644_v5, %v2651_v7  ;;  %v13180_v4 = vcombine.high %v2644_v5, %v2651_v7  ;;  %v2756_v48 = vcombine.low %v2660_v8, %v2667_v9  ;;  %v13181_v20 = vcombine.high %v2660_v8, %v2667_v9 }
 0x54a   :  { %v14249_v8 = vpack.c.bf16 %v303_v1, %v302_v0  ;;  %v14687_v0 = vld.sshfl [vmem:[#allocation5 + $0x2] sm:$0xf pattern:$0x76325410] }
 0x54b   :  { %v2747_v21 = vrot.slane %v2740_v47, %v15013_v13  ;;  %v2755_v22 = vrot.slane %v13180_v4, %v15013_v13  ;;  %v2763_v23 = vrot.slane %v2756_v48, %v15013_v13  ;;  %v2771_v10 = vrot.slane %v13181_v20, %v15013_v13  ;;  %v14688_v1 = vld.sshfl [vmem:[#allocation5 + $0x8] sm:$0xf pattern:$0x76325410] }
 0x54c   :  { %14250 = vmatprep.subr.bf16.mxu0 %v14249_v8 }
 0x54d   :  { %v2772_v38 = vcombine.low %v2747_v21, %v2755_v22  ;;  %v2788_v12 = vcombine.low %v2763_v23, %v2771_v10  ;;  %v2773_v51 = vcombine.high %v2747_v21, %v2755_v22  ;;  %v2789_v52 = vcombine.high %v2763_v23, %v2771_v10  ;;  %14252 = vmatpush3.bf16.msra.mxu0 %v14249_v8 }
 0x54f   :  { %v15358_v34 = vrot.slane %v2772_v38, %v15015_v19  ;;  %v15361_v61 = vrot.slane %v2788_v12, %v15015_v19  ;;  %v2787_v62 = vrot.slane %v2773_v51, %v15015_v19  ;;  %v2803_v33 = vrot.slane %v2789_v52, %v15015_v19 }
 0x551   :  { %v2805_v30 = vcombine.high %v15358_v34, %v15361_v61  ;;  %v2804_v15 = vcombine.low %v15358_v34, %v15361_v61  ;;  %v2806_v32 = vcombine.low %v2787_v62, %v2803_v33  ;;  %v2807_v16 = vcombine.high %v2787_v62, %v2803_v33  ;;  %v13184_v34 = vld [vmem:[%s17365_s5] ss:$0 sm:$0xff] }
 0x552   :  { %v2381_v17 = vpop.f32.mrb[10].mxu0  ;;  %v2454_v18 = vpop.f32.mrb[16].mxu1 }
 0x553   :  { %2878 = vrot.lane.b32.xlu0 %v2805_v30, %s17401_s26  ;;  %v13752_v27 = vpop.f32.mrb[11].mxu0  ;;  %v13757_v28 = vpop.f32.mrb[17].mxu1 }
 0x556   :  { %v2527_v29 = vpop.f32.mrb[12].mxu0  ;;  %v2600_v31 = vpop.f32.mrb[18].mxu1 }
 0x557   :  { %v2672_v40 = vcombine.low %v2381_v17, %v2527_v29  ;;  %v2673_v41 = vcombine.high %v2381_v17, %v2527_v29  ;;  %v2688_v43 = vcombine.low %v2454_v18, %v2600_v31  ;;  %v2689_v44 = vcombine.high %v2454_v18, %v2600_v31  ;;  %2886 = vrot.lane.b32.xlu0 %v2806_v32, %s17399_s22  ;;  %v13762_v46 = vpop.f32.mrb[13].mxu0  ;;  %v13767_v49 = vpop.f32.mrb[19].mxu1 }
 0x559   :  { %v2680_v50 = vrot.slane %v2672_v40, %v15013_v13  ;;  %v2687_v53 = vrot.slane %v2673_v41, %v15013_v13  ;;  %v2696_v63 = vrot.slane %v2688_v43, %v15013_v13  ;;  %v2703_v6 = vrot.slane %v2689_v44, %v15013_v13 }
 0x55b   :  { %v2704_v36 = vcombine.low %v2680_v50, %v2696_v63  ;;  %v2705_v54 = vcombine.high %v2680_v50, %v2696_v63  ;;  %v2720_v35 = vcombine.low %v2687_v53, %v2703_v6  ;;  %v2721_v39 = vcombine.high %v2687_v53, %v2703_v6  ;;  %2894 = vrot.lane.b32.xlu0 %v2807_v16, %s17397_s1  ;;  %v305_v50 = vld [vmem:[%s17366_s6] sm:$0xff]  ;;  %v306_v53 = vld [vmem:[%s17366_s6 + $0x8] sm:$0xff] }
 0x55c   :  { %v14498_v63 = vpack.i.bf16 %v306_v53, %v305_v50  ;;  %v14253_v8 = vpack.c.bf16 %v306_v53, %v305_v50 }
 0x55d   :  { %v2712_v11 = vrot.slane %v2704_v36, %v15015_v19  ;;  %v2719_v56 = vrot.slane %v2705_v54, %v15015_v19  ;;  %v2728_v14 = vrot.slane %v2720_v35, %v15015_v19  ;;  %v2735_v42 = vrot.slane %v2721_v39, %v15015_v19 }
 0x55e   :  { %14254 = vmatprep.subr.bf16.mxu1 %v14253_v8 }
 0x55f   :  { %v2808_v58 = vcombine.low %v2712_v11, %v2719_v56  ;;  %v13182_v59 = vcombine.high %v2712_v11, %v2719_v56  ;;  %v2824_v45 = vcombine.low %v2728_v14, %v2735_v42  ;;  %v13183_v60 = vcombine.high %v2728_v14, %v2735_v42  ;;  %v307_v14 = vld [vmem:[%s17366_s6 + $0x10] sm:$0xff]  ;;  %v308_v42 = vld [vmem:[%s17366_s6 + $0x18] sm:$0xff]  ;;  %14256 = vmatpush3.bf16.msra.mxu1 %v14253_v8 }
 0x561   :  { %v2815_v2 = vrot.slane %v2808_v58, %v15013_v13  ;;  %v2823_v3 = vrot.slane %v13182_v59, %v15013_v13  ;;  %v2831_v5 = vrot.slane %v2824_v45, %v15013_v13  ;;  %v2839_v7 = vrot.slane %v13183_v60, %v15013_v13  ;;  %v14686_v60 = vld.sshfl [vmem:[#allocation5] sm:$0xf pattern:$0x76325410] }
 0x562   :  { %v14503_v59 = vpack.i.bf16 %v308_v42, %v307_v14 }
 0x563   :  { %v2840_v9 = vcombine.low %v2815_v2, %v2823_v3  ;;  %v2856_v47 = vcombine.low %v2831_v5, %v2839_v7  ;;  %v2841_v4 = vcombine.high %v2815_v2, %v2823_v3  ;;  %v2857_v48 = vcombine.high %v2831_v5, %v2839_v7  ;;  %v14689_v2 = vld.sshfl [vmem:[#allocation5 + $0xa] sm:$0xf pattern:$0x76325410] }
 0x564   :  { %v227_v3 = vcombine.low %v14686_v60, %v14687_v0  ;;  %v235_v5 = vcombine.low %v14688_v1, %v14689_v2 }
 0x565   :  { %v2848_v20 = vrot.slane %v2840_v9, %v15015_v19  ;;  %v2864_v21 = vrot.slane %v2856_v47, %v15015_v19  ;;  %v2855_v22 = vrot.slane %v2841_v4, %v15015_v19  ;;  %v2871_v23 = vrot.slane %v2857_v48, %v15015_v19 }
 0x566   :  { %v234_v7 = vrot.slane %v227_v3, %v15015_v19  ;;  %v242_v9 = vrot.slane %v235_v5, %v15015_v19  ;;  %v14257_v48 = vpack.c.bf16 %v308_v42, %v307_v14  ;;  %v17390_v42 = vmov 0.0|0.0  }
 0x567   :  { %v2873_v10 = vcombine.high %v2848_v20, %v2864_v21  ;;  %v2872_v38 = vcombine.low %v2848_v20, %v2864_v21  ;;  %v2874_v12 = vcombine.low %v2855_v22, %v2871_v23  ;;  %v2875_v51 = vcombine.high %v2855_v22, %v2871_v23  ;;  %v15456_v20 = vld [vmem:[%s17367_s7] ss:$0 sm:$0xff]  ;;  %v14691_v22 = vld.sshfl [vmem:[#allocation5 + $0x12] sm:$0xf pattern:$0x76325410] }
 0x568   :  { %v15447_v47 = vcombine.low %v234_v7, %v242_v9  ;;  %v15449_v4 = vcombine.high %v234_v7, %v242_v9  ;;  %14258 = vmatprep.subr.bf16.mxu1 %v14257_v48  ;;  %v14690_v21 = vld.sshfl [vmem:[#allocation5 + $0x10] sm:$0xf pattern:$0x76325410] }
 0x569   :  { %2880 = vrot.lane.b32.xlu1 %v2873_v10, %s17401_s26  ;;  %14260 = vmatpush3.bf16.msra.mxu1 %v14257_v48  ;;  %v14692_v23 = vld.sshfl [vmem:[#allocation5 + $0x18] sm:$0xf pattern:$0x76325410] }
 0x56a   :  { %17418 = vst [vmem:[#allocation15_spill] sm:$0xff] %v15447_v47  ;;  %17419 = vst [vmem:[#allocation16_spill] sm:$0xff] %v15449_v4  ;;  %v14693_v10 = vld.sshfl [vmem:[#allocation5 + $0x1a] sm:$0xf pattern:$0x76325410]  ;;  %14269 = vmatprep.subr.bf16.mxu1 %v17390_v42 }
 0x56d   :  { %2888 = vrot.lane.b32.xlu1 %v2874_v12, %s17399_s22 }
 0x571   :  { %2896 = vrot.lane.b32.xlu1 %v2875_v51, %s17397_s1 }
 0x5c5   :  { %v2879_v52 = vpop.permute.xlu0 %2878 }
 0x5c6   :  { %v2900_v33 = vsel %vm1323_vm2, %v2804_v15, %v2879_v52 }
 0x5c9   :  { %v2887_v62 = vpop.permute.xlu0 %2886 }
 0x5ca   :  { %v2903_v30 = vsel %vm2902_vm3, %v2900_v33, %v2887_v62  ;;  %v277_v62 = vcombine.low %v14690_v21, %v14691_v22 }
 0x5cd   :  { %v2895_v32 = vpop.permute.xlu0 %2894 }
 0x5ce   :  { %v2906_v16 = vsel %vm2905_vm4, %v2903_v30, %v2895_v32  ;;  %v285_v30 = vcombine.low %v14692_v23, %v14693_v10 }
 0x5cf   :  { %13776 = vmatprep.mubr.msk.f32.mxu0 %vm341_vm0, %v2906_v16 }
 0x5db   :  { %v2881_v17 = vpop.permute.xlu1 %2880 }
 0x5dc   :  { %v2901_v27 = vsel %vm1323_vm2, %v2872_v38, %v2881_v17  ;;  %v284_v17 = vrot.slane %v277_v62, %v15015_v19 }
 0x5df   :  { %v2889_v18 = vpop.permute.xlu1 %2888 }
 0x5e0   :  { %v2904_v28 = vsel %vm2902_vm3, %v2901_v27, %v2889_v18 }
 0x5e3   :  { %v2897_v29 = vpop.permute.xlu1 %2896 }
 0x5e4   :  { %v2907_v31 = vsel %vm2905_vm4, %v2904_v28, %v2897_v29  ;;  %v292_v28 = vrot.slane %v285_v30, %v15015_v19 }
 0x5e5   :  { %13777 = vmatmul.mubr.msk.f32.vlgmr.msra.gmra.mrb[14].mxu0 %vm341_vm0, %v2907_v31 }
 0x5e6   :  { %13798 = vmatprep.mubr.msk.f32.mxu0 %vm341_vm0, %v15447_v47  ;;  %v15462_v31 = vcombine.low %v284_v17, %v292_v28 }
 0x5e8   :  { %17420 = vst [vmem:[#allocation17_spill] sm:$0xff] %v15462_v31 }
 0x6b8   :  { %v13778_v61 = vpop.f32.mrb[14].mxu0 }
 0x6b9   :  { %v2992_v15 = vadd.f32 %v13778_v61, %v13184_v34  ;;  %v2986_v40 = vpop.f32.mrb[15].mxu0  ;;  %v15466_v61 = vcombine.high %v284_v17, %v292_v28 }
 0x6ba   :  { %v2987_v41 = vadd.f32 %v13184_v34, %v2986_v40  ;;  %v13187_v40 = vld [vmem:[%s17374_s14] ss:$0 sm:$0xff] }
 0x6bb   :  { %v2996_v43 = vadd.f32 %v2992_v15, %v15021_v25  ;;  %17421 = vst [vmem:[#allocation18_spill] sm:$0xff] %v15466_v61 }
 0x6bc   :  { %v2995_v44 = vadd.f32 %v2987_v41, %v15019_v24 }
 0x6bd   :  { %v3000_v46 = vsel %vm341_vm0, %v2996_v43, 0.0 }
 0x6be   :  { %3001 = vadd.xlane.f32.xlu1 %v3000_v46  ;;  %v2997_v49 = vsel %vm341_vm0, %v2995_v44, 0.0  ;;  %v13188_v46 = vld [vmem:[%s17375_s15] ss:$0 sm:$0xff] }
 0x6bf   :  { %2998 = vadd.xlane.f32.xlu0 %v2997_v49 }
 0x6cf   :  { %14499 = vrot.lane.b32.xlu1 %v14498_v63, %s14825_s23 }
 0x6d3   :  { %3145 = vrot.lane.b32.xlu1 %v15456_v20, %s14825_s23 }
 0x74b   :  { %v3002_v25 = vpop.xlane.xlu1 %3001 }
 0x74c   :  { %v3005_v6 = vmul.f32 0.03125, %v3002_v25  ;;  %v2999_v24 = vpop.xlane.xlu0 %2998 }
 0x74d   :  { %v3004_v36 = vmul.f32 0.03125, %v2999_v24 }
 0x74e   :  { %v15428_v54 = vsub.f32 %v2996_v43, %v3005_v6 }
 0x74f   :  { %v15430_v35 = vsub.f32 %v2995_v44, %v3004_v36  ;;  %v14500_v56 = vpop.permute.xlu1 %14499 }
 0x750   :  { %v3009_v39 = vmul.f32 %v15428_v54, %v15428_v54  ;;  %v14502_v57 = vunpack.i.h.bf16 %v14500_v56  ;;  %v14501_v58 = vunpack.i.l.bf16 %v14500_v56 }
 0x751   :  { %v3008_v26 = vmul.f32 %v15430_v35, %v15430_v35 }
 0x752   :  { %v3013_v55 = vsel %vm341_vm0, %v3009_v39, 0.0  ;;  %v14261_v45 = vpack.c.bf16 %v14502_v57, %v14501_v58 }
 0x753   :  { %3014 = vadd.xlane.f32.xlu0 %v3013_v55  ;;  %v3010_v11 = vsel %vm341_vm0, %v3008_v26, 0.0  ;;  %v3146_v63 = vpop.permute.xlu1 %3145 }
 0x754   :  { %14262 = vmatprep.subr.bf16.mxu0 %v14261_v45 }
 0x755   :  { %14264 = vmatpush3.bf16.msra.mxu0 %v14261_v45 }
 0x757   :  { %3011 = vadd.xlane.f32.xlu0 %v3010_v11 }
 0x76d   :  { %14504 = vrot.lane.b32.xlu0 %v14503_v59, %s14825_s23 }
 0x7e0   :  { %v3015_v38 = vpop.xlane.xlu0 %3014 }
 0x7e1   :  { %v3017_v12 = vmul.f32 0.03125, %v3015_v38 }
 0x7e3   :  { %v3019_v51 = vadd.f32 1e-05, %v3017_v12 }
 0x7e4   :  { %v3012_v52 = vpop.xlane.xlu0 %3011 }
 0x7e5   :  { %14562 = vrsqrt.f32 %v3019_v51  ;;  %v3016_v33 = vmul.f32 0.03125, %v3012_v52 }
 0x7e7   :  { %v3018_v32 = vadd.f32 1e-05, %v3016_v33 }
 0x7e8   :  { %v14505_v16 = vpop.permute.xlu0 %14504 }
 0x7e9   :  { %14564 = vrsqrt.f32 %v3018_v32  ;;  %v14507_v18 = vunpack.i.h.bf16 %v14505_v16  ;;  %v14506_v27 = vunpack.i.l.bf16 %v14505_v16 }
 0x7eb   :  { %v14265_v29 = vpack.c.bf16 %v14507_v18, %v14506_v27 }
 0x7ed   :  { %14266 = vmatprep.subr.bf16.mxu0 %v14265_v29 }
 0x7ee   :  { %14268 = vmatpush3.bf16.msra.mxu0 %v14265_v29 }
 0x7ef   :  { %v14563_v34 = vpop.eup %14562  ;;  %14273 = vmatprep.subr.bf16.mxu0 %v17390_v42 }
 0x7f0   :  { %v3023_v15 = vmul.f32 %v14563_v34, %v15428_v54 }
 0x7f1   :  { %13799 = vmatmul.mubr.msk.f32.vlgmr.msra.gmra.mrb[16].mxu0 %vm341_vm0, %v15462_v31 }
 0x7f2   :  { %13801 = vmatprep.mubr.msk.f32.mxu0 %vm341_vm0, %v15449_v4  ;;  %v3031_v44 = vmul.f32 %v13187_v40, %v3023_v15 }
 0x7f3   :  { %v14565_v41 = vpop.eup %14564 }
 0x7f4   :  { %v3022_v43 = vmul.f32 %v14565_v41, %v15430_v35  ;;  %v15484_v53 = vadd.f32 %v13188_v46, %v3031_v44 }
 0x7f5   :  { %13802 = vmatmul.mubr.msk.f32.gmra.mrb[18].mxu0 %vm341_vm0, %v15466_v61 }
 0x7f6   :  { %v3030_v49 = vmul.f32 %v13187_v40, %v3022_v43  ;;  %13815 = vmatprep.mubr.msk.f32.mxu0 %vm14828_vm1, %v17388_v37 }
 0x7f8   :  { %v15482_v50 = vadd.f32 %v13188_v46, %v3030_v49 }
 0x7fa   :  { %13787 = vmatprep.mubr.msk.f32.mxu1 %vm341_vm0, %v15482_v50 }
 0x7fb   :  { %13788 = vmatmul.mubr.msk.f32.vlgmr.msra.gmra.mrb[20].mxu1 %vm341_vm0, %v15484_v53 }
 0x7fc   :  { %13808 = vmatprep.mubr.msk.f32.mxu1 %vm14828_vm1, %v17388_v37 }
 0x8c4   :  { %v13800_v25 = vpop.f32.mrb[16].mxu0 }
 0x8c5   :  { %v3232_v6 = vadd.f32 %v13800_v25, %v3146_v63  ;;  %v3226_v24 = vpop.f32.mrb[17].mxu0 }
 0x8c6   :  { %v15492_v36 = vadd.f32 %v3226_v24, %v3146_v63 }
 0x8c7   :  { %3543 = vrot.lane.b32.xlu0 %v3232_v6, %s14823_s30 }
 0x8c8   :  { %v13803_v54 = vpop.f32.mrb[18].mxu0  ;;  %3541 = vrot.lane.b32.xlu1 %v15492_v36, %s14823_s30 }
 0x8c9   :  { %v3236_v35 = vpop.f32.mrb[19].mxu0  ;;  %v15506_v56 = vadd.f32 %v13803_v54, %v3146_v63 }
 0x8ca   :  { %v15503_v26 = vadd.f32 %v3236_v35, %v3146_v63 }
 0x8cb   :  { %3555 = vrot.lane.b32.xlu0 %v3232_v6, %s14824_s8 }
 0x8cc   :  { %3553 = vrot.lane.b32.xlu1 %v15492_v36, %s14824_s8 }
 0x8ce   :  { %v13789_v39 = vpop.f32.mrb[20].mxu1 }
 0x8cf   :  { %v3118_v55 = vpop.f32.mrb[21].mxu1  ;;  %3567 = vrot.lane.b32.xlu0 %v3232_v6, %s14822_s29  ;;  %v3124_v57 = vadd.f32 %v13789_v39, %v15456_v20 }
 0x8d0   :  { %3565 = vrot.lane.b32.xlu1 %v15492_v36, %s14822_s29  ;;  %v3119_v11 = vadd.f32 %v15456_v20, %v3118_v55 }
 0x8d1   :  { %v15529_v58 = vmul.f32 0.35355338, %v3124_v57 }
 0x8d2   :  { %v15512_v14 = vmul.f32 0.35355338, %v3119_v11 }
 0x8d3   :  { %3545 = vrot.lane.b32.xlu0 %v15503_v26, %s14823_s30 }
 0x8d4   :  { %3547 = vrot.lane.b32.xlu1 %v15506_v56, %s14823_s30 }
 0x8d7   :  { %3253 = vrot.lane.b32.xlu0 %v15512_v14, %s14824_s8 }
 0x8d8   :  { %3247 = vrot.lane.b32.xlu1 %v15512_v14, %s14823_s30 }
 0x8db   :  { %3557 = vrot.lane.b32.xlu0 %v15503_v26, %s14824_s8 }
 0x8dc   :  { %3259 = vrot.lane.b32.xlu1 %v15512_v14, %s14822_s29 }
 0x8df   :  { %3569 = vrot.lane.b32.xlu0 %v15503_v26, %s14822_s29 }
 0x8e0   :  { %3559 = vrot.lane.b32.xlu1 %v15506_v56, %s14824_s8 }
 0x8e3   :  { %3249 = vrot.lane.b32.xlu0 %v15529_v58, %s14823_s30 }
 0x8e4   :  { %3571 = vrot.lane.b32.xlu1 %v15506_v56, %s14822_s29 }
 0x8e7   :  { %3261 = vrot.lane.b32.xlu0 %v15529_v58, %s14822_s29 }
 0x8e8   :  { %3255 = vrot.lane.b32.xlu1 %v15529_v58, %s14824_s8 }
 0x8eb   :  { %4123 = vrot.lane.b32.xlu0 %v3232_v6, %s14825_s23 }
 0x939   :  { %v15540_v59 = vpop.permute.xlu0 %3543 }
 0x93a   :  { %v15542_v45 = vpop.permute.xlu1 %3541 }
 0x93d   :  { %v15544_v60 = vpop.permute.xlu0 %3555 }
 0x93e   :  { %v15546_v0 = vpop.permute.xlu1 %3553  ;;  %v3645_v1 = vcombine.low %v3232_v6, %v15544_v60  ;;  %v3646_v2 = vcombine.high %v3232_v6, %v15544_v60 }
 0x93f   :  { %v3577_v3 = vcombine.low %v15492_v36, %v15546_v0  ;;  %v3578_v5 = vcombine.high %v15492_v36, %v15546_v0 }
 0x940   :  { %v3653_v22 = vrot.slane %v3645_v1, %v15013_v13  ;;  %v3660_v23 = vrot.slane %v3646_v2, %v15013_v13 }
 0x941   :  { %v15554_v7 = vpop.permute.xlu0 %3567  ;;  %v3585_v12 = vrot.slane %v3577_v3, %v15013_v13  ;;  %v3592_v51 = vrot.slane %v3578_v5, %v15013_v13 }
 0x942   :  { %v3661_v8 = vcombine.low %v15540_v59, %v15554_v7  ;;  %v3662_v9 = vcombine.high %v15540_v59, %v15554_v7  ;;  %v15560_v48 = vpop.permute.xlu1 %3565 }
 0x943   :  { %v3593_v20 = vcombine.low %v15542_v45, %v15560_v48  ;;  %v3594_v21 = vcombine.high %v15542_v45, %v15560_v48 }
 0x944   :  { %v3669_v10 = vrot.slane %v3661_v8, %v15013_v13  ;;  %v3676_v38 = vrot.slane %v3662_v9, %v15013_v13 }
 0x945   :  { %v3601_v52 = vrot.slane %v3593_v20, %v15013_v13  ;;  %v3608_v62 = vrot.slane %v3594_v21, %v15013_v13  ;;  %v15574_v33 = vpop.permute.xlu0 %3545 }
 0x946   :  { %v3677_v30 = vcombine.low %v3653_v22, %v3669_v10  ;;  %v3678_v32 = vcombine.high %v3653_v22, %v3669_v10  ;;  %v3693_v16 = vcombine.low %v3660_v23, %v3676_v38  ;;  %v3694_v17 = vcombine.high %v3660_v23, %v3676_v38  ;;  %v15576_v18 = vpop.permute.xlu1 %3547 }
 0x947   :  { %v3609_v27 = vcombine.low %v3585_v12, %v3601_v52  ;;  %v3610_v28 = vcombine.high %v3585_v12, %v3601_v52  ;;  %v3625_v29 = vcombine.low %v3592_v51, %v3608_v62  ;;  %v3626_v34 = vcombine.high %v3592_v51, %v3608_v62 }
 0x948   :  { %v3685_v15 = vrot.slane %v3677_v30, %v15015_v19  ;;  %v3692_v40 = vrot.slane %v3678_v32, %v15015_v19  ;;  %v3701_v41 = vrot.slane %v3693_v16, %v15015_v19  ;;  %v3708_v43 = vrot.slane %v3694_v17, %v15015_v19 }
 0x949   :  { %v3617_v44 = vrot.slane %v3609_v27, %v15015_v19  ;;  %v3624_v46 = vrot.slane %v3610_v28, %v15015_v19  ;;  %v3633_v49 = vrot.slane %v3625_v29, %v15015_v19  ;;  %v3640_v63 = vrot.slane %v3626_v34, %v15015_v19  ;;  %v3254_v25 = vpop.permute.xlu0 %3253 }
 0x94a   :  { %v3917_v6 = vcombine.low %v3685_v15, %v3692_v40  ;;  %v13202_v24 = vcombine.high %v3685_v15, %v3692_v40  ;;  %v3248_v54 = vpop.permute.xlu1 %3247  ;;  %v3933_v57 = vcombine.low %v3701_v41, %v3708_v43  ;;  %v13203_v22 = vcombine.high %v3701_v41, %v3708_v43 }
 0x94b   :  { %v3849_v35 = vcombine.low %v3617_v44, %v3624_v46  ;;  %v13200_v39 = vcombine.high %v3617_v44, %v3624_v46  ;;  %v3865_v55 = vcombine.low %v3633_v49, %v3640_v63  ;;  %v13201_v11 = vcombine.high %v3633_v49, %v3640_v63 }
 0x94c   :  { %v15601_v20 = vrot.slane %v3917_v6, %v15013_v13  ;;  %v15604_v21 = vrot.slane %v13202_v24, %v15013_v13  ;;  %v3265_v38 = vcombine.low %v15512_v14, %v3254_v25  ;;  %v3266_v12 = vcombine.high %v15512_v14, %v3254_v25 }
 0x94d   :  { %v15587_v1 = vrot.slane %v3849_v35, %v15013_v13  ;;  %v15590_v2 = vrot.slane %v13200_v39, %v15013_v13  ;;  %v15593_v3 = vrot.slane %v3865_v55, %v15013_v13  ;;  %v15596_v5 = vrot.slane %v13201_v11, %v15013_v13  ;;  %v15598_v8 = vpop.permute.xlu0 %3557 }
 0x94e   :  { %v3260_v9 = vpop.permute.xlu1 %3259  ;;  %v15613_v51 = vrot.slane %v3933_v57, %v15013_v13  ;;  %v3273_v32 = vrot.slane %v3265_v38, %v15013_v13  ;;  %v3280_v16 = vrot.slane %v3266_v12, %v15013_v13  ;;  %v3713_v17 = vcombine.low %v15503_v26, %v15598_v8 }
 0x94f   :  { %v3881_v23 = vcombine.low %v15587_v1, %v15590_v2  ;;  %v3897_v10 = vcombine.low %v15593_v3, %v15596_v5  ;;  %v3281_v52 = vcombine.low %v3248_v54, %v3260_v9  ;;  %v3282_v62 = vcombine.high %v3248_v54, %v3260_v9 }
 0x950   :  { %v3714_v27 = vcombine.high %v15503_v26, %v15598_v8  ;;  %v15632_v40 = vrot.slane %v13203_v22, %v15013_v13  ;;  %v3949_v41 = vcombine.low %v15601_v20, %v15604_v21  ;;  %v3721_v6 = vrot.slane %v3713_v17, %v15013_v13 }
 0x951   :  { %v15615_v30 = vpop.permute.xlu0 %3569  ;;  %v3289_v28 = vrot.slane %v3281_v52, %v15013_v13  ;;  %v3296_v14 = vrot.slane %v3282_v62, %v15013_v13  ;;  %v15637_v43 = vrot.slane %v3881_v23, %v15015_v19  ;;  %v15640_v44 = vrot.slane %v3897_v10, %v15015_v19 }
 0x952   :  { %v3729_v29 = vcombine.low %v15574_v33, %v15615_v30  ;;  %v3730_v34 = vcombine.high %v15574_v33, %v15615_v30  ;;  %v15629_v15 = vpop.permute.xlu1 %3559  ;;  %v3728_v24 = vrot.slane %v3714_v27, %v15013_v13 }
 0x953   :  { %v3297_v46 = vcombine.low %v3273_v32, %v3289_v28  ;;  %v3298_v49 = vcombine.high %v3273_v32, %v3289_v28  ;;  %v3313_v63 = vcombine.low %v3280_v16, %v3296_v14  ;;  %v3314_v25 = vcombine.high %v3280_v16, %v3296_v14 }
 0x954   :  { %v3737_v54 = vrot.slane %v3729_v29, %v15013_v13  ;;  %v3744_v35 = vrot.slane %v3730_v34, %v15013_v13  ;;  %v3781_v52 = vcombine.low %v15506_v56, %v15629_v15  ;;  %v3782_v62 = vcombine.high %v15506_v56, %v15629_v15 }
 0x955   :  { %v3305_v39 = vrot.slane %v3297_v46, %v15015_v19  ;;  %v3312_v55 = vrot.slane %v3298_v49, %v15015_v19  ;;  %v3321_v11 = vrot.slane %v3313_v63, %v15015_v19  ;;  %v3328_v57 = vrot.slane %v3314_v25, %v15015_v19  ;;  %v3250_v32 = vpop.permute.xlu0 %3249 }
 0x956   :  { %v3745_v9 = vcombine.low %v3721_v6, %v3737_v54  ;;  %v3746_v22 = vcombine.high %v3721_v6, %v3737_v54  ;;  %v3761_v23 = vcombine.low %v3728_v24, %v3744_v35  ;;  %v3762_v10 = vcombine.high %v3728_v24, %v3744_v35  ;;  %v15654_v16 = vpop.permute.xlu1 %3571 }
 0x957   :  { %v3401_v38 = vcombine.low %v3305_v39, %v3312_v55  ;;  %v13196_v12 = vcombine.high %v3305_v39, %v3312_v55  ;;  %v3417_v17 = vcombine.low %v3321_v11, %v3328_v57  ;;  %v13197_v27 = vcombine.high %v3321_v11, %v3328_v57 }
 0x958   :  { %v15657_v28 = vrot.slane %v3745_v9, %v15015_v19  ;;  %v15660_v14 = vrot.slane %v3746_v22, %v15015_v19  ;;  %v3965_v34 = vcombine.low %v15613_v51, %v15632_v40  ;;  %v3769_v25 = vrot.slane %v3761_v23, %v15015_v19 }
 0x959   :  { %v15669_v49 = vrot.slane %v3401_v38, %v15013_v13  ;;  %v15672_v63 = vrot.slane %v13196_v12, %v15013_v13  ;;  %v3776_v6 = vrot.slane %v3762_v10, %v15015_v19  ;;  %v3789_v54 = vrot.slane %v3781_v52, %v15013_v13  ;;  %v3262_v38 = vpop.permute.xlu0 %3261 }
 0x95a   :  { %v3913_v35 = vcombine.low %v15637_v43, %v15640_v44  ;;  %v3957_v39 = vrot.slane %v3949_v41, %v15015_v19  ;;  %v15683_v55 = vrot.slane %v3417_v17, %v15013_v13  ;;  %v15686_v11 = vrot.slane %v13197_v27, %v15013_v13  ;;  %v3256_v12 = vpop.permute.xlu1 %3255 }
 0x95b   :  { %v3985_v57 = vcombine.low %v15657_v28, %v15660_v14  ;;  %v3796_v9 = vrot.slane %v3782_v62, %v15013_v13  ;;  %v13204_v22 = vcombine.high %v15657_v28, %v15660_v14  ;;  %v3797_v23 = vcombine.low %v15576_v18, %v15654_v16 }
 0x95c   :  { %v3798_v41 = vcombine.high %v15576_v18, %v15654_v16  ;;  %v3973_v10 = vrot.slane %v3965_v34, %v15015_v19  ;;  %v3433_v52 = vcombine.low %v15669_v49, %v15672_v63  ;;  %v4001_v17 = vcombine.low %v3769_v25, %v3776_v6 }
 0x95d   :  { %v13205_v27 = vcombine.high %v3769_v25, %v3776_v6  ;;  %v3914_v62 = vcombine.high %v15637_v43, %v15640_v44  ;;  %v3805_v28 = vrot.slane %v3797_v23, %v15013_v13  ;;  %v3349_v24 = vcombine.low %v3250_v32, %v3262_v38 }
 0x95e   :  { %v3812_v14 = vrot.slane %v3798_v41, %v15013_v13  ;;  %v3981_v37 = vcombine.low %v3957_v39, %v3973_v10  ;;  %v3982_v29 = vcombine.high %v3957_v39, %v3973_v10  ;;  %v3350_v46 = vcombine.high %v3250_v32, %v3262_v38 }
 0x95f   :  { %v3333_v34 = vcombine.low %v15529_v58, %v3256_v12  ;;  %v3334_v42 = vcombine.high %v15529_v58, %v3256_v12  ;;  %v3813_v61 = vcombine.low %v3789_v54, %v3805_v28  ;;  %v3814_v4 = vcombine.high %v3789_v54, %v3805_v28 }
 0x960   :  { %v3829_v31 = vcombine.low %v3796_v9, %v3812_v14  ;;  %v3830_v47 = vcombine.high %v3796_v9, %v3812_v14  ;;  %v14270_v44 = vpack.c.bf16 %v3981_v37, %v3913_v35  ;;  %v14274_v25 = vpack.c.bf16 %v3982_v29, %v3914_v62 }
 0x961   :  { %v3357_v6 = vrot.slane %v3349_v24, %v15013_v13  ;;  %v3364_v32 = vrot.slane %v3350_v46, %v15013_v13  ;;  %v3821_v39 = vrot.slane %v3813_v61, %v15015_v19  ;;  %v3828_v58 = vrot.slane %v3814_v4, %v15015_v19 }
 0x962   :  { %v3837_v54 = vrot.slane %v3829_v31, %v15015_v19  ;;  %v3844_v9 = vrot.slane %v3830_v47, %v15015_v19  ;;  %v3449_v23 = vcombine.low %v15683_v55, %v15686_v11  ;;  %14272 = vmatpush3.bf16.xpose.msk.msra.mxu1 %vm15708_vm5, %v14270_v44  ;;  %14276 = vmatpush3.bf16.xpose.msk.msra.mxu0 %vm15708_vm5, %v14274_v25  ;;  %v17424_v31 = vmov 0.0|0.0  }
 0x963   :  { %v3341_v37 = vrot.slane %v3333_v34, %v15013_v13  ;;  %v3348_v29 = vrot.slane %v3334_v42, %v15013_v13  ;;  %v4053_v61 = vcombine.low %v3821_v39, %v3828_v58  ;;  %v13206_v46 = vcombine.high %v3821_v39, %v3828_v58  ;;  %14277 = vmatprep.subr.bf16.mxu1 %v17424_v31 }
 0x964   :  { %v4069_v4 = vcombine.low %v3837_v54, %v3844_v9  ;;  %v13207_v24 = vcombine.high %v3837_v54, %v3844_v9  ;;  %14281 = vmatprep.subr.bf16.mxu0 %v17424_v31  ;;  %v15729_v38 = vrot.slane %v3985_v57, %v15013_v13  ;;  %v15732_v12 = vrot.slane %v13204_v22, %v15013_v13 }
 0x965   :  { %v3365_v47 = vcombine.low %v3341_v37, %v3357_v6  ;;  %v3366_v35 = vcombine.high %v3341_v37, %v3357_v6  ;;  %v3381_v41 = vcombine.low %v3348_v29, %v3364_v32  ;;  %v3382_v10 = vcombine.high %v3348_v29, %v3364_v32 }
 0x966   :  { %v15735_v42 = vrot.slane %v4001_v17, %v15013_v13  ;;  %v15738_v62 = vrot.slane %v13205_v27, %v15013_v13  ;;  %v15741_v28 = vrot.slane %v4053_v61, %v15013_v13  ;;  %v15744_v14 = vrot.slane %v13206_v46, %v15013_v13 }
 0x967   :  { %v15747_v34 = vrot.slane %v4069_v4, %v15013_v13  ;;  %v15750_v57 = vrot.slane %v13207_v24, %v15013_v13  ;;  %v3966_v22 = vcombine.high %v15613_v51, %v15632_v40  ;;  %v3434_v17 = vcombine.high %v15669_v49, %v15672_v63 }
 0x968   :  { %v3441_v27 = vrot.slane %v3433_v52, %v15015_v19  ;;  %v3373_v44 = vrot.slane %v3365_v47, %v15015_v19  ;;  %v3380_v25 = vrot.slane %v3366_v35, %v15015_v19  ;;  %v3389_v6 = vrot.slane %v3381_v41, %v15015_v19 }
 0x969   :  { %v3396_v32 = vrot.slane %v3382_v10, %v15015_v19  ;;  %v3457_v39 = vrot.slane %v3449_v23, %v15015_v19  ;;  %v17425_v58 = vcombine.high %v15587_v1, %v15590_v2  ;;  %v17426_v40 = vcombine.high %v15593_v3, %v15596_v5 }
 0x96a   :  { %v17427_v63 = vcombine.high %v15601_v20, %v15604_v21  ;;  %v4017_v54 = vcombine.low %v15729_v38, %v15732_v12  ;;  %v4033_v9 = vcombine.low %v15735_v42, %v15738_v62  ;;  %v4085_v1 = vcombine.low %v15741_v28, %v15744_v14 }
 0x96b   :  { %v3896_v51 = vrot.slane %v17425_v58, %v15015_v19  ;;  %v3912_v49 = vrot.slane %v17426_v40, %v15015_v19  ;;  %v4101_v2 = vcombine.low %v15747_v34, %v15750_v57  ;;  %v3465_v23 = vcombine.low %v3441_v27, %v3457_v39 }
 0x96c   :  { %v3964_v52 = vrot.slane %v17427_v63, %v15015_v19  ;;  %v3466_v3 = vcombine.high %v3441_v27, %v3457_v39  ;;  %v3980_v37 = vrot.slane %v3966_v22, %v15015_v19  ;;  %v3469_v29 = vcombine.low %v3373_v44, %v3380_v25 }
 0x96d   :  { %v3915_v5 = vcombine.low %v3896_v51, %v3912_v49  ;;  %v13198_v20 = vcombine.high %v3373_v44, %v3380_v25  ;;  %v3485_v21 = vcombine.low %v3389_v6, %v3396_v32  ;;  %v13199_v61 = vcombine.high %v3389_v6, %v3396_v32  ;;  %13809 = vmatmul.mubr.msk.f32.vlgmr.msra.gmra.mrb[22].mxu1 %vm1323_vm2, %v3465_v23 }
 0x96e   :  { %13816 = vmatmul.mubr.msk.f32.vlgmr.msra.gmra.mrb[20].mxu0 %vm1323_vm2, %v3466_v3  ;;  %v3983_v46 = vcombine.low %v3964_v52, %v3980_v37  ;;  %v3916_v4 = vcombine.high %v3896_v51, %v3912_v49  ;;  %v3984_v24 = vcombine.high %v3964_v52, %v3980_v37  ;;  %v3450_v47 = vcombine.high %v15683_v55, %v15686_v11 }
 0x96f   :  { %v17428_v35 = vmov 0.0   ;;  %v4025_v41 = vrot.slane %v4017_v54, %v15015_v19  ;;  %v4041_v27 = vrot.slane %v4033_v9, %v15015_v19  ;;  %v4093_v44 = vrot.slane %v4085_v1, %v15015_v19 }
 0x970   :  { %13822 = vmatprep.mubr.msk.f32.mxu1 %vm14828_vm1, %v17428_v35  ;;  %13829 = vmatprep.mubr.msk.f32.mxu0 %vm14828_vm1, %v17428_v35  ;;  %v14278_v10 = vpack.c.bf16 %v3983_v46, %v3915_v5  ;;  %v14282_v22 = vpack.c.bf16 %v3984_v24, %v3916_v4  ;;  %v3476_v25 = vrot.slane %v3469_v29, %v15013_v13 }
 0x971   :  { %v3484_v6 = vrot.slane %v13198_v20, %v15013_v13  ;;  %v4109_v55 = vrot.slane %v4101_v2, %v15015_v19  ;;  %v3492_v11 = vrot.slane %v3485_v21, %v15013_v13  ;;  %v3500_v32 = vrot.slane %v13199_v61, %v15013_v13 }
 0x972   :  { %14280 = vmatpush3.bf16.xpose.msk.msra.mxu1 %vm15708_vm5, %v14278_v10  ;;  %14284 = vmatpush3.bf16.xpose.msk.msra.mxu0 %vm15708_vm5, %v14282_v22  ;;  %v3448_v39 = vrot.slane %v3434_v17, %v15015_v19  ;;  %v3464_v58 = vrot.slane %v3450_v47, %v15015_v19  ;;  %v4086_v49 = vcombine.high %v15741_v28, %v15744_v14 }
 0x973   :  { %14285 = vmatprep.subr.bf16.mxu1 %v17424_v31  ;;  %14289 = vmatprep.subr.bf16.mxu0 %v17424_v31  ;;  %v4117_v51 = vcombine.low %v4093_v44, %v4109_v55  ;;  %v4118_v40 = vcombine.high %v4093_v44, %v4109_v55  ;;  %v4102_v63 = vcombine.high %v15747_v34, %v15750_v57 }
 0x974   :  { %v4049_v52 = vcombine.low %v4025_v41, %v4041_v27  ;;  %v4050_v54 = vcombine.high %v4025_v41, %v4041_v27  ;;  %v4018_v9 = vcombine.high %v15729_v38, %v15732_v12  ;;  %v4034_v17 = vcombine.high %v15735_v42, %v15738_v62 }
 0x975   :  { %v3501_v23 = vcombine.low %v3476_v25, %v3484_v6  ;;  %v3517_v3 = vcombine.low %v3492_v11, %v3500_v32  ;;  %v3467_v5 = vcombine.low %v3448_v39, %v3464_v58  ;;  %v3468_v37 = vcombine.high %v3448_v39, %v3464_v58 }
 0x976   :  { %v14286_v1 = vpack.c.bf16 %v4117_v51, %v4049_v52  ;;  %v14290_v2 = vpack.c.bf16 %v4118_v40, %v4050_v54  ;;  %v4100_v29 = vrot.slane %v4086_v49, %v15015_v19  ;;  %v4116_v28 = vrot.slane %v4102_v63, %v15015_v19 }
 0x977   :  { %v4032_v38 = vrot.slane %v4018_v9, %v15015_v19  ;;  %v4048_v12 = vrot.slane %v4034_v17, %v15015_v19  ;;  %v3509_v42 = vrot.slane %v3501_v23, %v15015_v19  ;;  %v3525_v62 = vrot.slane %v3517_v3, %v15015_v19 }
 0x978   :  { %v4119_v14 = vcombine.low %v4100_v29, %v4116_v28  ;;  %v4120_v34 = vcombine.high %v4100_v29, %v4116_v28  ;;  %v3502_v21 = vcombine.high %v3476_v25, %v3484_v6  ;;  %v3518_v61 = vcombine.high %v3492_v11, %v3500_v32 }
 0x979   :  { %13823 = vmatmul.mubr.msk.f32.vlgmr.msra.gmra.mrb[24].mxu1 %vm1323_vm2, %v3467_v5  ;;  %13830 = vmatmul.mubr.msk.f32.vlgmr.msra.gmra.mrb[22].mxu0 %vm1323_vm2, %v3468_v37  ;;  %v4051_v57 = vcombine.low %v4032_v38, %v4048_v12  ;;  %v4052_v20 = vcombine.high %v4032_v38, %v4048_v12  ;;  %v3533_v46 = vcombine.low %v3509_v42, %v3525_v62 }
 0x97a   :  { %14288 = vmatpush3.bf16.xpose.msk.msra.mxu1 %vm15708_vm5, %v14286_v1  ;;  %14292 = vmatpush3.bf16.xpose.msk.msra.mxu0 %vm15708_vm5, %v14290_v2  ;;  %v3534_v4 = vcombine.high %v3509_v42, %v3525_v62  ;;  %v3516_v41 = vrot.slane %v3502_v21, %v15015_v19  ;;  %v3532_v10 = vrot.slane %v3518_v61, %v15015_v19 }
 0x97b   :  { %13836 = vmatprep.mubr.msk.f32.mxu1 %vm14828_vm1, %v17428_v35  ;;  %13843 = vmatprep.mubr.msk.f32.mxu0 %vm14828_vm1, %v17428_v35  ;;  %v14294_v24 = vpack.c.bf16 %v4119_v14, %v4051_v57  ;;  %v14298_v47 = vpack.c.bf16 %v4120_v34, %v4052_v20 }
 0x97c   :  { %14293 = vmatprep.subr.bf16.mxu1 %v17424_v31  ;;  %14297 = vmatprep.subr.bf16.mxu0 %v17424_v31  ;;  %v3535_v22 = vcombine.low %v3516_v41, %v3532_v10  ;;  %v3536_v27 = vcombine.high %v3516_v41, %v3532_v10 }
 0x981   :  { %13837 = vmatmul.mubr.msk.f32.vlgmr.msra.gmra.mrb[26].mxu1 %vm1323_vm2, %v3533_v46  ;;  %13844 = vmatmul.mubr.msk.f32.vlgmr.msra.gmra.mrb[24].mxu0 %vm1323_vm2, %v3534_v4 }
 0x982   :  { %14296 = vmatpush3.bf16.xpose.msk.msra.mxu1 %vm15708_vm5, %v14294_v24  ;;  %14300 = vmatpush3.bf16.xpose.msk.msra.mxu0 %vm15708_vm5, %v14298_v47 }
 0x983   :  { %13850 = vmatprep.mubr.msk.f32.mxu1 %vm14828_vm1, %v17428_v35  ;;  %13857 = vmatprep.mubr.msk.f32.mxu0 %vm14828_vm1, %v17428_v35 }
 0x984   :  { %14301 = vmatprep.subr.bf16.mxu1 %v17424_v31  ;;  %14307 = vmatprep.subr.bf16.mxu0 %v17424_v31 }
 0x989   :  { %13851 = vmatmul.mubr.msk.f32.vlgmr.msra.gmra.mrb[28].mxu1 %vm1323_vm2, %v3535_v22  ;;  %13858 = vmatmul.mubr.msk.f32.vlgmr.msra.gmra.mrb[26].mxu0 %vm1323_vm2, %v3536_v27 }
 0x98a   :  { %13864 = vmatprep.mubr.msk.f32.mxu1 %vm14828_vm1, %v17428_v35  ;;  %13878 = vmatprep.mubr.msk.f32.mxu0 %vm14828_vm1, %v17428_v35 }
 0xa40   :  { %v4788_v44 = vpop.f32.mrb[22].mxu1 }
 0xa41   :  { %v4867_v25 = vpop.f32.mrb[20].mxu0  ;;  %v13810_v6 = vpop.f32.mrb[23].mxu1  ;;  %v5345_v32 = vsel %vm2902_vm3, %v4788_v44, -inf }
 0xa42   :  { %v13817_v55 = vpop.f32.mrb[21].mxu0  ;;  %v5348_v11 = vsel %vm2902_vm3, %v4867_v25, -inf  ;;  %5346 = vmax.xlane.f32.xlu1 %v5345_v32 }
 0xa43   :  { %5349 = vmax.xlane.f32.xlu0 %v5348_v11 }
 0xa4c   :  { %v4946_v39 = vpop.f32.mrb[24].mxu1  ;;  %v15855_v58 = vpop.f32.mrb[22].mxu0 }
 0xa4d   :  { %v13824_v51 = vpop.f32.mrb[25].mxu1  ;;  %v13831_v40 = vpop.f32.mrb[23].mxu0  ;;  %v5351_v49 = vsel %vm2902_vm3, %v4946_v39, -inf  ;;  %v5354_v37 = vsel %vm2902_vm3, %v15855_v58, -inf }
 0xa4e   :  { %5352 = vmax.xlane.f32.xlu0 %v5351_v49 }
 0xa53   :  { %4121 = vrot.lane.b32.xlu1 %v15492_v36, %s14825_s23 }
 0xa54   :  { %v5104_v63 = vpop.f32.mrb[26].mxu1  ;;  %v15858_v52 = vpop.f32.mrb[24].mxu0 }
 0xa55   :  { %v13838_v54 = vpop.f32.mrb[27].mxu1  ;;  %v13845_v9 = vpop.f32.mrb[25].mxu0  ;;  %v5357_v17 = vsel %vm2902_vm3, %v5104_v63, -inf  ;;  %v5360_v36 = vsel %vm2902_vm3, %v15858_v52, -inf }
 0xa56   :  { %5358 = vmax.xlane.f32.xlu0 %v5357_v17 }
 0xa5c   :  { %v5262_v1 = vpop.f32.mrb[28].mxu1  ;;  %v15863_v2 = vpop.f32.mrb[26].mxu0 }
 0xa5d   :  { %v13852_v23 = vpop.f32.mrb[29].mxu1  ;;  %v13859_v3 = vpop.f32.mrb[27].mxu0  ;;  %v5363_v5 = vsel %vm2902_vm3, %v5262_v1, -inf  ;;  %v5366_v29 = vsel %vm2902_vm3, %v15863_v2, -inf }
 0xa5e   :  { %5364 = vmax.xlane.f32.xlu0 %v5363_v5 }
 0xa74   :  { %4137 = vrot.lane.b32.xlu0 %v15546_v0, %s14825_s23 }
 0xa77   :  { %5355 = vmax.xlane.f32.xlu1 %v5354_v37 }
 0xa78   :  { %4145 = vrot.lane.b32.xlu0 %v15560_v48, %s14825_s23 }
 0xa7b   :  { %5361 = vmax.xlane.f32.xlu1 %v5360_v36 }
 0xa7c   :  { %4125 = vrot.lane.b32.xlu0 %v15503_v26, %s14825_s23  ;;  %v15900_v26 = vpop.permute.xlu0 %4123 }
 0xa7f   :  { %5367 = vmax.xlane.f32.xlu1 %v5366_v29 }
 0xa80   :  { %4135 = vrot.lane.b32.xlu0 %v15576_v18, %s14825_s23 }
 0xa84   :  { %4143 = vrot.lane.b32.xlu0 %v15629_v15, %s14825_s23 }
 0xa88   :  { %4151 = vrot.lane.b32.xlu0 %v15654_v16, %s14825_s23 }
 0xa90   :  { %4129 = vrot.lane.b32.xlu1 %v15542_v45, %s14825_s23 }
 0xa94   :  { %4131 = vrot.lane.b32.xlu1 %v15540_v59, %s14825_s23 }
 0xa98   :  { %4139 = vrot.lane.b32.xlu1 %v15544_v60, %s14825_s23 }
 0xa9c   :  { %4147 = vrot.lane.b32.xlu1 %v15554_v7, %s14825_s23 }
 0xaa0   :  { %4127 = vrot.lane.b32.xlu1 %v15506_v56, %s14825_s23 }
 0xaa4   :  { %4133 = vrot.lane.b32.xlu1 %v15574_v33, %s14825_s23 }
 0xaa8   :  { %4141 = vrot.lane.b32.xlu1 %v15598_v8, %s14825_s23 }
 0xaac   :  { %4149 = vrot.lane.b32.xlu1 %v15615_v30, %s14825_s23 }
 0xacf   :  { %v5347_v45 = vpop.xlane.xlu1 %5346 }
 0xad0   :  { %v5350_v59 = vpop.xlane.xlu0 %5349  ;;  %v5369_v0 = vsub.f32 %v4788_v44, %v5347_v45 }
 0xad1   :  { %v5370_v60 = vsub.f32 %v4867_v25, %v5350_v59 }
 0xad2   :  { %v5377_v48 = vmul.f32 1.442695, %v5369_v0 }
 0xad3   :  { %v5379_v7 = vmul.f32 1.442695, %v5370_v60  ;;  %v4122_v12 = vpop.permute.xlu1 %4121 }
 0xad4   :  { %14566 = vpow2.f32 %v5377_v48 }
 0xad5   :  { %14568 = vpow2.f32 %v5379_v7 }
 0xadb   :  { %v5353_v56 = vpop.xlane.xlu0 %5352 }
 0xadc   :  { %v5371_v18 = vsub.f32 %v4946_v39, %v5353_v56 }
 0xade   :  { %v5381_v15 = vmul.f32 1.442695, %v5371_v18  ;;  %v15902_v33 = vpop.eup %14566 }
 0xadf   :  { %v5393_v8 = vsel %vm2902_vm3, %v15902_v33, 0.0  ;;  %v15906_v30 = vpop.eup %14568 }
 0xae0   :  { %14570 = vpow2.f32 %v5381_v15  ;;  %5394 = vadd.xlane.f32.xlu0 %v5393_v8  ;;  %v5396_v16 = vsel %vm2902_vm3, %v15906_v30, 0.0 }
 0xae3   :  { %v5359_v42 = vpop.xlane.xlu0 %5358 }
 0xae4   :  { %5397 = vadd.xlane.f32.xlu0 %v5396_v16  ;;  %v5373_v62 = vsub.f32 %v5104_v63, %v5359_v42 }
 0xae6   :  { %v5385_v20 = vmul.f32 1.442695, %v5373_v62 }
 0xaea   :  { %v15910_v28 = vpop.eup %14570 }
 0xaeb   :  { %v5399_v38 = vsel %vm2902_vm3, %v15910_v28, 0.0  ;;  %v5365_v14 = vpop.xlane.xlu0 %5364 }
 0xaec   :  { %5400 = vadd.xlane.f32.xlu1 %v5399_v38  ;;  %v5375_v21 = vsub.f32 %v5262_v1, %v5365_v14 }
 0xaee   :  { %v5389_v47 = vmul.f32 1.442695, %v5375_v21 }
 0xaef   :  { %v4138_v24 = vpop.permute.xlu0 %4137 }
 0xaf0   :  { %v4169_v27 = vcombine.low %v4122_v12, %v4138_v24  ;;  %v4170_v44 = vcombine.high %v4122_v12, %v4138_v24 }
 0xaf2   :  { %v4184_v51 = vrot.slane %v4170_v44, %v15013_v13 }
 0xaf3   :  { %v4146_v6 = vpop.permute.xlu0 %4145 }
 0xb04   :  { %v5356_v34 = vpop.xlane.xlu1 %5355 }
 0xb05   :  { %v5372_v57 = vsub.f32 %v15855_v58, %v5356_v34  ;;  %v4177_v58 = vrot.slane %v4169_v27, %v15013_v13 }
 0xb07   :  { %v5383_v61 = vmul.f32 1.442695, %v5372_v57 }
 0xb08   :  { %v5362_v46 = vpop.xlane.xlu1 %5361 }
 0xb09   :  { %14572 = vpow2.f32 %v5383_v61  ;;  %v5374_v4 = vsub.f32 %v15858_v52, %v5362_v46 }
 0xb0a   :  { %14574 = vpow2.f32 %v5385_v20 }
 0xb0b   :  { %v5387_v41 = vmul.f32 1.442695, %v5374_v4 }
 0xb0c   :  { %v5368_v10 = vpop.xlane.xlu1 %5367 }
 0xb0d   :  { %14576 = vpow2.f32 %v5387_v41  ;;  %v5376_v22 = vsub.f32 %v15863_v2, %v5368_v10 }
 0xb0e   :  { %14578 = vpow2.f32 %v5389_v47 }
 0xb0f   :  { %v5391_v25 = vmul.f32 1.442695, %v5376_v22 }
 0xb10   :  { %v4130_v55 = vpop.permute.xlu1 %4129 }
 0xb11   :  { %14580 = vpow2.f32 %v5391_v25  ;;  %v4185_v11 = vcombine.low %v4130_v55, %v4146_v6  ;;  %v4186_v32 = vcombine.high %v4130_v55, %v4146_v6 }
 0xb13   :  { %v15917_v39 = vpop.eup %14572  ;;  %v4193_v40 = vrot.slane %v4185_v11, %v15013_v13  ;;  %v4200_v49 = vrot.slane %v4186_v32, %v15013_v13 }
 0xb14   :  { %v4132_v63 = vpop.permute.xlu1 %4131  ;;  %v5402_v52 = vsel %vm2902_vm3, %v15917_v39, 0.0  ;;  %v15925_v54 = vpop.eup %14574 }
 0xb15   :  { %v4201_v9 = vcombine.low %v4177_v58, %v4193_v40  ;;  %v4202_v17 = vcombine.high %v4177_v58, %v4193_v40  ;;  %v4217_v1 = vcombine.low %v4184_v51, %v4200_v49  ;;  %v4218_v2 = vcombine.high %v4184_v51, %v4200_v49  ;;  %5403 = vadd.xlane.f32.xlu0 %v5402_v52 }
 0xb16   :  { %v5405_v59 = vsel %vm2902_vm3, %v15925_v54, 0.0 }
 0xb17   :  { %v15927_v23 = vpop.eup %14576  ;;  %v4209_v3 = vrot.slane %v4201_v9, %v15015_v19  ;;  %v4216_v5 = vrot.slane %v4202_v17, %v15015_v19  ;;  %v4225_v37 = vrot.slane %v4217_v1, %v15015_v19  ;;  %v4232_v36 = vrot.slane %v4218_v2, %v15015_v19 }
 0xb18   :  { %v4140_v29 = vpop.permute.xlu1 %4139  ;;  %v5408_v45 = vsel %vm2902_vm3, %v15927_v23, 0.0  ;;  %v15937_v60 = vpop.eup %14578 }
 0xb19   :  { %v4441_v0 = vcombine.low %v4209_v3, %v4216_v5  ;;  %v13208_v48 = vcombine.high %v4209_v3, %v4216_v5  ;;  %v4457_v7 = vcombine.low %v4225_v37, %v4232_v36  ;;  %v13209_v56 = vcombine.high %v4225_v37, %v4232_v36  ;;  %5406 = vadd.xlane.f32.xlu0 %v5405_v59 }
 0xb1a   :  { %v4237_v18 = vcombine.low %v15900_v26, %v4140_v29  ;;  %v4238_v15 = vcombine.high %v15900_v26, %v4140_v29  ;;  %5409 = vadd.xlane.f32.xlu1 %v5408_v45  ;;  %v5411_v14 = vsel %vm2902_vm3, %v15937_v60, 0.0 }
 0xb1b   :  { %v15941_v8 = vpop.eup %14580  ;;  %v4448_v16 = vrot.slane %v4441_v0, %v15013_v13  ;;  %v4456_v38 = vrot.slane %v13208_v48, %v15013_v13  ;;  %v4464_v12 = vrot.slane %v4457_v7, %v15013_v13  ;;  %v4472_v42 = vrot.slane %v13209_v56, %v15013_v13 }
 0xb1c   :  { %v4148_v62 = vpop.permute.xlu1 %4147  ;;  %v5414_v34 = vsel %vm2902_vm3, %v15941_v8, 0.0  ;;  %v4245_v4 = vrot.slane %v4237_v18, %v15013_v13  ;;  %v4252_v24 = vrot.slane %v4238_v15, %v15013_v13 }
 0xb1d   :  { %v4253_v57 = vcombine.low %v4132_v63, %v4148_v62  ;;  %v4254_v26 = vcombine.high %v4132_v63, %v4148_v62  ;;  %5415 = vadd.xlane.f32.xlu0 %v5414_v34  ;;  %v4473_v20 = vcombine.low %v4448_v16, %v4456_v38  ;;  %v4489_v21 = vcombine.low %v4464_v12, %v4472_v42 }
 0xb1e   :  { %5412 = vadd.xlane.f32.xlu1 %v5411_v14  ;;  %v4474_v61 = vcombine.high %v4448_v16, %v4456_v38  ;;  %v4490_v46 = vcombine.high %v4464_v12, %v4472_v42 }
 0xb1f   :  { %v4261_v47 = vrot.slane %v4253_v57, %v15013_v13  ;;  %v4268_v41 = vrot.slane %v4254_v26, %v15013_v13  ;;  %v4481_v10 = vrot.slane %v4473_v20, %v15015_v19  ;;  %v4497_v22 = vrot.slane %v4489_v21, %v15015_v19  ;;  %v4126_v20 = vpop.permute.xlu0 %4125 }
 0xb20   :  { %v4488_v27 = vrot.slane %v4474_v61, %v15015_v19  ;;  %v4504_v44 = vrot.slane %v4490_v46, %v15015_v19  ;;  %v4128_v26 = vpop.permute.xlu1 %4127 }
 0xb21   :  { %v4269_v25 = vcombine.low %v4245_v4, %v4261_v47  ;;  %v4270_v6 = vcombine.high %v4245_v4, %v4261_v47  ;;  %v4285_v55 = vcombine.low %v4252_v24, %v4268_v41  ;;  %v4286_v11 = vcombine.high %v4252_v24, %v4268_v41 }
 0xb22   :  { %v4506_v49 = vcombine.high %v4481_v10, %v4497_v22  ;;  %v4508_v63 = vcombine.high %v4488_v27, %v4504_v44  ;;  %v4505_v0 = vcombine.low %v4481_v10, %v4497_v22  ;;  %v4507_v42 = vcombine.low %v4488_v27, %v4504_v44 }
 0xb23   :  { %v4277_v32 = vrot.slane %v4269_v25, %v15015_v19  ;;  %v4284_v58 = vrot.slane %v4270_v6, %v15015_v19  ;;  %v4293_v51 = vrot.slane %v4285_v55, %v15015_v19  ;;  %v4300_v40 = vrot.slane %v4286_v11, %v15015_v19  ;;  %v4136_v61 = vpop.permute.xlu0 %4135 }
 0xb24   :  { %v4134_v21 = vpop.permute.xlu1 %4133 }
 0xb25   :  { %v4509_v52 = vcombine.low %v4277_v32, %v4284_v58  ;;  %v13210_v9 = vcombine.high %v4277_v32, %v4284_v58  ;;  %v4525_v17 = vcombine.low %v4293_v51, %v4300_v40  ;;  %v13211_v1 = vcombine.high %v4293_v51, %v4300_v40 }
 0xb27   :  { %v4516_v2 = vrot.slane %v4509_v52, %v15013_v13  ;;  %v4524_v3 = vrot.slane %v13210_v9, %v15013_v13  ;;  %v4532_v5 = vrot.slane %v4525_v17, %v15013_v13  ;;  %v4540_v37 = vrot.slane %v13211_v1, %v15013_v13  ;;  %v4144_v4 = vpop.permute.xlu0 %4143 }
 0xb28   :  { %v4142_v46 = vpop.permute.xlu1 %4141  ;;  %v4373_v22 = vcombine.low %v4128_v26, %v4144_v4  ;;  %v4374_v27 = vcombine.high %v4128_v26, %v4144_v4 }
 0xb29   :  { %v4541_v36 = vcombine.low %v4516_v2, %v4524_v3  ;;  %v4557_v29 = vcombine.low %v4532_v5, %v4540_v37  ;;  %v4542_v7 = vcombine.high %v4516_v2, %v4524_v3  ;;  %v4558_v56 = vcombine.high %v4532_v5, %v4540_v37 }
 0xb2a   :  { %v4305_v44 = vcombine.low %v4126_v20, %v4142_v46  ;;  %v4306_v25 = vcombine.high %v4126_v20, %v4142_v46  ;;  %v4381_v58 = vrot.slane %v4373_v22, %v15013_v13  ;;  %v4388_v51 = vrot.slane %v4374_v27, %v15013_v13 }
 0xb2b   :  { %v4549_v59 = vrot.slane %v4541_v36, %v15015_v19  ;;  %v4565_v45 = vrot.slane %v4557_v29, %v15015_v19  ;;  %v4556_v16 = vrot.slane %v4542_v7, %v15015_v19  ;;  %v4572_v38 = vrot.slane %v4558_v56, %v15015_v19  ;;  %v4152_v47 = vpop.permute.xlu0 %4151 }
 0xb2c   :  { %v4150_v24 = vpop.permute.xlu1 %4149  ;;  %v4389_v6 = vcombine.low %v4136_v61, %v4152_v47  ;;  %v4390_v55 = vcombine.high %v4136_v61, %v4152_v47  ;;  %v4313_v40 = vrot.slane %v4305_v44, %v15013_v13 }
 0xb2d   :  { %v4573_v48 = vcombine.low %v4549_v59, %v4565_v45  ;;  %v4574_v18 = vcombine.high %v4549_v59, %v4565_v45  ;;  %v4575_v62 = vcombine.low %v4556_v16, %v4572_v38  ;;  %v4576_v14 = vcombine.high %v4556_v16, %v4572_v38 }
 0xb2e   :  { %v4321_v41 = vcombine.low %v4134_v21, %v4150_v24  ;;  %v4322_v10 = vcombine.high %v4134_v21, %v4150_v24  ;;  %v4404_v52 = vrot.slane %v4390_v55, %v15013_v13 }
 0xb2f   :  { %v14302_v15 = vpack.c.bf16 %v4573_v48, %v4505_v0  ;;  %v15971_v12 = vpack.c.bf16 %v4574_v18, %v4506_v49  ;;  %v14308_v34 = vpack.c.bf16 %v4575_v62, %v4507_v42  ;;  %v15974_v57 = vpack.c.bf16 %v4576_v14, %v4508_v63 }
 0xb30   :  { %v4329_v11 = vrot.slane %v4321_v41, %v15013_v13  ;;  %v4336_v32 = vrot.slane %v4322_v10, %v15013_v13  ;;  %v4320_v49 = vrot.slane %v4306_v25, %v15013_v13  ;;  %v4397_v63 = vrot.slane %v4389_v6, %v15013_v13 }
 0xb31   :  { %14303 = vmatpush3.bf16.msra.mxu1 %v14302_v15  ;;  %14309 = vmatpush3.bf16.msra.mxu0 %v14308_v34  ;;  %v4421_v37 = vcombine.low %v4388_v51, %v4404_v52  ;;  %v4422_v36 = vcombine.high %v4388_v51, %v4404_v52 }
 0xb32   :  { %14304 = vmatprep.subr.bf16.mxu1 %v17424_v31  ;;  %14313 = vmatprep.subr.bf16.mxu0 %v17424_v31  ;;  %v4337_v9 = vcombine.low %v4313_v40, %v4329_v11  ;;  %v4338_v17 = vcombine.high %v4313_v40, %v4329_v11  ;;  %v4353_v1 = vcombine.low %v4320_v49, %v4336_v32 }
 0xb33   :  { %v4354_v2 = vcombine.high %v4320_v49, %v4336_v32  ;;  %v4405_v3 = vcombine.low %v4381_v58, %v4397_v63  ;;  %v4406_v5 = vcombine.high %v4381_v58, %v4397_v63  ;;  %v4429_v18 = vrot.slane %v4421_v37, %v15015_v19 }
 0xb34   :  { %v4345_v29 = vrot.slane %v4337_v9, %v15015_v19  ;;  %v4352_v59 = vrot.slane %v4338_v17, %v15015_v19  ;;  %v4361_v45 = vrot.slane %v4353_v1, %v15015_v19  ;;  %v4436_v15 = vrot.slane %v4422_v36, %v15015_v19 }
 0xb35   :  { %v4368_v0 = vrot.slane %v4354_v2, %v15015_v19  ;;  %v4413_v48 = vrot.slane %v4405_v3, %v15015_v19  ;;  %v4420_v7 = vrot.slane %v4406_v5, %v15015_v19 }
 0xb36   :  { %v4577_v16 = vcombine.low %v4345_v29, %v4352_v59  ;;  %v13212_v38 = vcombine.high %v4345_v29, %v4352_v59  ;;  %v4661_v20 = vcombine.low %v4429_v18, %v4436_v15  ;;  %v13215_v21 = vcombine.high %v4429_v18, %v4436_v15 }
 0xb37   :  { %v4593_v42 = vcombine.low %v4361_v45, %v4368_v0  ;;  %v13213_v62 = vcombine.high %v4361_v45, %v4368_v0  ;;  %v4645_v14 = vcombine.low %v4413_v48, %v4420_v7  ;;  %v13214_v26 = vcombine.high %v4413_v48, %v4420_v7 }
 0xb38   :  { %v4584_v61 = vrot.slane %v4577_v16, %v15013_v13  ;;  %v4592_v46 = vrot.slane %v13212_v38, %v15013_v13  ;;  %v4668_v10 = vrot.slane %v4661_v20, %v15013_v13  ;;  %v4676_v22 = vrot.slane %v13215_v21, %v15013_v13 }
 0xb39   :  { %v4600_v4 = vrot.slane %v4593_v42, %v15013_v13  ;;  %v4608_v24 = vrot.slane %v13213_v62, %v15013_v13  ;;  %v4652_v47 = vrot.slane %v4645_v14, %v15013_v13  ;;  %v4660_v41 = vrot.slane %v13214_v26, %v15013_v13 }
 0xb3a   :  { %v4609_v25 = vcombine.low %v4584_v61, %v4592_v46  ;;  %v4693_v32 = vcombine.low %v4668_v10, %v4676_v22  ;;  %v4610_v3 = vcombine.high %v4584_v61, %v4592_v46  ;;  %v4694_v36 = vcombine.high %v4668_v10, %v4676_v22 }
 0xb3b   :  { %v4625_v6 = vcombine.low %v4600_v4, %v4608_v24  ;;  %v4677_v11 = vcombine.low %v4652_v47, %v4660_v41  ;;  %v4626_v5 = vcombine.high %v4600_v4, %v4608_v24  ;;  %v4678_v37 = vcombine.high %v4652_v47, %v4660_v41 }
 0xb3c   :  { %v4617_v51 = vrot.slane %v4609_v25, %v15015_v19  ;;  %v4701_v63 = vrot.slane %v4693_v32, %v15015_v19  ;;  %v4624_v45 = vrot.slane %v4610_v3, %v15015_v19  ;;  %v4708_v18 = vrot.slane %v4694_v36, %v15015_v19  ;;  %v310_v3 = vld [vmem:[#allocation7] sm:$0xff] }
 0xb3d   :  { %v4633_v40 = vrot.slane %v4625_v6, %v15015_v19  ;;  %v4640_v0 = vrot.slane %v4626_v5, %v15015_v19  ;;  %v311_v5 = vld [vmem:[#allocation7 + $0x8] sm:$0xff] }
 0xb3f   :  { %v4642_v59 = vcombine.high %v4617_v51, %v4633_v40  ;;  %v4643_v38 = vcombine.low %v4624_v45, %v4640_v0  ;;  %v4644_v42 = vcombine.high %v4624_v45, %v4640_v0 }
 0xb6d   :  { %v5395_v56 = vpop.xlane.xlu0 %5394 }
 0xb6e   :  { %14582 = vrcp.f32 %v5395_v56  ;;  %v4692_v56 = vrot.slane %v4678_v37, %v15015_v19  ;;  %v14325_v37 = vpack.c.bf16 %v311_v5, %v310_v3 }
 0xb70   :  { %v4711_v14 = vcombine.low %v4692_v56, %v4708_v18  ;;  %v4712_v20 = vcombine.high %v4692_v56, %v4708_v18 }
 0xb71   :  { %v5398_v34 = vpop.xlane.xlu0 %5397 }
 0xb72   :  { %14584 = vrcp.f32 %v5398_v34  ;;  %v14323_v61 = vpack.c.bf16 %v4712_v20, %v4644_v42 }
 0xb78   :  { %v14583_v44 = vpop.eup %14582 }
 0xb79   :  { %v5401_v27 = vpop.xlane.xlu1 %5400  ;;  %v5425_v55 = vmul.f32 %v14583_v44, %v15902_v33  ;;  %v4685_v33 = vrot.slane %v4677_v11, %v15015_v19 }
 0xb7a   :  { %14586 = vrcp.f32 %v5401_v27 }
 0xb7b   :  { %13865 = vmatmul.mubr.msk.f32.vlgmr.msra.gmra.mrb[30].mxu1 %vm2902_vm3, %v5425_v55  ;;  %v4709_v9 = vcombine.low %v4685_v33, %v4701_v63  ;;  %v4710_v7 = vcombine.high %v4685_v33, %v4701_v63 }
 0xb7c   :  { %v14585_v58 = vpop.eup %14584  ;;  %14306 = vmatpush3.bf16.msra.mxu1 %v15971_v12  ;;  %13871 = vmatprep.mubr.msk.f32.mxu1 %vm14828_vm1, %v17428_v35  ;;  %v4641_v12 = vcombine.low %v4617_v51, %v4633_v40 }
 0xb7d   :  { %14310 = vmatprep.subr.bf16.mxu1 %v17424_v31  ;;  %v5426_v49 = vmul.f32 %v14585_v58, %v15906_v30  ;;  %v14317_v16 = vpack.c.bf16 %v4710_v7, %v4642_v59 }
 0xb7e   :  { %v14314_v1 = vpack.c.bf16 %v4709_v9, %v4641_v12 }
 0xb7f   :  { %13872 = vmatmul.mubr.msk.f32.vlgmr.msra.gmra.mrb[32].mxu1 %vm2902_vm3, %v5426_v49 }
 0xb80   :  { %14312 = vmatpush3.bf16.msra.mxu1 %v15974_v57  ;;  %13885 = vmatprep.mubr.msk.f32.mxu1 %vm14828_vm1, %v17428_v35 }
 0xb81   :  { %14316 = vmatprep.subr.bf16.mxu1 %v17424_v31 }
 0xb84   :  { %v14587_v52 = vpop.eup %14586 }
 0xb85   :  { %v5427_v17 = vmul.f32 %v14587_v52, %v15910_v28 }
 0xb87   :  { %13879 = vmatmul.mubr.msk.f32.vlgmr.msra.gmra.mrb[28].mxu0 %vm2902_vm3, %v5427_v17 }
 0xb88   :  { %14315 = vmatpush3.bf16.msra.mxu0 %v14314_v1  ;;  %13892 = vmatprep.mubr.msk.f32.mxu0 %vm14828_vm1, %v17428_v35 }
 0xb89   :  { %14319 = vmatprep.subr.bf16.mxu0 %v17424_v31 }
 0xba2   :  { %v5404_v30 = vpop.xlane.xlu0 %5403 }
 0xba3   :  { %14588 = vrcp.f32 %v5404_v30 }
 0xba6   :  { %v5407_v57 = vpop.xlane.xlu0 %5406 }
 0xba7   :  { %14590 = vrcp.f32 %v5407_v57  ;;  %v5410_v2 = vpop.xlane.xlu1 %5409 }
 0xba8   :  { %14592 = vrcp.f32 %v5410_v2 }
 0xbaa   :  { %v5416_v28 = vpop.xlane.xlu0 %5415 }
 0xbab   :  { %14594 = vrcp.f32 %v5416_v28  ;;  %v5413_v29 = vpop.xlane.xlu1 %5412 }
 0xbac   :  { %14596 = vrcp.f32 %v5413_v29 }
 0xbad   :  { %v14589_v48 = vpop.eup %14588 }
 0xbae   :  { %v5428_v15 = vmul.f32 %v14589_v48, %v15917_v39  ;;  %v14320_v39 = vpack.c.bf16 %v4711_v14, %v4643_v38 }
 0xbb0   :  { %13886 = vmatmul.mubr.msk.f32.vlgmr.msra.gmra.mrb[34].mxu1 %vm2902_vm3, %v5428_v15 }
 0xbb1   :  { %v14591_v62 = vpop.eup %14590  ;;  %14318 = vmatpush3.bf16.msra.mxu1 %v14317_v16  ;;  %13899 = vmatprep.mubr.msk.f32.mxu1 %vm14828_vm1, %v17428_v35 }
 0xbb2   :  { %v14593_v34 = vpop.eup %14592  ;;  %14322 = vmatprep.subr.bf16.mxu1 %v17424_v31  ;;  %v5429_v26 = vmul.f32 %v14591_v62, %v15925_v54 }
 0xbb3   :  { %v5430_v21 = vmul.f32 %v14593_v34, %v15927_v23 }
 0xbb4   :  { %13893 = vmatmul.mubr.msk.f32.vlgmr.msra.gmra.mrb[30].mxu0 %vm2902_vm3, %v5429_v26 }
 0xbb5   :  { %v14595_v46 = vpop.eup %14594  ;;  %13900 = vmatmul.mubr.msk.f32.vlgmr.msra.gmra.mrb[36].mxu1 %vm2902_vm3, %v5430_v21  ;;  %14321 = vmatpush3.bf16.msra.mxu0 %v14320_v39 }
 0xbb6   :  { %v14597_v4 = vpop.eup %14596  ;;  %14324 = vmatpush3.bf16.msra.mxu1 %v14323_v61  ;;  %13906 = vmatprep.mubr.msk.f32.mxu0 %vm14828_vm1, %v17428_v35  ;;  %v5432_v24 = vmul.f32 %v14595_v46, %v15941_v8 }
 0xbb7   :  { %13913 = vmatprep.mubr.msk.f32.mxu1 %vm14828_vm1, %v17428_v35  ;;  %v5431_v54 = vmul.f32 %v14597_v4, %v15937_v60  ;;  %14326 = vmatprep.subr.bf16.mxu0 %v14325_v37 }
 0xbb9   :  { %13907 = vmatmul.mubr.msk.f32.vlgmr.msra.gmra.mrb[32].mxu0 %vm2902_vm3, %v5431_v54  ;;  %13914 = vmatmul.mubr.msk.f32.vlgmr.msra.gmra.mrb[38].mxu1 %vm2902_vm3, %v5432_v24 }
 0xbba   :  { %14328 = vmatpush3.bf16.msra.mxu0 %v14325_v37 }
 0xc4e   :  { %v5502_v23 = vpop.f32.mrb[30].mxu1 }
 0xc4f   :  { %v13866_v47 = vpop.f32.mrb[31].mxu1 }
 0xc52   :  { %v5575_v41 = vpop.f32.mrb[32].mxu1 }
 0xc53   :  { %v13873_v10 = vpop.f32.mrb[33].mxu1 }
 0xc5a   :  { %v5648_v22 = vpop.f32.mrb[28].mxu0 }
 0xc5b   :  { %v6017_v27 = vcombine.low %v5502_v23, %v5648_v22  ;;  %v6018_v44 = vcombine.high %v5502_v23, %v5648_v22  ;;  %v13880_v25 = vpop.f32.mrb[29].mxu0 }
 0xc5d   :  { %v6025_v32 = vrot.slane %v6017_v27, %v15013_v13  ;;  %v6032_v60 = vrot.slane %v6018_v44, %v15013_v13 }
 0xc83   :  { %v5721_v6 = vpop.f32.mrb[34].mxu1 }
 0xc84   :  { %v6033_v55 = vcombine.low %v5575_v41, %v5721_v6  ;;  %v6034_v8 = vcombine.high %v5575_v41, %v5721_v6  ;;  %v13887_v11 = vpop.f32.mrb[35].mxu1 }
 0xc85   :  { %v313_v11 = vld [vmem:[#allocation7 + $0x18] sm:$0xff] }
 0xc86   :  { %v6041_v58 = vrot.slane %v6033_v55, %v15013_v13  ;;  %v6048_v51 = vrot.slane %v6034_v8, %v15013_v13  ;;  %v312_v8 = vld [vmem:[#allocation7 + $0x10] sm:$0xff] }
 0xc87   :  { %v5794_v40 = vpop.f32.mrb[30].mxu0 }
 0xc88   :  { %v6049_v49 = vcombine.low %v6025_v32, %v6041_v58  ;;  %v6050_v33 = vcombine.high %v6025_v32, %v6041_v58  ;;  %v6065_v63 = vcombine.low %v6032_v60, %v6048_v51  ;;  %v6066_v12 = vcombine.high %v6032_v60, %v6048_v51  ;;  %v5867_v52 = vpop.f32.mrb[36].mxu1  ;;  %v13894_v9 = vpop.f32.mrb[31].mxu0 }
 0xc89   :  { %v13901_v17 = vpop.f32.mrb[37].mxu1 }
 0xc8a   :  { %v6057_v1 = vrot.slane %v6049_v49, %v15015_v19  ;;  %v6064_v30 = vrot.slane %v6050_v33, %v15015_v19  ;;  %v6073_v57 = vrot.slane %v6065_v63, %v15015_v19  ;;  %v6080_v2 = vrot.slane %v6066_v12, %v15015_v19 }
 0xc8b   :  { %v14329_v12 = vpack.c.bf16 %v313_v11, %v312_v8  ;;  %v316_v8 = vld [vmem:[#allocation8 + $0x8] sm:$0xff]  ;;  %v317_v11 = vld [vmem:[#allocation8 + $0x10] sm:$0xff] }
 0xc8c   :  { %v6153_v36 = vcombine.low %v6057_v1, %v6064_v30  ;;  %v13248_v28 = vcombine.high %v6057_v1, %v6064_v30  ;;  %v6169_v29 = vcombine.low %v6073_v57, %v6080_v2  ;;  %v13249_v59 = vcombine.high %v6073_v57, %v6080_v2  ;;  %v5940_v45 = vpop.f32.mrb[32].mxu0  ;;  %v6013_v0 = vpop.f32.mrb[38].mxu1 }
 0xc8d   :  { %v6085_v48 = vcombine.low %v5794_v40, %v5940_v45  ;;  %v6086_v7 = vcombine.high %v5794_v40, %v5940_v45  ;;  %v6101_v56 = vcombine.low %v5867_v52, %v6013_v0  ;;  %v6102_v18 = vcombine.high %v5867_v52, %v6013_v0  ;;  %v13908_v15 = vpop.f32.mrb[33].mxu0  ;;  %v13915_v16 = vpop.f32.mrb[39].mxu1  ;;  %14330 = vmatprep.subr.bf16.mxu0 %v14329_v12 }
 0xc8e   :  { %v6160_v38 = vrot.slane %v6153_v36, %v15013_v13  ;;  %v6168_v42 = vrot.slane %v13248_v28, %v15013_v13  ;;  %v6176_v62 = vrot.slane %v6169_v29, %v15013_v13  ;;  %v6184_v14 = vrot.slane %v13249_v59, %v15013_v13  ;;  %14332 = vmatpush3.bf16.msra.mxu0 %v14329_v12 }
 0xc8f   :  { %v6093_v34 = vrot.slane %v6085_v48, %v15013_v13  ;;  %v6100_v26 = vrot.slane %v6086_v7, %v15013_v13  ;;  %v6109_v20 = vrot.slane %v6101_v56, %v15013_v13  ;;  %v6116_v21 = vrot.slane %v6102_v18, %v15013_v13 }
 0xc90   :  { %v6186_v39 = vcombine.high %v6160_v38, %v6168_v42  ;;  %v6202_v61 = vcombine.high %v6176_v62, %v6184_v14  ;;  %v6185_v46 = vcombine.low %v6160_v38, %v6168_v42  ;;  %v6201_v4 = vcombine.low %v6176_v62, %v6184_v14 }
 0xc91   :  { %v6117_v24 = vcombine.low %v6093_v34, %v6109_v20  ;;  %v6118_v54 = vcombine.high %v6093_v34, %v6109_v20  ;;  %v6133_v23 = vcombine.low %v6100_v26, %v6116_v21  ;;  %v6134_v47 = vcombine.high %v6100_v26, %v6116_v21  ;;  %v13252_v20 = vld [vmem:[%s17369_s9] ss:$0 sm:$0xff] }
 0xc92   :  { %v6200_v41 = vrot.slane %v6186_v39, %v15015_v19  ;;  %v6216_v10 = vrot.slane %v6202_v61, %v15015_v19  ;;  %v6193_v22 = vrot.slane %v6185_v46, %v15015_v19  ;;  %v6209_v27 = vrot.slane %v6201_v4, %v15015_v19 }
 0xc93   :  { %v6125_v44 = vrot.slane %v6117_v24, %v15015_v19  ;;  %v6132_v25 = vrot.slane %v6118_v54, %v15015_v19  ;;  %v6141_v6 = vrot.slane %v6133_v23, %v15015_v19  ;;  %v6148_v55 = vrot.slane %v6134_v47, %v15015_v19 }
 0xc94   :  { %v6219_v32 = vcombine.low %v6200_v41, %v6216_v10  ;;  %v6218_v60 = vcombine.high %v6193_v22, %v6209_v27  ;;  %v6220_v58 = vcombine.high %v6200_v41, %v6216_v10  ;;  %v6217_v51 = vcombine.low %v6193_v22, %v6209_v27 }
 0xc95   :  { %v6221_v40 = vcombine.low %v6125_v44, %v6132_v25  ;;  %v13250_v49 = vcombine.high %v6125_v44, %v6132_v25  ;;  %v6237_v33 = vcombine.low %v6141_v6, %v6148_v55  ;;  %v13251_v63 = vcombine.high %v6141_v6, %v6148_v55 }
 0xc96   :  { %6299 = vrot.lane.b32.xlu1 %v6219_v32, %s17399_s22  ;;  %6291 = vrot.lane.b32.xlu0 %v6218_v60, %s17401_s26  ;;  %v318_v60 = vld [vmem:[#allocation8 + $0x18] sm:$0xff] }
 0xc97   :  { %v6228_v52 = vrot.slane %v6221_v40, %v15013_v13  ;;  %v6236_v9 = vrot.slane %v13250_v49, %v15013_v13  ;;  %v6244_v17 = vrot.slane %v6237_v33, %v15013_v13  ;;  %v6252_v1 = vrot.slane %v13251_v63, %v15013_v13  ;;  %v321_v40 = vld [vmem:[%s17372_s12 + $0x8] sm:$0xff]  ;;  %v322_v49 = vld [vmem:[%s17372_s12 + $0x10] sm:$0xff]  ;;  %v323_v63 = vld [vmem:[%s17372_s12 + $0x18] sm:$0xff] }
 0xc98   :  { %v14345_v12 = vpack.c.bf16 %v323_v63, %v322_v49 }
 0xc99   :  { %v6254_v30 = vcombine.high %v6228_v52, %v6236_v9  ;;  %v6270_v57 = vcombine.high %v6244_v17, %v6252_v1  ;;  %v6253_v2 = vcombine.low %v6228_v52, %v6236_v9  ;;  %v6269_v3 = vcombine.low %v6244_v17, %v6252_v1  ;;  %v324_v52 = vld [vmem:[%s17372_s12 + $0x20] sm:$0xff]  ;;  %v325_v9 = vld [vmem:[%s17372_s12 + $0x28] sm:$0xff] }
 0xc9a   :  { %v14349_v17 = vpack.c.bf16 %v325_v9, %v324_v52 }
 0xc9b   :  { %v6268_v5 = vrot.slane %v6254_v30, %v15015_v19  ;;  %v6284_v37 = vrot.slane %v6270_v57, %v15015_v19  ;;  %v6261_v36 = vrot.slane %v6253_v2, %v15015_v19  ;;  %v6277_v28 = vrot.slane %v6269_v3, %v15015_v19 }
 0xc9d   :  { %v6287_v29 = vcombine.low %v6268_v5, %v6284_v37  ;;  %v6286_v59 = vcombine.high %v6261_v36, %v6277_v28  ;;  %v6288_v45 = vcombine.high %v6268_v5, %v6284_v37  ;;  %v6285_v0 = vcombine.low %v6261_v36, %v6277_v28  ;;  %v13255_v36 = vld [vmem:[%s17376_s16] ss:$0 sm:$0xff] }
 0xc9f   :  { %6301 = vrot.lane.b32.xlu0 %v6287_v29, %s17399_s22  ;;  %6293 = vrot.lane.b32.xlu1 %v6286_v59, %s17401_s26 }
 0xca3   :  { %6309 = vrot.lane.b32.xlu0 %v6288_v45, %s17397_s1  ;;  %6307 = vrot.lane.b32.xlu1 %v6220_v58, %s17397_s1  ;;  %v14337_v58 = vpack.c.bf16 %v318_v60, %v317_v11  ;;  %v13256_v45 = vld [vmem:[%s17377_s17] ss:$0 sm:$0xff]  ;;  %v13266_v11 = vld [vmem:[%s17415_s3 + $0x28] sm:$0xff] }
 0xd08   :  { %v6292_v48 = vpop.permute.xlu0 %6291  ;;  %v6300_v7 = vpop.permute.xlu1 %6299 }
 0xd09   :  { %v6313_v15 = vsel %vm1323_vm2, %v6217_v51, %v6292_v48  ;;  %v320_v51 = vld [vmem:[%s17372_s12] sm:$0xff] }
 0xd0a   :  { %v6315_v38 = vsel %vm2902_vm3, %v6313_v15, %v6300_v7  ;;  %v14341_v33 = vpack.c.bf16 %v321_v40, %v320_v51  ;;  %v327_v15 = vld [vmem:[%s17372_s12 + $0x38] sm:$0xff] }
 0xd0c   :  { %14342 = vmatprep.subr.bf16.mxu0 %v14341_v33 }
 0xd11   :  { %v6302_v56 = vpop.permute.xlu0 %6301  ;;  %v6294_v18 = vpop.permute.xlu1 %6293 }
 0xd12   :  { %v6314_v16 = vsel %vm1323_vm2, %v6285_v0, %v6294_v18  ;;  %v326_v18 = vld [vmem:[%s17372_s12 + $0x30] sm:$0xff] }
 0xd13   :  { %v6316_v62 = vsel %vm2902_vm3, %v6314_v16, %v6302_v56  ;;  %v14353_v16 = vpack.c.bf16 %v327_v15, %v326_v18 }
 0xd15   :  { %v6310_v42 = vpop.permute.xlu0 %6309  ;;  %v6308_v14 = vpop.permute.xlu1 %6307 }
 0xd16   :  { %v6318_v34 = vsel %vm2905_vm4, %v6316_v62, %v6310_v42  ;;  %v6317_v26 = vsel %vm2905_vm4, %v6315_v38, %v6308_v14  ;;  %v13257_v38 = vld [vmem:[%s17371_s11] ss:$0 sm:$0xff] }
 0xd17   :  { %13924 = vmatprep.mubr.msk.f32.mxu0 %vm341_vm0, %v6317_v26 }
 0xd18   :  { %13925 = vmatmul.mubr.msk.f32.vlgmr.msra.gmra.mrb[34].mxu0 %vm341_vm0, %v6318_v34 }
 0xd19   :  { %14344 = vmatpush3.bf16.msra.mxu0 %v14341_v33 }
 0xd1a   :  { %14346 = vmatprep.subr.bf16.mxu0 %v14345_v12 }
 0xd1d   :  { %14348 = vmatpush3.bf16.msra.mxu0 %v14345_v12 }
 0xd1e   :  { %14350 = vmatprep.subr.bf16.mxu0 %v14349_v17 }
 0xd21   :  { %14352 = vmatpush3.bf16.msra.mxu0 %v14349_v17  ;;  %v13263_v17 = vld [vmem:[%s17378_s18] ss:$0 sm:$0xff] }
 0xd22   :  { %14354 = vmatprep.subr.bf16.mxu0 %v14353_v16 }
 0xd25   :  { %14356 = vmatpush3.bf16.msra.mxu0 %v14353_v16 }
 0xd26   :  { %13978 = vmatprep.subr.mxu0 %v17428_v35 }
 0xdeb   :  { %v13926_v21 = vpop.f32.mrb[34].mxu0 }
 0xdec   :  { %v6403_v39 = vadd.f32 %v13926_v21, %v13252_v20  ;;  %v6397_v61 = vpop.f32.mrb[35].mxu0  ;;  %v13260_v21 = vld [vmem:[%s17373_s13] ss:$0 sm:$0xff] }
 0xded   :  { %v6398_v46 = vadd.f32 %v13252_v20, %v6397_v61 }
 0xdee   :  { %v6407_v4 = vadd.f32 %v6403_v39, %v15484_v53 }
 0xdef   :  { %v6406_v24 = vadd.f32 %v6398_v46, %v15482_v50  ;;  %v315_v50 = vld [vmem:[#allocation8] sm:$0xff] }
 0xdf0   :  { %v6411_v54 = vsel %vm341_vm0, %v6407_v4, 0.0  ;;  %v14333_v32 = vpack.c.bf16 %v316_v8, %v315_v50  ;;  %v13265_v8 = vld [vmem:[%s17415_s3 + $0x20] sm:$0xff] }
 0xdf1   :  { %6412 = vadd.xlane.f32.xlu0 %v6411_v54  ;;  %v6408_v23 = vsel %vm341_vm0, %v6406_v24, 0.0  ;;  %v14357_v60 = vpack.c.bf16 %v13266_v11, %v13265_v8 }
 0xdf2   :  { %6409 = vadd.xlane.f32.xlu1 %v6408_v23  ;;  %14334 = vmatprep.subr.bf16.mxu1 %v14333_v32 }
 0xdf3   :  { %14336 = vmatpush3.bf16.msra.mxu1 %v14333_v32  ;;  %v13267_v32 = vld [vmem:[%s17415_s3 + $0x30] sm:$0xff] }
 0xdf4   :  { %14338 = vmatprep.subr.bf16.mxu1 %v14337_v58 }
 0xdf7   :  { %14340 = vmatpush3.bf16.msra.mxu1 %v14337_v58  ;;  %v13268_v58 = vld [vmem:[%s17415_s3 + $0x38] sm:$0xff] }
 0xdf8   :  { %v14361_v51 = vpack.c.bf16 %v13268_v58, %v13267_v32  ;;  %14358 = vmatprep.subr.bf16.mxu1 %v14357_v60 }
 0xe7e   :  { %v6413_v47 = vpop.xlane.xlu0 %6412 }
 0xe7f   :  { %v6415_v41 = vmul.f32 0.03125, %v6413_v47  ;;  %v6410_v10 = vpop.xlane.xlu1 %6409 }
 0xe80   :  { %v6414_v22 = vmul.f32 0.03125, %v6410_v10 }
 0xe81   :  { %v6417_v27 = vsub.f32 %v6407_v4, %v6415_v41 }
 0xe82   :  { %v6416_v44 = vsub.f32 %v6406_v24, %v6414_v22 }
 0xe83   :  { %v6419_v25 = vmul.f32 %v6417_v27, %v6417_v27 }
 0xe84   :  { %v6418_v6 = vmul.f32 %v6416_v44, %v6416_v44 }
 0xe85   :  { %v6423_v55 = vsel %vm341_vm0, %v6419_v25, 0.0 }
 0xe86   :  { %6424 = vadd.xlane.f32.xlu1 %v6423_v55  ;;  %v6420_v53 = vsel %vm341_vm0, %v6418_v6, 0.0 }
 0xe87   :  { %6421 = vadd.xlane.f32.xlu0 %v6420_v53 }
 0xf13   :  { %v6425_v1 = vpop.xlane.xlu1 %6424 }
 0xf14   :  { %v6427_v30 = vmul.f32 0.03125, %v6425_v1  ;;  %v6422_v57 = vpop.xlane.xlu0 %6421 }
 0xf15   :  { %v6426_v2 = vmul.f32 0.03125, %v6422_v57 }
 0xf16   :  { %v6429_v3 = vadd.f32 1e-05, %v6427_v30 }
 0xf17   :  { %v6428_v5 = vadd.f32 1e-05, %v6426_v2  ;;  %v13264_v2 = vld [vmem:[%s17379_s19] ss:$0 sm:$0xff] }
 0xf18   :  { %14598 = vrsqrt.f32 %v6429_v3 }
 0xf19   :  { %14600 = vrsqrt.f32 %v6428_v5 }
 0xf22   :  { %v14599_v37 = vpop.eup %14598 }
 0xf23   :  { %v14601_v28 = vpop.eup %14600  ;;  %v6433_v29 = vmul.f32 %v14599_v37, %v6417_v27 }
 0xf24   :  { %v6432_v59 = vmul.f32 %v14601_v28, %v6416_v44  ;;  %v13297_v28 = vld [vmem:[%s17416_s4 + $0x1] ss:$0 sm:$0xff]  ;;  %s17429_s4 = smov 8  }
 0xf25   :  { %v6441_v0 = vmul.f32 %v13255_v36, %v6433_v29 }
 0xf26   :  { %v6440_v48 = vmul.f32 %v13255_v36, %v6432_v59 }
 0xf27   :  { %v6449_v56 = vadd.f32 %v13256_v45, %v6441_v0 }
 0xf28   :  { %v6448_v7 = vadd.f32 %v13256_v45, %v6440_v48 }
 0xf2a   :  { %13935 = vmatprep.mubr.msk.f32.mxu1 %vm341_vm0, %v6448_v7 }
 0xf2b   :  { %13936 = vmatmul.mubr.msk.f32.vlgmr.msra.gmra.mrb[40].mxu1 %vm341_vm0, %v6449_v56 }
 0xf2c   :  { %14360 = vmatpush3.bf16.msra.mxu1 %v14357_v60 }
 0xf2d   :  { %14362 = vmatprep.subr.bf16.mxu1 %v14361_v51 }
 0xf30   :  { %14364 = vmatpush3.bf16.msra.mxu1 %v14361_v51 }
 0xf31   :  { %13968 = vmatprep.subr.mxu1 %v17428_v35 }
 0xffe   :  { %v13937_v42 = vpop.f32.mrb[40].mxu1 }
 0xfff   :  { %v6534_v62 = vadd.f32 %v13937_v42, %v13257_v38  ;;  %v6528_v14 = vpop.f32.mrb[41].mxu1 }
0x1000   :  { %v6529_v34 = vadd.f32 %v13257_v38, %v6528_v14 }
0x1001   :  { %v6538_v20 = vmax.f32 %v6534_v62, 0.0 }
0x1002   :  { %v6537_v26 = vmax.f32 %v6529_v34, 0.0 }
0x1004   :  { %13954 = vmatprep.mubr.msk.f32.mxu0 %vm6545_vm6, %v6537_v26 }
0x1005   :  { %13955 = vmatmul.mubr.msk.f32.vlgmr.msra.gmra.mrb[36].mxu0 %vm6545_vm6, %v6538_v20 }
0x1006   :  { %13980 = vmatprep.mubr.msk.f32.mxu0 %vm14828_vm1, %v17428_v35 }
0x10d8   :  { %v13956_v39 = vpop.f32.mrb[36].mxu0 }
0x10d9   :  { %v6624_v61 = vadd.f32 %v13956_v39, %v13260_v21  ;;  %v6618_v46 = vpop.f32.mrb[37].mxu0 }
0x10da   :  { %v6619_v4 = vadd.f32 %v13260_v21, %v6618_v46 }
0x10db   :  { %v6628_v24 = vadd.f32 %v6624_v61, %v6449_v56 }
0x10dc   :  { %v6627_v54 = vadd.f32 %v6619_v4, %v6448_v7 }
0x10dd   :  { %v6632_v23 = vsel %vm341_vm0, %v6628_v24, 0.0 }
0x10de   :  { %6633 = vadd.xlane.f32.xlu1 %v6632_v23  ;;  %v6629_v47 = vsel %vm341_vm0, %v6627_v54, 0.0 }
0x10df   :  { %6630 = vadd.xlane.f32.xlu0 %v6629_v47 }
0x116b   :  { %v6634_v41 = vpop.xlane.xlu1 %6633 }
0x116c   :  { %v6636_v10 = vmul.f32 0.03125, %v6634_v41  ;;  %v6631_v22 = vpop.xlane.xlu0 %6630 }
0x116d   :  { %v6635_v27 = vmul.f32 0.03125, %v6631_v22 }
0x116e   :  { %v6638_v44 = vsub.f32 %v6628_v24, %v6636_v10 }
0x116f   :  { %v6637_v25 = vsub.f32 %v6627_v54, %v6635_v27 }
0x1170   :  { %v6640_v6 = vmul.f32 %v6638_v44, %v6638_v44 }
0x1171   :  { %v6639_v55 = vmul.f32 %v6637_v25, %v6637_v25 }
0x1172   :  { %v6644_v53 = vsel %vm341_vm0, %v6640_v6, 0.0 }
0x1173   :  { %6645 = vadd.xlane.f32.xlu1 %v6644_v53  ;;  %v6641_v50 = vsel %vm341_vm0, %v6639_v55, 0.0 }
0x1174   :  { %6642 = vadd.xlane.f32.xlu0 %v6641_v50 }
0x1200   :  { %v6646_v40 = vpop.xlane.xlu1 %6645 }
0x1201   :  { %v6648_v49 = vmul.f32 0.03125, %v6646_v40  ;;  %v6643_v33 = vpop.xlane.xlu0 %6642 }
0x1202   :  { %v6647_v63 = vmul.f32 0.03125, %v6643_v33 }
0x1203   :  { %v6650_v12 = vadd.f32 1e-05, %v6648_v49 }
0x1204   :  { %v6649_v52 = vadd.f32 1e-05, %v6647_v63 }
0x1205   :  { %14602 = vrsqrt.f32 %v6650_v12 }
0x1206   :  { %14604 = vrsqrt.f32 %v6649_v52 }
0x120f   :  { %v14603_v9 = vpop.eup %14602 }
0x1210   :  { %v14605_v1 = vpop.eup %14604  ;;  %v6654_v30 = vmul.f32 %v14603_v9, %v6638_v44 }
0x1211   :  { %v6653_v57 = vmul.f32 %v14605_v1, %v6637_v25 }
0x1212   :  { %v6662_v3 = vmul.f32 %v13263_v17, %v6654_v30 }
0x1213   :  { %v6661_v5 = vmul.f32 %v13263_v17, %v6653_v57 }
0x1214   :  { %v16166_v36 = vadd.f32 %v13264_v2, %v6662_v3 }
0x1215   :  { %v16164_v37 = vadd.f32 %v13264_v2, %v6661_v5 }
0x1217   :  { %13965 = vmatprep.mubr.msk.f32.mxu1 %vm341_vm0, %v16164_v37 }
0x1218   :  { %13966 = vmatmul.mubr.msk.f32.vlgmr.msra.gmra.mrb[42].mxu1 %vm341_vm0, %v16166_v36 }
0x1219   :  { %13970 = vmatprep.mubr.msk.f32.mxu1 %vm14828_vm1, %v17428_v35 }
0x12eb   :  { %v13967_v29 = vpop.f32.mrb[42].mxu1 }
0x12ec   :  { %v6807_v59 = vpop.f32.mrb[43].mxu1  ;;  %v16179_v0 = vadd.f32 %v13967_v29, %v13297_v28 }
0x12ed   :  { %v6808_v45 = vadd.f32 %v13297_v28, %v6807_v59 }
0x12ee   :  { %v16210_v42 = vmul.f32 0.35355338, %v16179_v0 }
0x12ef   :  { %7116 = vrot.lane.b32.xlu1 %v6808_v45, %s14824_s8  ;;  %7112 = vrot.lane.b32.xlu0 %v6808_v45, %s14823_s30  ;;  %v6816_v48 = vmul.f32 0.35355338, %v6808_v45 }
0x12f3   :  { %7120 = vrot.lane.b32.xlu1 %v6808_v45, %s14822_s29  ;;  %7114 = vrot.lane.b32.xlu0 %v16179_v0, %s14823_s30 }
0x12f7   :  { %7118 = vrot.lane.b32.xlu1 %v16179_v0, %s14824_s8  ;;  %7122 = vrot.lane.b32.xlu0 %v16179_v0, %s14822_s29 }
0x12fb   :  { %7124 = vrot.lane.b32.xlu1 %v6808_v45, %s14825_s23  ;;  %6826 = vrot.lane.b32.xlu0 %v6816_v48, %s14824_s8 }
0x12ff   :  { %6820 = vrot.lane.b32.xlu1 %v6816_v48, %s14823_s30 }
0x1361   :  { %v7117_v7 = vpop.permute.xlu1 %7116  ;;  %v7113_v56 = vpop.permute.xlu0 %7112 }
0x1362   :  { %7128 = vrot.lane.b32.xlu0 %v7113_v56, %s14825_s23  ;;  %7132 = vrot.lane.b32.xlu1 %v7117_v7, %s14825_s23 }
0x1365   :  { %v7121_v18 = vpop.permute.xlu1 %7120  ;;  %v16195_v15 = vpop.permute.xlu0 %7114 }
0x1366   :  { %7136 = vrot.lane.b32.xlu0 %v7121_v18, %s14825_s23  ;;  %6832 = vrot.lane.b32.xlu1 %v6816_v48, %s14822_s29 }
0x1369   :  { %v16201_v16 = vpop.permute.xlu1 %7118  ;;  %v16203_v38 = vpop.permute.xlu0 %7122 }
0x136a   :  { %7126 = vrot.lane.b32.xlu0 %v16179_v0, %s14825_s23  ;;  %7130 = vrot.lane.b32.xlu1 %v16195_v15, %s14825_s23 }
0x136d   :  { %v7125_v62 = vpop.permute.xlu1 %7124  ;;  %v6827_v14 = vpop.permute.xlu0 %6826 }
0x136e   :  { %7134 = vrot.lane.b32.xlu0 %v16201_v16, %s14825_s23  ;;  %7138 = vrot.lane.b32.xlu1 %v16203_v38, %s14825_s23  ;;  %v6838_v61 = vcombine.low %v6816_v48, %v6827_v14  ;;  %v6839_v46 = vcombine.high %v6816_v48, %v6827_v14 }
0x1370   :  { %v6846_v55 = vrot.slane %v6838_v61, %v15013_v13  ;;  %v6853_v53 = vrot.slane %v6839_v46, %v15013_v13 }
0x1371   :  { %v6821_v34 = vpop.permute.xlu1 %6820 }
0x1372   :  { %6822 = vrot.lane.b32.xlu0 %v16210_v42, %s14823_s30  ;;  %6828 = vrot.lane.b32.xlu1 %v16210_v42, %s14824_s8 }
0x1376   :  { %6834 = vrot.lane.b32.xlu0 %v16210_v42, %s14822_s29  ;;  %7424 = vrot.lane.b32.xlu1 %v7113_v56, %s14827_s0 }
0x137a   :  { %7420 = vrot.lane.b32.xlu0 %v6808_v45, %s14827_s0  ;;  %7428 = vrot.lane.b32.xlu1 %v7117_v7, %s14827_s0 }
0x137e   :  { %7432 = vrot.lane.b32.xlu0 %v7121_v18, %s14827_s0 }
0x13d4   :  { %v7129_v26 = vpop.permute.xlu0 %7128  ;;  %v7133_v20 = vpop.permute.xlu1 %7132 }
0x13d5   :  { %v7148_v21 = vcombine.low %v7125_v62, %v7133_v20  ;;  %v7149_v39 = vcombine.high %v7125_v62, %v7133_v20 }
0x13d7   :  { %v7156_v10 = vrot.slane %v7148_v21, %v15013_v13  ;;  %v7163_v22 = vrot.slane %v7149_v39, %v15013_v13 }
0x13d8   :  { %v7137_v4 = vpop.permute.xlu0 %7136  ;;  %v6833_v24 = vpop.permute.xlu1 %6832 }
0x13d9   :  { %v7164_v54 = vcombine.low %v7129_v26, %v7137_v4  ;;  %v7165_v23 = vcombine.high %v7129_v26, %v7137_v4  ;;  %v6854_v47 = vcombine.low %v6821_v34, %v6833_v24  ;;  %v6855_v41 = vcombine.high %v6821_v34, %v6833_v24 }
0x13db   :  { %v7172_v27 = vrot.slane %v7164_v54, %v15013_v13  ;;  %v7179_v44 = vrot.slane %v7165_v23, %v15013_v13  ;;  %v6862_v25 = vrot.slane %v6854_v47, %v15013_v13  ;;  %v6869_v6 = vrot.slane %v6855_v41, %v15013_v13 }
0x13dc   :  { %v7127_v50 = vpop.permute.xlu0 %7126  ;;  %v7131_v8 = vpop.permute.xlu1 %7130 }
0x13dd   :  { %v7180_v11 = vcombine.low %v7156_v10, %v7172_v27  ;;  %v7181_v32 = vcombine.high %v7156_v10, %v7172_v27  ;;  %v7196_v60 = vcombine.low %v7163_v22, %v7179_v44  ;;  %v7197_v58 = vcombine.high %v7163_v22, %v7179_v44 }
0x13de   :  { %v6870_v51 = vcombine.low %v6846_v55, %v6862_v25  ;;  %v6871_v40 = vcombine.high %v6846_v55, %v6862_v25  ;;  %v6886_v49 = vcombine.low %v6853_v53, %v6869_v6  ;;  %v6887_v33 = vcombine.high %v6853_v53, %v6869_v6 }
0x13df   :  { %v7188_v63 = vrot.slane %v7180_v11, %v15015_v19  ;;  %v7195_v12 = vrot.slane %v7181_v32, %v15015_v19  ;;  %v7204_v52 = vrot.slane %v7196_v60, %v15015_v19  ;;  %v7211_v9 = vrot.slane %v7197_v58, %v15015_v19 }
0x13e0   :  { %v6878_v17 = vrot.slane %v6870_v51, %v15015_v19  ;;  %v6885_v1 = vrot.slane %v6871_v40, %v15015_v19  ;;  %v6894_v30 = vrot.slane %v6886_v49, %v15015_v19  ;;  %v6901_v57 = vrot.slane %v6887_v33, %v15015_v19  ;;  %v7135_v2 = vpop.permute.xlu0 %7134  ;;  %v7139_v3 = vpop.permute.xlu1 %7138 }
0x13e1   :  { %v7284_v5 = vcombine.low %v7188_v63, %v7195_v12  ;;  %v13304_v28 = vcombine.high %v7188_v63, %v7195_v12  ;;  %v7300_v29 = vcombine.low %v7204_v52, %v7211_v9  ;;  %v13305_v59 = vcombine.high %v7204_v52, %v7211_v9 }
0x13e2   :  { %v6974_v45 = vcombine.low %v6878_v17, %v6885_v1  ;;  %v13300_v48 = vcombine.high %v6878_v17, %v6885_v1  ;;  %v6990_v7 = vcombine.low %v6894_v30, %v6901_v57  ;;  %v13301_v56 = vcombine.high %v6894_v30, %v6901_v57 }
0x13e3   :  { %v16239_v18 = vrot.slane %v7284_v5, %v15013_v13  ;;  %v16242_v62 = vrot.slane %v13304_v28, %v15013_v13  ;;  %v16245_v14 = vrot.slane %v7300_v29, %v15013_v13  ;;  %v16248_v34 = vrot.slane %v13305_v59, %v15013_v13 }
0x13e4   :  { %v16251_v26 = vrot.slane %v6974_v45, %v15013_v13  ;;  %v16254_v20 = vrot.slane %v13300_v48, %v15013_v13  ;;  %v16257_v21 = vrot.slane %v6990_v7, %v15013_v13  ;;  %v16260_v39 = vrot.slane %v13301_v56, %v15013_v13  ;;  %v6823_v61 = vpop.permute.xlu0 %6822  ;;  %v6829_v54 = vpop.permute.xlu1 %6828 }
0x13e5   :  { %v7316_v46 = vcombine.low %v16239_v18, %v16242_v62  ;;  %v7317_v4 = vcombine.high %v16239_v18, %v16242_v62  ;;  %v7332_v24 = vcombine.low %v16245_v14, %v16248_v34  ;;  %v7333_v23 = vcombine.high %v16245_v14, %v16248_v34 }
0x13e6   :  { %v7006_v47 = vcombine.low %v16251_v26, %v16254_v20  ;;  %v7007_v41 = vcombine.high %v16251_v26, %v16254_v20  ;;  %v7022_v10 = vcombine.low %v16257_v21, %v16260_v39  ;;  %v7216_v22 = vcombine.low %v7127_v50, %v7135_v2 }
0x13e7   :  { %v7217_v27 = vcombine.high %v7127_v50, %v7135_v2  ;;  %v7232_v44 = vcombine.low %v7131_v8, %v7139_v3  ;;  %v7233_v25 = vcombine.high %v7131_v8, %v7139_v3  ;;  %v6906_v6 = vcombine.low %v16210_v42, %v6829_v54 }
0x13e8   :  { %v6907_v55 = vcombine.high %v16210_v42, %v6829_v54  ;;  %v6835_v53 = vpop.permute.xlu0 %6834  ;;  %v16279_v11 = vrot.slane %v7316_v46, %v15015_v19  ;;  %v16282_v32 = vrot.slane %v7332_v24, %v15015_v19  ;;  %v7224_v60 = vrot.slane %v7216_v22, %v15013_v13  ;;  %v16294_v30 = vpop.permute.xlu1 %7424 }
0x13e9   :  { %v7231_v58 = vrot.slane %v7217_v27, %v15013_v13  ;;  %v7240_v51 = vrot.slane %v7232_v44, %v15013_v13  ;;  %v7247_v50 = vrot.slane %v7233_v25, %v15013_v13  ;;  %v7023_v8 = vcombine.high %v16257_v21, %v16260_v39 }
0x13ea   :  { %v6914_v42 = vrot.slane %v6906_v6, %v15013_v13  ;;  %v6922_v40 = vcombine.low %v6823_v61, %v6835_v53  ;;  %v6923_v49 = vcombine.high %v6823_v61, %v6835_v53  ;;  %v6921_v9 = vrot.slane %v6907_v55, %v15013_v13 }
0x13eb   :  { %v7248_v33 = vcombine.low %v7224_v60, %v7240_v51  ;;  %v7249_v63 = vcombine.high %v7224_v60, %v7240_v51  ;;  %v7264_v12 = vcombine.low %v7231_v58, %v7247_v50  ;;  %v7265_v52 = vcombine.high %v7231_v58, %v7247_v50 }
0x13ec   :  { %v6930_v17 = vrot.slane %v6922_v40, %v15013_v13  ;;  %v6937_v1 = vrot.slane %v6923_v49, %v15013_v13  ;;  %v7348_v57 = vcombine.low %v16279_v11, %v16282_v32  ;;  %v7421_v24 = vpop.permute.xlu0 %7420  ;;  %v7014_v62 = vrot.slane %v7006_v47, %v15015_v19 }
0x13ed   :  { %v7256_v2 = vrot.slane %v7248_v33, %v15015_v19  ;;  %v7263_v3 = vrot.slane %v7249_v63, %v15015_v19  ;;  %v7272_v5 = vrot.slane %v7264_v12, %v15015_v19  ;;  %v7279_v28 = vrot.slane %v7265_v52, %v15015_v19 }
0x13ee   :  { %v6938_v29 = vcombine.low %v6914_v42, %v6930_v17  ;;  %v6939_v59 = vcombine.high %v6914_v42, %v6930_v17  ;;  %v6954_v45 = vcombine.low %v6921_v9, %v6937_v1  ;;  %v6955_v48 = vcombine.high %v6921_v9, %v6937_v1  ;;  %13969 = vmatpush3.xpose.msk.msra.mxu1 %vm1323_vm2, %v7348_v57  ;;  %v7429_v42 = vpop.permute.xlu1 %7428 }
0x13ef   :  { %v7352_v7 = vcombine.low %v7256_v2, %v7263_v3  ;;  %v13306_v56 = vcombine.high %v7256_v2, %v7263_v3  ;;  %v7368_v61 = vcombine.low %v7272_v5, %v7279_v28  ;;  %v13307_v46 = vcombine.high %v7272_v5, %v7279_v28  ;;  %13973 = vmatprep.subr.mxu1 %v17428_v35 }
0x13f0   :  { %v6946_v54 = vrot.slane %v6938_v29, %v15015_v19  ;;  %v6953_v22 = vrot.slane %v6939_v59, %v15015_v19  ;;  %v6962_v27 = vrot.slane %v6954_v45, %v15015_v19  ;;  %v6969_v44 = vrot.slane %v6955_v48, %v15015_v19 }
0x13f1   :  { %v16309_v25 = vrot.slane %v7352_v7, %v15013_v13  ;;  %v16312_v6 = vrot.slane %v13306_v56, %v15013_v13  ;;  %v16315_v55 = vrot.slane %v7368_v61, %v15013_v13  ;;  %v16318_v53 = vrot.slane %v13307_v46, %v15013_v13 }
0x13f2   :  { %v7042_v60 = vcombine.low %v6946_v54, %v6953_v22  ;;  %v13302_v58 = vcombine.high %v6946_v54, %v6953_v22  ;;  %v7058_v51 = vcombine.low %v6962_v27, %v6969_v44  ;;  %v13303_v50 = vcombine.high %v6962_v27, %v6969_v44 }
0x13f3   :  { %v7384_v40 = vcombine.low %v16309_v25, %v16312_v6  ;;  %v7385_v49 = vcombine.high %v16309_v25, %v16312_v6  ;;  %v7400_v33 = vcombine.low %v16315_v55, %v16318_v53  ;;  %v7331_v63 = vrot.slane %v7317_v4, %v15015_v19  ;;  %v7433_v4 = vpop.permute.xlu0 %7432 }
0x13f4   :  { %v16331_v12 = vrot.slane %v7042_v60, %v15013_v13  ;;  %v16334_v52 = vrot.slane %v13302_v58, %v15013_v13  ;;  %v16337_v9 = vrot.slane %v7058_v51, %v15013_v13  ;;  %v16340_v17 = vrot.slane %v13303_v50, %v15013_v13 }
0x13f5   :  { %v7347_v1 = vrot.slane %v7333_v23, %v15015_v19  ;;  %v7444_v57 = vcombine.low %v7421_v24, %v7429_v42  ;;  %v7445_v18 = vcombine.high %v7421_v24, %v7429_v42  ;;  %v7401_v2 = vcombine.high %v16315_v55, %v16318_v53 }
0x13f6   :  { %v7074_v3 = vcombine.low %v16331_v12, %v16334_v52  ;;  %v7075_v5 = vcombine.high %v16331_v12, %v16334_v52  ;;  %v7090_v14 = vcombine.low %v16337_v9, %v16340_v17  ;;  %v7091_v34 = vcombine.high %v16337_v9, %v16340_v17 }
0x13f7   :  { %v7350_v23 = vcombine.low %v7331_v63, %v7347_v1  ;;  %v7452_v28 = vrot.slane %v7444_v57, %v15013_v13  ;;  %v7030_v47 = vrot.slane %v7022_v10, %v15015_v19  ;;  %v7459_v29 = vrot.slane %v7445_v18, %v15013_v13 }
0x13f8   :  { %v7021_v59 = vrot.slane %v7007_v41, %v15015_v19  ;;  %v7037_v45 = vrot.slane %v7023_v8, %v15015_v19  ;;  %v7460_v48 = vcombine.low %v16294_v30, %v7433_v4  ;;  %v7349_v10 = vcombine.high %v16279_v11, %v16282_v32 }
0x13f9   :  { %13979 = vmatpush3.xpose.msk.msra.mxu0 %vm1323_vm2, %v7350_v23  ;;  %v7038_v7 = vcombine.low %v7014_v62, %v7030_v47  ;;  %v7461_v56 = vcombine.high %v16294_v30, %v7433_v4  ;;  %v7039_v61 = vcombine.high %v7014_v62, %v7030_v47  ;;  %v7392_v20 = vrot.slane %v7384_v40, %v15015_v19 }
0x13fa   :  { %v7040_v46 = vcombine.low %v7021_v59, %v7037_v45  ;;  %v7468_v26 = vrot.slane %v7460_v48, %v15013_v13  ;;  %13988 = vmatprep.subr.mxu0 %v17428_v35  ;;  %v7408_v21 = vrot.slane %v7400_v33, %v15015_v19  ;;  %v7351_v41 = vcombine.high %v7331_v63, %v7347_v1 }
0x13fb   :  { %13971 = vmatmul.mubr.msk.f32.vlgmr.msra.gmra.mrb[44].mxu1 %vm1323_vm2, %v7038_v7  ;;  %v7475_v39 = vrot.slane %v7461_v56, %v15013_v13  ;;  %v7082_v8 = vrot.slane %v7074_v3, %v15015_v19  ;;  %v7098_v11 = vrot.slane %v7090_v14, %v15015_v19  ;;  %v7041_v27 = vcombine.high %v7021_v59, %v7037_v45 }
0x13fc   :  { %13981 = vmatmul.mubr.msk.f32.vlgmr.msra.gmra.mrb[38].mxu0 %vm1323_vm2, %v7040_v46  ;;  %13974 = vmatpush3.xpose.msk.msra.mxu1 %vm1323_vm2, %v7349_v10  ;;  %v7476_v32 = vcombine.low %v7452_v28, %v7468_v26  ;;  %v7477_v30 = vcombine.high %v7452_v28, %v7468_v26  ;;  %v7416_v24 = vcombine.low %v7392_v20, %v7408_v21 }
0x13fd   :  { %v7492_v54 = vcombine.low %v7459_v29, %v7475_v39  ;;  %v7493_v22 = vcombine.high %v7459_v29, %v7475_v39  ;;  %13975 = vmatprep.mubr.msk.f32.mxu1 %vm14828_vm1, %v17428_v35  ;;  %13983 = vmatprep.subr.mxu1 %v17428_v35  ;;  %v7106_v53 = vcombine.low %v7082_v8, %v7098_v11 }
0x13fe   :  { %v7484_v44 = vrot.slane %v7476_v32, %v15015_v19  ;;  %v7491_v55 = vrot.slane %v7477_v30, %v15015_v19  ;;  %13989 = vmatpush3.xpose.msk.msra.mxu0 %vm1323_vm2, %v7416_v24  ;;  %13990 = vmatprep.mubr.msk.f32.mxu0 %vm14828_vm1, %v17428_v35  ;;  %v7417_v51 = vcombine.high %v7392_v20, %v7408_v21 }
0x13ff   :  { %v7500_v60 = vrot.slane %v7492_v54, %v15015_v19  ;;  %v7507_v58 = vrot.slane %v7493_v22, %v15015_v19  ;;  %13976 = vmatmul.mubr.msk.f32.vlgmr.msra.gmra.mrb[46].mxu1 %vm1323_vm2, %v7039_v61  ;;  %13998 = vmatprep.subr.mxu0 %v17428_v35  ;;  %v7399_v40 = vrot.slane %v7385_v49, %v15015_v19 }
0x1400   :  { %v7580_v50 = vcombine.low %v7484_v44, %v7491_v55  ;;  %v13308_v42 = vcombine.high %v7484_v44, %v7491_v55  ;;  %13984 = vmatpush3.xpose.msk.msra.mxu1 %vm1323_vm2, %v7351_v41  ;;  %13985 = vmatprep.mubr.msk.f32.mxu1 %vm14828_vm1, %v17428_v35  ;;  %v7415_v12 = vrot.slane %v7401_v2, %v15015_v19 }
0x1401   :  { %v7596_v33 = vcombine.low %v7500_v60, %v7507_v58  ;;  %v13309_v63 = vcombine.high %v7500_v60, %v7507_v58  ;;  %13993 = vmatprep.subr.mxu1 %v17428_v35  ;;  %13991 = vmatmul.mubr.msk.f32.vlgmr.msra.gmra.mrb[40].mxu0 %vm1323_vm2, %v7106_v53  ;;  %v7107_v52 = vcombine.high %v7082_v8, %v7098_v11 }
0x1402   :  { %14000 = vmatprep.mubr.msk.f32.mxu0 %vm14828_vm1, %v17428_v35  ;;  %v7089_v9 = vrot.slane %v7075_v5, %v15015_v19  ;;  %v7587_v17 = vrot.slane %v7580_v50, %v15013_v13  ;;  %v7595_v1 = vrot.slane %v13308_v42, %v15013_v13  ;;  %v7418_v25 = vcombine.low %v7399_v40, %v7415_v12 }
0x1403   :  { %13986 = vmatmul.mubr.msk.f32.vlgmr.msra.gmra.mrb[48].mxu1 %vm1323_vm2, %v7041_v27  ;;  %v7105_v6 = vrot.slane %v7091_v34, %v15015_v19  ;;  %v7603_v49 = vrot.slane %v7596_v33, %v15013_v13  ;;  %v7611_v57 = vrot.slane %v13309_v63, %v15013_v13  ;;  %v7419_v3 = vcombine.high %v7399_v40, %v7415_v12 }
0x1404   :  { %13994 = vmatpush3.xpose.msk.msra.mxu1 %vm1323_vm2, %v7417_v51  ;;  %13995 = vmatprep.mubr.msk.f32.mxu1 %vm14828_vm1, %v17428_v35  ;;  %v7612_v18 = vcombine.low %v7587_v17, %v7595_v1  ;;  %v7613_v4 = vcombine.high %v7587_v17, %v7595_v1 }
0x1405   :  { %14003 = vmatprep.subr.mxu1 %v17428_v35  ;;  %13999 = vmatpush3.xpose.msk.msra.mxu0 %vm1323_vm2, %v7418_v25  ;;  %v7628_v62 = vcombine.low %v7603_v49, %v7611_v57  ;;  %v7629_v2 = vcombine.high %v7603_v49, %v7611_v57  ;;  %v7108_v14 = vcombine.low %v7089_v9, %v7105_v6 }
0x1406   :  { %14008 = vmatprep.subr.mxu0 %v17428_v35  ;;  %v7620_v5 = vrot.slane %v7612_v18, %v15015_v19  ;;  %v16430_v23 = vrot.slane %v7613_v4, %v15015_v19  ;;  %v7109_v47 = vcombine.high %v7089_v9, %v7105_v6 }
0x1407   :  { %13996 = vmatmul.mubr.msk.f32.vlgmr.msra.gmra.mrb[50].mxu1 %vm1323_vm2, %v7107_v52  ;;  %v7636_v34 = vrot.slane %v7628_v62, %v15015_v19  ;;  %v16433_v28 = vrot.slane %v7629_v2, %v15015_v19 }
0x1408   :  { %14004 = vmatpush3.xpose.msk.msra.mxu1 %vm1323_vm2, %v7419_v3  ;;  %14005 = vmatprep.mubr.msk.f32.mxu1 %vm14828_vm1, %v17428_v35 }
0x1409   :  { %14001 = vmatmul.mubr.msk.f32.vlgmr.msra.gmra.mrb[42].mxu0 %vm1323_vm2, %v7108_v14  ;;  %14013 = vmatprep.subr.mxu1 %v17428_v35  ;;  %v7644_v29 = vcombine.low %v7620_v5, %v7636_v34  ;;  %v7645_v59 = vcombine.high %v7620_v5, %v7636_v34  ;;  %v7646_v45 = vcombine.low %v16430_v23, %v16433_v28 }
0x140a   :  { %14010 = vmatprep.mubr.msk.f32.mxu0 %vm14828_vm1, %v17428_v35  ;;  %v7647_v48 = vcombine.high %v16430_v23, %v16433_v28 }
0x140b   :  { %14006 = vmatmul.mubr.msk.f32.vlgmr.msra.gmra.mrb[52].mxu1 %vm1323_vm2, %v7109_v47  ;;  %14009 = vmatpush3.msra.mxu0 %v7644_v29 }
0x140c   :  { %14014 = vmatpush3.msra.mxu1 %v7645_v59  ;;  %14018 = vmatprep.subr.mxu0 %v17428_v35 }
0x140d   :  { %14015 = vmatprep.mubr.msk.f32.mxu1 %vm14828_vm1, %v17428_v35  ;;  %14023 = vmatprep.subr.mxu1 %v17428_v35 }
0x14ce   :  { %v7788_v7 = vpop.f32.mrb[44].mxu1 }
0x14cf   :  { %v7940_v10 = vpop.f32.mrb[38].mxu0  ;;  %v13972_v56 = vpop.f32.mrb[45].mxu1  ;;  %v8324_v61 = vsel %vm1323_vm2, %v7788_v7, -inf }
0x14d0   :  { %v13982_v46 = vpop.f32.mrb[39].mxu0  ;;  %v8330_v26 = vsel %vm1323_vm2, %v7940_v10, -inf  ;;  %8325 = vmax.xlane.f32.xlu1 %v8324_v61 }
0x14d1   :  { %8331 = vmax.xlane.f32.xlu0 %v8330_v26 }
0x14d2   :  { %v7864_v20 = vpop.f32.mrb[46].mxu1 }
0x14d3   :  { %v13977_v21 = vpop.f32.mrb[47].mxu1  ;;  %v8327_v39 = vsel %vm1323_vm2, %v7864_v20, -inf }
0x14d4   :  { %v8092_v41 = vpop.f32.mrb[40].mxu0 }
0x14d5   :  { %8328 = vmax.xlane.f32.xlu0 %v8327_v39  ;;  %v13992_v8 = vpop.f32.mrb[41].mxu0  ;;  %v8336_v32 = vsel %vm1323_vm2, %v8092_v41, -inf }
0x14d6   :  { %v8016_v11 = vpop.f32.mrb[48].mxu1 }
0x14d7   :  { %v13987_v30 = vpop.f32.mrb[49].mxu1  ;;  %v8333_v24 = vsel %vm1323_vm2, %v8016_v11, -inf }
0x14d8   :  { %8334 = vmax.xlane.f32.xlu1 %v8333_v24 }
0x14d9   :  { %8337 = vmax.xlane.f32.xlu0 %v8336_v32 }
0x14da   :  { %v8168_v54 = vpop.f32.mrb[50].mxu1 }
0x14db   :  { %v13997_v22 = vpop.f32.mrb[51].mxu1  ;;  %v8339_v27 = vsel %vm1323_vm2, %v8168_v54, -inf }
0x14dc   :  { %8340 = vmax.xlane.f32.xlu1 %v8339_v27  ;;  %v8244_v44 = vpop.f32.mrb[42].mxu0 }
0x14dd   :  { %v14002_v55 = vpop.f32.mrb[43].mxu0  ;;  %v8342_v53 = vsel %vm1323_vm2, %v8244_v44, -inf }
0x14de   :  { %v8320_v60 = vpop.f32.mrb[52].mxu1  ;;  %8343 = vmax.xlane.f32.xlu0 %v8342_v53 }
0x14df   :  { %v14007_v58 = vpop.f32.mrb[53].mxu1  ;;  %v8345_v51 = vsel %vm1323_vm2, %v8320_v60, -inf }
0x14e0   :  { %8346 = vmax.xlane.f32.xlu1 %v8345_v51 }
0x14f1   :  { %7426 = vrot.lane.b32.xlu1 %v16195_v15, %s14827_s0 }
0x14f4   :  { %7422 = vrot.lane.b32.xlu0 %v16179_v0, %s14827_s0 }
0x155d   :  { %v8326_v50 = vpop.xlane.xlu1 %8325 }
0x155e   :  { %v8332_v42 = vpop.xlane.xlu0 %8331  ;;  %v8348_v40 = vsub.f32 %v7788_v7, %v8326_v50 }
0x155f   :  { %v8350_v33 = vsub.f32 %v7940_v10, %v8332_v42 }
0x1560   :  { %v8356_v63 = vmul.f32 1.442695, %v8348_v40 }
0x1561   :  { %v8360_v12 = vmul.f32 1.442695, %v8350_v33 }
0x1562   :  { %14606 = vpow2.f32 %v8356_v63  ;;  %v8329_v52 = vpop.xlane.xlu0 %8328 }
0x1563   :  { %v8349_v9 = vsub.f32 %v7864_v20, %v8329_v52  ;;  %14608 = vpow2.f32 %v8360_v12 }
0x1565   :  { %v8358_v17 = vmul.f32 1.442695, %v8349_v9  ;;  %v8335_v1 = vpop.xlane.xlu1 %8334 }
0x1566   :  { %v8351_v25 = vsub.f32 %v8016_v11, %v8335_v1  ;;  %v8338_v6 = vpop.xlane.xlu0 %8337 }
0x1567   :  { %14610 = vpow2.f32 %v8358_v17  ;;  %v8352_v49 = vsub.f32 %v8092_v41, %v8338_v6 }
0x1568   :  { %v8362_v15 = vmul.f32 1.442695, %v8351_v25 }
0x1569   :  { %v8364_v57 = vmul.f32 1.442695, %v8352_v49  ;;  %v8341_v18 = vpop.xlane.xlu1 %8340 }
0x156a   :  { %v8353_v0 = vsub.f32 %v8168_v54, %v8341_v18 }
0x156b   :  { %14612 = vpow2.f32 %v8364_v57  ;;  %v8344_v62 = vpop.xlane.xlu0 %8343 }
0x156c   :  { %v14607_v4 = vpop.eup %14606  ;;  %v8354_v2 = vsub.f32 %v8244_v44, %v8344_v62  ;;  %14614 = vpow2.f32 %v8362_v15  ;;  %v8366_v3 = vmul.f32 1.442695, %v8353_v0 }
0x156d   :  { %v8372_v5 = vsel %vm1323_vm2, %v14607_v4, 0.0  ;;  %v8347_v14 = vpop.xlane.xlu1 %8346  ;;  %v14609_v34 = vpop.eup %14608 }
0x156e   :  { %v8368_v47 = vmul.f32 1.442695, %v8354_v2  ;;  %8373 = vadd.xlane.f32.xlu0 %v8372_v5  ;;  %v8355_v29 = vsub.f32 %v8320_v60, %v8347_v14  ;;  %v8378_v10 = vsel %vm1323_vm2, %v14609_v34, 0.0 }
0x156f   :  { %v7423_v30 = vpop.permute.xlu0 %7422 }
0x1570   :  { %14616 = vpow2.f32 %v8368_v47  ;;  %v8370_v59 = vmul.f32 1.442695, %v8355_v29 }
0x1571   :  { %v14611_v7 = vpop.eup %14610  ;;  %14618 = vpow2.f32 %v8366_v3  ;;  %v7427_v54 = vpop.permute.xlu1 %7426 }
0x1572   :  { %14620 = vpow2.f32 %v8370_v59  ;;  %v8375_v56 = vsel %vm1323_vm2, %v14611_v7, 0.0  ;;  %8379 = vadd.xlane.f32.xlu0 %v8378_v10 }
0x1573   :  { %8376 = vadd.xlane.f32.xlu1 %v8375_v56 }
0x1575   :  { %v16466_v61 = vpop.eup %14612 }
0x1576   :  { %v8384_v46 = vsel %vm1323_vm2, %v16466_v61, 0.0  ;;  %v14615_v26 = vpop.eup %14614 }
0x1577   :  { %8385 = vadd.xlane.f32.xlu1 %v8384_v46  ;;  %v8381_v21 = vsel %vm1323_vm2, %v14615_v26, 0.0 }
0x157a   :  { %v16470_v20 = vpop.eup %14616 }
0x157b   :  { %v16473_v39 = vpop.eup %14618  ;;  %v8390_v41 = vsel %vm1323_vm2, %v16470_v20, 0.0  ;;  %8382 = vadd.xlane.f32.xlu1 %v8381_v21 }
0x157c   :  { %v16477_v8 = vpop.eup %14620  ;;  %8391 = vadd.xlane.f32.xlu0 %v8390_v41  ;;  %v8387_v32 = vsel %vm1323_vm2, %v16473_v39, 0.0 }
0x157d   :  { %v8393_v11 = vsel %vm1323_vm2, %v16477_v8, 0.0 }
0x157f   :  { %8394 = vadd.xlane.f32.xlu1 %v8393_v11 }
0x1580   :  { %8388 = vadd.xlane.f32.xlu0 %v8387_v32 }
0x1590   :  { %7430 = vrot.lane.b32.xlu1 %v16201_v16, %s14827_s0 }
0x1596   :  { %7434 = vrot.lane.b32.xlu0 %v16203_v38, %s14827_s0  ;;  %s17430_s0 = smov 16  }
0x15fb   :  { %v8374_v24 = vpop.xlane.xlu0 %8373 }
0x15fc   :  { %14622 = vrcp.f32 %v8374_v24 }
0x15ff   :  { %v8380_v22 = vpop.xlane.xlu0 %8379 }
0x1600   :  { %14624 = vrcp.f32 %v8380_v22  ;;  %v8377_v27 = vpop.xlane.xlu1 %8376 }
0x1601   :  { %14626 = vrcp.f32 %v8377_v27 }
0x1604   :  { %v8386_v44 = vpop.xlane.xlu1 %8385 }
0x1606   :  { %v14623_v55 = vpop.eup %14622 }
0x1607   :  { %v8404_v53 = vmul.f32 %v14623_v55, %v14607_v4 }
0x1608   :  { %v8383_v60 = vpop.xlane.xlu1 %8382 }
0x1609   :  { %14011 = vmatmul.mubr.msk.f32.vlgmr.msra.gmra.mrb[44].mxu0 %vm1323_vm2, %v8404_v53  ;;  %v8392_v58 = vpop.xlane.xlu0 %8391  ;;  %14628 = vrcp.f32 %v8383_v60 }
0x160a   :  { %v14625_v16 = vpop.eup %14624  ;;  %14019 = vmatpush3.msra.mxu0 %v7646_v45  ;;  %14020 = vmatprep.mubr.msk.f32.mxu0 %vm14828_vm1, %v17428_v35  ;;  %14630 = vrcp.f32 %v8386_v44 }
0x160b   :  { %v14627_v38 = vpop.eup %14626  ;;  %v8406_v51 = vmul.f32 %v14625_v16, %v14609_v34  ;;  %14028 = vmatprep.subr.mxu0 %v17428_v35 }
0x160c   :  { %v8405_v50 = vmul.f32 %v14627_v38, %v14611_v7  ;;  %v8395_v42 = vpop.xlane.xlu1 %8394 }
0x160d   :  { %14021 = vmatmul.mubr.msk.f32.vlgmr.msra.gmra.mrb[46].mxu0 %vm1323_vm2, %v8406_v51  ;;  %v8389_v40 = vpop.xlane.xlu0 %8388 }
0x160e   :  { %14016 = vmatmul.mubr.msk.f32.vlgmr.msra.gmra.mrb[54].mxu1 %vm1323_vm2, %v8405_v50  ;;  %14030 = vmatprep.mubr.msk.f32.mxu0 %vm14828_vm1, %v17428_v35  ;;  %14632 = vrcp.f32 %v8389_v40 }
0x160f   :  { %14024 = vmatpush3.msra.mxu1 %v7647_v48  ;;  %14025 = vmatprep.mubr.msk.f32.mxu1 %vm14828_vm1, %v17428_v35  ;;  %14634 = vrcp.f32 %v8392_v58 }
0x1610   :  { %v7431_v45 = vpop.permute.xlu1 %7430  ;;  %14033 = vmatprep.subr.mxu1 %v17428_v35  ;;  %14636 = vrcp.f32 %v8395_v42 }
0x1611   :  { %v7435_v33 = vpop.permute.xlu0 %7434  ;;  %v7512_v63 = vcombine.low %v7423_v30, %v7431_v45  ;;  %v7513_v12 = vcombine.high %v7423_v30, %v7431_v45 }
0x1612   :  { %v7528_v52 = vcombine.low %v7427_v54, %v7435_v33  ;;  %v7529_v9 = vcombine.high %v7427_v54, %v7435_v33 }
0x1613   :  { %v14629_v17 = vpop.eup %14628  ;;  %v7520_v1 = vrot.slane %v7512_v63, %v15013_v13  ;;  %v7527_v25 = vrot.slane %v7513_v12, %v15013_v13 }
0x1614   :  { %v8407_v6 = vmul.f32 %v14629_v17, %v14615_v26  ;;  %v7536_v23 = vrot.slane %v7528_v52, %v15013_v13  ;;  %v7543_v28 = vrot.slane %v7529_v9, %v15013_v13  ;;  %v14631_v56 = vpop.eup %14630 }
0x1615   :  { %v8408_v27 = vmul.f32 %v14631_v56, %v16466_v61 }
0x1616   :  { %v7544_v48 = vcombine.low %v7520_v1, %v7536_v23  ;;  %v7545_v49 = vcombine.high %v7520_v1, %v7536_v23  ;;  %v7560_v15 = vcombine.low %v7527_v25, %v7543_v28  ;;  %v7561_v57 = vcombine.high %v7527_v25, %v7543_v28  ;;  %14026 = vmatmul.mubr.msk.f32.vlgmr.msra.gmra.mrb[56].mxu1 %vm1323_vm2, %v8407_v6 }
0x1617   :  { %14035 = vmatprep.mubr.msk.f32.mxu1 %vm14828_vm1, %v17428_v35 }
0x1618   :  { %v7552_v18 = vrot.slane %v7544_v48, %v15015_v19  ;;  %v7559_v0 = vrot.slane %v7545_v49, %v15015_v19  ;;  %v7568_v62 = vrot.slane %v7560_v15, %v15015_v19  ;;  %v7575_v4 = vrot.slane %v7561_v57, %v15015_v19  ;;  %v14633_v41 = vpop.eup %14632 }
0x1619   :  { %v14635_v22 = vpop.eup %14634  ;;  %v8409_v44 = vmul.f32 %v14633_v41, %v16473_v39 }
0x161a   :  { %v7648_v2 = vcombine.low %v7552_v18, %v7559_v0  ;;  %v13310_v3 = vcombine.high %v7552_v18, %v7559_v0  ;;  %v7664_v5 = vcombine.low %v7568_v62, %v7575_v4  ;;  %v13311_v14 = vcombine.high %v7568_v62, %v7575_v4  ;;  %v14637_v55 = vpop.eup %14636 }
0x161b   :  { %v8410_v58 = vmul.f32 %v14635_v22, %v16470_v20  ;;  %v8411_v16 = vmul.f32 %v14637_v55, %v16477_v8 }
0x161c   :  { %v7655_v34 = vrot.slane %v7648_v2, %v15013_v13  ;;  %v7663_v47 = vrot.slane %v13310_v3, %v15013_v13  ;;  %v7671_v29 = vrot.slane %v7664_v5, %v15013_v13  ;;  %v7679_v59 = vrot.slane %v13311_v14, %v15013_v13 }
0x161e   :  { %v7680_v7 = vcombine.low %v7655_v34, %v7663_v47  ;;  %v7681_v10 = vcombine.high %v7655_v34, %v7663_v47  ;;  %v7696_v46 = vcombine.low %v7671_v29, %v7679_v59  ;;  %v7697_v26 = vcombine.high %v7671_v29, %v7679_v59 }
0x1620   :  { %v7688_v21 = vrot.slane %v7680_v7, %v15015_v19  ;;  %v7704_v11 = vrot.slane %v7696_v46, %v15015_v19  ;;  %v7695_v32 = vrot.slane %v7681_v10, %v15015_v19  ;;  %v7711_v30 = vrot.slane %v7697_v26, %v15015_v19 }
0x1622   :  { %v7712_v24 = vcombine.low %v7688_v21, %v7704_v11  ;;  %v7713_v54 = vcombine.high %v7688_v21, %v7704_v11  ;;  %v7714_v53 = vcombine.low %v7695_v32, %v7711_v30  ;;  %v7715_v60 = vcombine.high %v7695_v32, %v7711_v30 }
0x1624   :  { %14029 = vmatpush3.msra.mxu0 %v7712_v24  ;;  %14034 = vmatpush3.msra.mxu1 %v7713_v54 }
0x1625   :  { %14031 = vmatmul.mubr.msk.f32.vlgmr.msra.gmra.mrb[48].mxu0 %vm1323_vm2, %v8408_v27  ;;  %14036 = vmatmul.mubr.msk.f32.vlgmr.msra.gmra.mrb[58].mxu1 %vm1323_vm2, %v8409_v44 }
0x1626   :  { %14038 = vmatprep.subr.mxu0 %v17428_v35  ;;  %14043 = vmatprep.subr.mxu1 %v17428_v35 }
0x1627   :  { %14039 = vmatpush3.msra.mxu0 %v7714_v53  ;;  %14044 = vmatpush3.msra.mxu1 %v7715_v60 }
0x1628   :  { %14040 = vmatprep.mubr.msk.f32.mxu0 %vm14828_vm1, %v17428_v35  ;;  %14045 = vmatprep.mubr.msk.f32.mxu1 %vm14828_vm1, %v17428_v35 }
0x1629   :  { %14041 = vmatmul.mubr.msk.f32.vlgmr.msra.gmra.mrb[50].mxu0 %vm1323_vm2, %v8410_v58  ;;  %14046 = vmatmul.mubr.msk.f32.vlgmr.msra.gmra.mrb[60].mxu1 %vm1323_vm2, %v8411_v16 }
0x16dc   :  { %v8481_v61 = vpop.f32.mrb[44].mxu0 }
0x16dd   :  { %v14012_v39 = vpop.f32.mrb[45].mxu0 }
0x16e0   :  { %v8627_v38 = vpop.f32.mrb[46].mxu0 }
0x16e1   :  { %v8554_v51 = vpop.f32.mrb[54].mxu1  ;;  %v8996_v50 = vcombine.low %v8481_v61, %v8627_v38  ;;  %v8997_v20 = vcombine.high %v8481_v61, %v8627_v38  ;;  %v14022_v42 = vpop.f32.mrb[47].mxu0 }
0x16e2   :  { %v14017_v8 = vpop.f32.mrb[55].mxu1 }
0x16e3   :  { %v9004_v12 = vrot.slane %v8996_v50, %v15013_v13  ;;  %v9011_v52 = vrot.slane %v8997_v20, %v15013_v13  ;;  %v13270_v8 = vld [vmem:[%s17417_s24 + $0x20] sm:$0xff] }
0x16e9   :  { %v8700_v40 = vpop.f32.mrb[56].mxu1 }
0x16ea   :  { %v9012_v45 = vcombine.low %v8554_v51, %v8700_v40  ;;  %v9013_v33 = vcombine.high %v8554_v51, %v8700_v40  ;;  %v14027_v63 = vpop.f32.mrb[57].mxu1  ;;  %v13271_v40 = vld [vmem:[%s17417_s24 + $0x28] sm:$0xff] }
0x16ec   :  { %v9020_v9 = vrot.slane %v9012_v45, %v15013_v13  ;;  %v9027_v17 = vrot.slane %v9013_v33, %v15013_v13 }
0x16ee   :  { %v9028_v1 = vcombine.low %v9004_v12, %v9020_v9  ;;  %v9029_v25 = vcombine.high %v9004_v12, %v9020_v9  ;;  %v9044_v6 = vcombine.low %v9011_v52, %v9027_v17  ;;  %v9045_v23 = vcombine.high %v9011_v52, %v9027_v17 }
0x16ef   :  { %v14365_v52 = vpack.c.bf16 %v13271_v40, %v13270_v8 }
0x16f0   :  { %v9036_v28 = vrot.slane %v9028_v1, %v15015_v19  ;;  %v9043_v48 = vrot.slane %v9029_v25, %v15015_v19  ;;  %v9052_v49 = vrot.slane %v9044_v6, %v15015_v19  ;;  %v9059_v15 = vrot.slane %v9045_v23, %v15015_v19  ;;  %v13272_v6 = vld [vmem:[%s17417_s24 + $0x30] sm:$0xff]  ;;  %v13273_v23 = vld [vmem:[%s17417_s24 + $0x38] sm:$0xff] }
0x16f1   :  { %14366 = vmatprep.subr.bf16.mxu0 %v14365_v52 }
0x16f2   :  { %v9132_v57 = vcombine.low %v9036_v28, %v9043_v48  ;;  %v13336_v18 = vcombine.high %v9036_v28, %v9043_v48  ;;  %v9148_v0 = vcombine.low %v9052_v49, %v9059_v15  ;;  %v13337_v62 = vcombine.high %v9052_v49, %v9059_v15  ;;  %14368 = vmatpush3.bf16.msra.mxu0 %v14365_v52  ;;  %v13275_v52 = vld [vmem:[%s17366_s6 + $0x20] sm:$0xff] }
0x16f4   :  { %v9139_v4 = vrot.slane %v9132_v57, %v15013_v13  ;;  %v9147_v2 = vrot.slane %v13336_v18, %v15013_v13  ;;  %v9155_v3 = vrot.slane %v9148_v0, %v15013_v13  ;;  %v9163_v5 = vrot.slane %v13337_v62, %v15013_v13 }
0x16f5   :  { %v14369_v57 = vpack.c.bf16 %v13273_v23, %v13272_v6  ;;  %v16631_v6 = vld [vmem:[%s17367_s7 + $0x1] ss:$0 sm:$0xff] }
0x16f6   :  { %v9164_v14 = vcombine.low %v9139_v4, %v9147_v2  ;;  %v9180_v34 = vcombine.low %v9155_v3, %v9163_v5  ;;  %v9165_v47 = vcombine.high %v9139_v4, %v9147_v2  ;;  %v9181_v29 = vcombine.high %v9155_v3, %v9163_v5 }
0x16f7   :  { %14370 = vmatprep.subr.bf16.mxu0 %v14369_v57 }
0x16f8   :  { %v16550_v59 = vrot.slane %v9164_v14, %v15015_v19  ;;  %v16553_v7 = vrot.slane %v9180_v34, %v15015_v19  ;;  %v9179_v10 = vrot.slane %v9165_v47, %v15015_v19  ;;  %v9195_v56 = vrot.slane %v9181_v29, %v15015_v19  ;;  %v8773_v46 = vpop.f32.mrb[48].mxu0  ;;  %v8846_v26 = vpop.f32.mrb[58].mxu1  ;;  %14372 = vmatpush3.bf16.msra.mxu0 %v14369_v57 }
0x16f9   :  { %v14032_v21 = vpop.f32.mrb[49].mxu0  ;;  %v14037_v41 = vpop.f32.mrb[59].mxu1 }
0x16fa   :  { %v9197_v11 = vcombine.high %v16550_v59, %v16553_v7  ;;  %v9198_v32 = vcombine.low %v9179_v10, %v9195_v56  ;;  %v9199_v30 = vcombine.high %v9179_v10, %v9195_v56  ;;  %v9196_v24 = vcombine.low %v16550_v59, %v16553_v7 }
0x16fc   :  { %9270 = vrot.lane.b32.xlu1 %v9197_v11, %s17429_s4  ;;  %v8919_v54 = vpop.f32.mrb[50].mxu0  ;;  %v8992_v22 = vpop.f32.mrb[60].mxu1 }
0x16fd   :  { %v9064_v27 = vcombine.low %v8773_v46, %v8919_v54  ;;  %v9065_v44 = vcombine.high %v8773_v46, %v8919_v54  ;;  %v9080_v55 = vcombine.low %v8846_v26, %v8992_v22  ;;  %v9081_v53 = vcombine.high %v8846_v26, %v8992_v22  ;;  %v14042_v60 = vpop.f32.mrb[51].mxu0  ;;  %v14047_v58 = vpop.f32.mrb[61].mxu1 }
0x16ff   :  { %v9072_v16 = vrot.slane %v9064_v27, %v15013_v13  ;;  %v9079_v61 = vrot.slane %v9065_v44, %v15013_v13  ;;  %v9088_v39 = vrot.slane %v9080_v55, %v15013_v13  ;;  %v9095_v38 = vrot.slane %v9081_v53, %v15013_v13  ;;  %v17432_v27 = vld [vmem:[#allocation15_spill] sm:$0xff] }
0x1700   :  { %9278 = vrot.lane.b32.xlu1 %v9198_v32, %s17430_s0 }
0x1701   :  { %v9096_v51 = vcombine.low %v9072_v16, %v9088_v39  ;;  %v9097_v50 = vcombine.high %v9072_v16, %v9088_v39  ;;  %v9112_v20 = vcombine.low %v9079_v61, %v9095_v38  ;;  %v9113_v42 = vcombine.high %v9079_v61, %v9095_v38 }
0x1703   :  { %v9104_v45 = vrot.slane %v9096_v51, %v15015_v19  ;;  %v9111_v33 = vrot.slane %v9097_v50, %v15015_v19  ;;  %v9120_v63 = vrot.slane %v9112_v20, %v15015_v19  ;;  %v9127_v12 = vrot.slane %v9113_v42, %v15015_v19 }
0x1704   :  { %9286 = vrot.lane.b32.xlu1 %v9199_v30, %s17431_s27 }
0x1705   :  { %v9200_v9 = vcombine.low %v9104_v45, %v9111_v33  ;;  %v13338_v17 = vcombine.high %v9104_v45, %v9111_v33  ;;  %v9216_v1 = vcombine.low %v9120_v63, %v9127_v12  ;;  %v13339_v25 = vcombine.high %v9120_v63, %v9127_v12  ;;  %v13278_v63 = vld [vmem:[%s17366_s6 + $0x38] sm:$0xff] }
0x1707   :  { %v9207_v28 = vrot.slane %v9200_v9, %v15013_v13  ;;  %v9215_v48 = vrot.slane %v13338_v17, %v15013_v13  ;;  %v9223_v49 = vrot.slane %v9216_v1, %v15013_v13  ;;  %v9231_v15 = vrot.slane %v13339_v25, %v15013_v13  ;;  %v13276_v9 = vld [vmem:[%s17366_s6 + $0x28] sm:$0xff] }
0x1708   :  { %v14508_v17 = vpack.i.bf16 %v13276_v9, %v13275_v52  ;;  %v14373_v1 = vpack.c.bf16 %v13276_v9, %v13275_v52 }
0x1709   :  { %v9232_v18 = vcombine.low %v9207_v28, %v9215_v48  ;;  %v9248_v0 = vcombine.low %v9223_v49, %v9231_v15  ;;  %v9233_v62 = vcombine.high %v9207_v28, %v9215_v48  ;;  %v9249_v4 = vcombine.high %v9223_v49, %v9231_v15 }
0x170a   :  { %14374 = vmatprep.subr.bf16.mxu1 %v14373_v1 }
0x170b   :  { %v9240_v2 = vrot.slane %v9232_v18, %v15015_v19  ;;  %v9256_v3 = vrot.slane %v9248_v0, %v15015_v19  ;;  %v9247_v5 = vrot.slane %v9233_v62, %v15015_v19  ;;  %v9263_v14 = vrot.slane %v9249_v4, %v15015_v19  ;;  %14376 = vmatpush3.bf16.msra.mxu1 %v14373_v1 }
0x170d   :  { %v9265_v34 = vcombine.high %v9240_v2, %v9256_v3  ;;  %v9266_v47 = vcombine.low %v9247_v5, %v9263_v14  ;;  %v9267_v29 = vcombine.high %v9247_v5, %v9263_v14  ;;  %v9264_v59 = vcombine.low %v9240_v2, %v9256_v3 }
0x170f   :  { %9272 = vrot.lane.b32.xlu0 %v9265_v34, %s17429_s4 }
0x1713   :  { %9280 = vrot.lane.b32.xlu0 %v9266_v47, %s17430_s0  ;;  %v13343_v47 = vld [vmem:[%s17374_s14 + $0x1] ss:$0 sm:$0xff] }
0x1717   :  { %9288 = vrot.lane.b32.xlu0 %v9267_v29, %s17431_s27 }
0x176e   :  { %v9271_v7 = vpop.permute.xlu1 %9270 }
0x176f   :  { %v9292_v56 = vsel %vm1323_vm2, %v9196_v24, %v9271_v7  ;;  %v13340_v24 = vld [vmem:[%s17365_s5 + $0x1] ss:$0 sm:$0xff] }
0x1772   :  { %v9279_v10 = vpop.permute.xlu1 %9278 }
0x1773   :  { %v9294_v46 = vsel %vm2902_vm3, %v9292_v56, %v9279_v10  ;;  %v17433_v10 = vld [vmem:[#allocation17_spill] sm:$0xff]  ;;  %v13344_v56 = vld [vmem:[%s17375_s15 + $0x1] ss:$0 sm:$0xff] }
0x1776   :  { %v9287_v26 = vpop.permute.xlu1 %9286 }
0x1777   :  { %v9296_v21 = vsel %vm2905_vm4, %v9294_v46, %v9287_v26  ;;  %v17434_v26 = vld [vmem:[#allocation16_spill] sm:$0xff] }
0x1778   :  { %14056 = vmatprep.mubr.msk.f32.mxu0 %vm341_vm0, %v9296_v21 }
0x1781   :  { %v9273_v41 = vpop.permute.xlu0 %9272 }
0x1782   :  { %v9293_v32 = vsel %vm1323_vm2, %v9264_v59, %v9273_v41 }
0x1785   :  { %v9281_v11 = vpop.permute.xlu0 %9280 }
0x1786   :  { %v9295_v30 = vsel %vm2902_vm3, %v9293_v32, %v9281_v11  ;;  %v17436_v11 = vld [vmem:[#allocation18_spill] sm:$0xff] }
0x1789   :  { %v9289_v54 = vpop.permute.xlu0 %9288 }
0x178a   :  { %v9297_v22 = vsel %vm2905_vm4, %v9295_v30, %v9289_v54 }
0x178b   :  { %14057 = vmatmul.mubr.msk.f32.vlgmr.msra.gmra.mrb[52].mxu0 %vm341_vm0, %v9297_v22 }
0x178c   :  { %14078 = vmatprep.mubr.msk.f32.mxu0 %vm341_vm0, %v17432_v27 }
0x185e   :  { %v14058_v44 = vpop.f32.mrb[52].mxu0 }
0x185f   :  { %v9382_v55 = vadd.f32 %v14058_v44, %v13340_v24  ;;  %v9376_v53 = vpop.f32.mrb[53].mxu0 }
0x1860   :  { %v9377_v60 = vadd.f32 %v13340_v24, %v9376_v53 }
0x1861   :  { %v9386_v58 = vadd.f32 %v9382_v55, %v16166_v36 }
0x1862   :  { %v9385_v16 = vadd.f32 %v9377_v60, %v16164_v37  ;;  %v13277_v37 = vld [vmem:[%s17366_s6 + $0x30] sm:$0xff] }
0x1863   :  { %v9390_v61 = vsel %vm341_vm0, %v9386_v58, 0.0  ;;  %v14513_v12 = vpack.i.bf16 %v13278_v63, %v13277_v37  ;;  %v14377_v25 = vpack.c.bf16 %v13278_v63, %v13277_v37 }
0x1864   :  { %9391 = vadd.xlane.f32.xlu0 %v9390_v61  ;;  %v9387_v39 = vsel %vm341_vm0, %v9385_v16, 0.0 }
0x1865   :  { %9388 = vadd.xlane.f32.xlu1 %v9387_v39  ;;  %14378 = vmatprep.subr.bf16.mxu1 %v14377_v25 }
0x1866   :  { %14380 = vmatpush3.bf16.msra.mxu1 %v14377_v25 }
0x1867   :  { %14389 = vmatprep.subr.bf16.mxu1 %v17424_v31 }
0x18f1   :  { %v9392_v38 = vpop.xlane.xlu0 %9391 }
0x18f2   :  { %v9394_v51 = vmul.f32 0.03125, %v9392_v38  ;;  %v9389_v50 = vpop.xlane.xlu1 %9388 }
0x18f3   :  { %v9393_v20 = vmul.f32 0.03125, %v9389_v50 }
0x18f4   :  { %v9396_v42 = vsub.f32 %v9386_v58, %v9394_v51 }
0x18f5   :  { %v9395_v8 = vsub.f32 %v9385_v16, %v9393_v20 }
0x18f6   :  { %v9398_v40 = vmul.f32 %v9396_v42, %v9396_v42 }
0x18f7   :  { %v9397_v45 = vmul.f32 %v9395_v8, %v9395_v8 }
0x18f8   :  { %v9402_v33 = vsel %vm341_vm0, %v9398_v40, 0.0 }
0x18f9   :  { %9403 = vadd.xlane.f32.xlu1 %v9402_v33  ;;  %v9399_v36 = vsel %vm341_vm0, %v9397_v45, 0.0 }
0x18fa   :  { %9400 = vadd.xlane.f32.xlu0 %v9399_v36 }
0x190a   :  { %14514 = vrot.lane.b32.xlu1 %v14513_v12, %s14825_s23 }
0x190e   :  { %9534 = vrot.lane.b32.xlu1 %v16631_v6, %s14825_s23 }
0x1910   :  { %14509 = vrot.lane.b32.xlu0 %v14508_v17, %s14825_s23 }
0x1986   :  { %v9404_v23 = vpop.xlane.xlu1 %9403 }
0x1987   :  { %v9406_v28 = vmul.f32 0.03125, %v9404_v23  ;;  %v9401_v48 = vpop.xlane.xlu0 %9400 }
0x1988   :  { %v9405_v49 = vmul.f32 0.03125, %v9401_v48 }
0x1989   :  { %v9408_v15 = vadd.f32 1e-05, %v9406_v28 }
0x198a   :  { %v9407_v57 = vadd.f32 1e-05, %v9405_v49  ;;  %v14515_v18 = vpop.permute.xlu1 %14514 }
0x198b   :  { %14638 = vrsqrt.f32 %v9408_v15  ;;  %v14510_v0 = vpop.permute.xlu0 %14509  ;;  %v14517_v62 = vunpack.i.h.bf16 %v14515_v18  ;;  %v14516_v4 = vunpack.i.l.bf16 %v14515_v18 }
0x198c   :  { %14640 = vrsqrt.f32 %v9407_v57  ;;  %v14512_v2 = vunpack.i.h.bf16 %v14510_v0  ;;  %v14511_v3 = vunpack.i.l.bf16 %v14510_v0 }
0x198d   :  { %v14385_v14 = vpack.c.bf16 %v14517_v62, %v14516_v4 }
0x198e   :  { %v14381_v5 = vpack.c.bf16 %v14512_v2, %v14511_v3  ;;  %v9535_v30 = vpop.permute.xlu1 %9534 }
0x1990   :  { %14382 = vmatprep.subr.bf16.mxu0 %v14381_v5 }
0x1991   :  { %14384 = vmatpush3.bf16.msra.mxu0 %v14381_v5 }
0x1992   :  { %14386 = vmatprep.subr.bf16.mxu0 %v14385_v14 }
0x1995   :  { %v14639_v34 = vpop.eup %14638  ;;  %14388 = vmatpush3.bf16.msra.mxu0 %v14385_v14 }
0x1996   :  { %v14641_v29 = vpop.eup %14640  ;;  %v9412_v59 = vmul.f32 %v14639_v34, %v9396_v42  ;;  %14393 = vmatprep.subr.bf16.mxu0 %v17424_v31 }
0x1997   :  { %v9411_v7 = vmul.f32 %v14641_v29, %v9395_v8 }
0x1998   :  { %14079 = vmatmul.mubr.msk.f32.vlgmr.msra.gmra.mrb[54].mxu0 %vm341_vm0, %v17433_v10  ;;  %v9420_v46 = vmul.f32 %v13343_v47, %v9412_v59 }
0x1999   :  { %14081 = vmatprep.mubr.msk.f32.mxu0 %vm341_vm0, %v17434_v26  ;;  %v9419_v21 = vmul.f32 %v13343_v47, %v9411_v7 }
0x199a   :  { %v16651_v32 = vadd.f32 %v13344_v56, %v9420_v46 }
0x199b   :  { %v16647_v41 = vadd.f32 %v13344_v56, %v9419_v21 }
0x199c   :  { %14082 = vmatmul.mubr.msk.f32.gmra.mrb[56].mxu0 %vm341_vm0, %v17436_v11  ;;  %17437 = vst [vmem:[#allocation17_spill] sm:$0xff] %v16651_v32 }
0x199d   :  { %17435 = vst [vmem:[#allocation15_spill] sm:$0xff] %v16647_v41  ;;  %14067 = vmatprep.mubr.msk.f32.mxu1 %vm341_vm0, %v16647_v41  ;;  %14095 = vmatprep.mubr.msk.f32.mxu0 %vm14828_vm1, %v17428_v35 }
0x199e   :  { %14068 = vmatmul.mubr.msk.f32.vlgmr.msra.gmra.mrb[62].mxu1 %vm341_vm0, %v16651_v32 }
0x199f   :  { %14088 = vmatprep.mubr.msk.f32.mxu1 %vm14828_vm1, %v17428_v35 }
0x1a6b   :  { %v14080_v54 = vpop.f32.mrb[54].mxu0 }
0x1a6c   :  { %v16661_v22 = vadd.f32 %v14080_v54, %v9535_v30  ;;  %v9603_v27 = vpop.f32.mrb[55].mxu0 }
0x1a6d   :  { %v16663_v24 = vadd.f32 %v9603_v27, %v9535_v30 }
0x1a6e   :  { %9920 = vrot.lane.b32.xlu1 %v16661_v22, %s14823_s30 }
0x1a6f   :  { %v14083_v44 = vpop.f32.mrb[56].mxu0  ;;  %9918 = vrot.lane.b32.xlu0 %v16663_v24, %s14823_s30 }
0x1a70   :  { %v9613_v55 = vpop.f32.mrb[57].mxu0  ;;  %v16680_v61 = vadd.f32 %v14083_v44, %v9535_v30 }
0x1a71   :  { %v14069_v53 = vpop.f32.mrb[62].mxu1  ;;  %v16677_v58 = vadd.f32 %v9613_v55, %v9535_v30 }
0x1a72   :  { %v9507_v60 = vpop.f32.mrb[63].mxu1  ;;  %9932 = vrot.lane.b32.xlu1 %v16661_v22, %s14824_s8  ;;  %v9513_v38 = vadd.f32 %v14069_v53, %v16631_v6 }
0x1a73   :  { %9930 = vrot.lane.b32.xlu0 %v16663_v24, %s14824_s8  ;;  %v9508_v16 = vadd.f32 %v16631_v6, %v9507_v60 }
0x1a74   :  { %v16701_v51 = vmul.f32 0.35355338, %v9513_v38 }
0x1a75   :  { %v16686_v39 = vmul.f32 0.35355338, %v9508_v16 }
0x1a76   :  { %9944 = vrot.lane.b32.xlu1 %v16661_v22, %s14822_s29 }
0x1a77   :  { %9942 = vrot.lane.b32.xlu0 %v16663_v24, %s14822_s29 }
0x1a7a   :  { %9922 = vrot.lane.b32.xlu1 %v16677_v58, %s14823_s30 }
0x1a7b   :  { %9924 = vrot.lane.b32.xlu0 %v16680_v61, %s14823_s30 }
0x1a7e   :  { %9630 = vrot.lane.b32.xlu1 %v16686_v39, %s14824_s8 }
0x1a7f   :  { %9624 = vrot.lane.b32.xlu0 %v16686_v39, %s14823_s30 }
0x1a82   :  { %9934 = vrot.lane.b32.xlu1 %v16677_v58, %s14824_s8 }
0x1a83   :  { %9636 = vrot.lane.b32.xlu0 %v16686_v39, %s14822_s29 }
0x1a86   :  { %9946 = vrot.lane.b32.xlu1 %v16677_v58, %s14822_s29 }
0x1a87   :  { %9936 = vrot.lane.b32.xlu0 %v16680_v61, %s14824_s8 }
0x1a8a   :  { %9626 = vrot.lane.b32.xlu1 %v16701_v51, %s14823_s30 }
0x1a8b   :  { %9948 = vrot.lane.b32.xlu0 %v16680_v61, %s14822_s29 }
0x1a8e   :  { %9638 = vrot.lane.b32.xlu1 %v16701_v51, %s14822_s29 }
0x1a8f   :  { %9632 = vrot.lane.b32.xlu0 %v16701_v51, %s14824_s8 }
0x1ae0   :  { %v16711_v50 = vpop.permute.xlu1 %9920 }
0x1ae1   :  { %v16713_v20 = vpop.permute.xlu0 %9918 }
0x1ae4   :  { %v16715_v42 = vpop.permute.xlu1 %9932 }
0x1ae5   :  { %v16717_v8 = vpop.permute.xlu0 %9930  ;;  %v10022_v40 = vcombine.low %v16661_v22, %v16715_v42  ;;  %v10023_v45 = vcombine.high %v16661_v22, %v16715_v42 }
0x1ae6   :  { %v9954_v33 = vcombine.low %v16663_v24, %v16717_v8  ;;  %v9955_v36 = vcombine.high %v16663_v24, %v16717_v8 }
0x1ae7   :  { %v10030_v1 = vrot.slane %v10022_v40, %v15013_v13  ;;  %v10037_v25 = vrot.slane %v10023_v45, %v15013_v13 }
0x1ae8   :  { %v16727_v37 = vpop.permute.xlu1 %9944  ;;  %v9962_v28 = vrot.slane %v9954_v33, %v15013_v13  ;;  %v9969_v48 = vrot.slane %v9955_v36, %v15013_v13 }
0x1ae9   :  { %v10038_v63 = vcombine.low %v16711_v50, %v16727_v37  ;;  %v10039_v12 = vcombine.high %v16711_v50, %v16727_v37  ;;  %v16733_v52 = vpop.permute.xlu0 %9942 }
0x1aea   :  { %v9970_v9 = vcombine.low %v16713_v20, %v16733_v52  ;;  %v9971_v17 = vcombine.high %v16713_v20, %v16733_v52 }
0x1aeb   :  { %v10046_v6 = vrot.slane %v10038_v63, %v15013_v13  ;;  %v10053_v23 = vrot.slane %v10039_v12, %v15013_v13 }
0x1aec   :  { %v9978_v49 = vrot.slane %v9970_v9, %v15013_v13  ;;  %v9985_v15 = vrot.slane %v9971_v17, %v15013_v13  ;;  %v16747_v57 = vpop.permute.xlu1 %9922 }
0x1aed   :  { %v10054_v18 = vcombine.low %v10030_v1, %v10046_v6  ;;  %v10055_v0 = vcombine.high %v10030_v1, %v10046_v6  ;;  %v10070_v62 = vcombine.low %v10037_v25, %v10053_v23  ;;  %v10071_v4 = vcombine.high %v10037_v25, %v10053_v23  ;;  %v16749_v2 = vpop.permute.xlu0 %9924 }
0x1aee   :  { %v9986_v3 = vcombine.low %v9962_v28, %v9978_v49  ;;  %v9987_v5 = vcombine.high %v9962_v28, %v9978_v49  ;;  %v10002_v14 = vcombine.low %v9969_v48, %v9985_v15  ;;  %v10003_v34 = vcombine.high %v9969_v48, %v9985_v15 }
0x1aef   :  { %v10062_v47 = vrot.slane %v10054_v18, %v15015_v19  ;;  %v10069_v29 = vrot.slane %v10055_v0, %v15015_v19  ;;  %v10078_v59 = vrot.slane %v10070_v62, %v15015_v19  ;;  %v10085_v7 = vrot.slane %v10071_v4, %v15015_v19 }
0x1af0   :  { %v9994_v10 = vrot.slane %v9986_v3, %v15015_v19  ;;  %v10001_v56 = vrot.slane %v9987_v5, %v15015_v19  ;;  %v10010_v46 = vrot.slane %v10002_v14, %v15015_v19  ;;  %v10017_v26 = vrot.slane %v10003_v34, %v15015_v19  ;;  %v9631_v21 = vpop.permute.xlu1 %9630 }
0x1af1   :  { %v10294_v11 = vcombine.low %v10062_v47, %v10069_v29  ;;  %v13358_v30 = vcombine.high %v10062_v47, %v10069_v29  ;;  %v9625_v54 = vpop.permute.xlu0 %9624  ;;  %v10310_v60 = vcombine.low %v10078_v59, %v10085_v7  ;;  %v13359_v9 = vcombine.high %v10078_v59, %v10085_v7 }
0x1af2   :  { %v10226_v27 = vcombine.low %v9994_v10, %v10001_v56  ;;  %v13356_v44 = vcombine.high %v9994_v10, %v10001_v56  ;;  %v10242_v55 = vcombine.low %v10010_v46, %v10017_v26  ;;  %v13357_v53 = vcombine.high %v10010_v46, %v10017_v26 }
0x1af3   :  { %v16774_v63 = vrot.slane %v10294_v11, %v15013_v13  ;;  %v16777_v12 = vrot.slane %v13358_v30, %v15013_v13  ;;  %v9642_v25 = vcombine.low %v16686_v39, %v9631_v21  ;;  %v9643_v6 = vcombine.high %v16686_v39, %v9631_v21 }
0x1af4   :  { %v16760_v16 = vrot.slane %v10226_v27, %v15013_v13  ;;  %v16763_v38 = vrot.slane %v13356_v44, %v15013_v13  ;;  %v16766_v40 = vrot.slane %v10242_v55, %v15013_v13  ;;  %v16769_v45 = vrot.slane %v13357_v53, %v15013_v13  ;;  %v16771_v33 = vpop.permute.xlu1 %9934 }
0x1af5   :  { %v9637_v36 = vpop.permute.xlu0 %9636  ;;  %v16786_v23 = vrot.slane %v10310_v60, %v15013_v13  ;;  %v9650_v15 = vrot.slane %v9642_v25, %v15013_v13  ;;  %v9657_v18 = vrot.slane %v9643_v6, %v15013_v13  ;;  %v10090_v0 = vcombine.low %v16677_v58, %v16771_v33 }
0x1af6   :  { %v10258_v17 = vcombine.low %v16760_v16, %v16763_v38  ;;  %v10274_v1 = vcombine.low %v16766_v40, %v16769_v45  ;;  %v9658_v28 = vcombine.low %v9625_v54, %v9637_v36  ;;  %v9659_v48 = vcombine.high %v9625_v54, %v9637_v36 }
0x1af7   :  { %v10091_v62 = vcombine.high %v16677_v58, %v16771_v33  ;;  %v16805_v34 = vrot.slane %v13359_v9, %v15013_v13  ;;  %v10326_v47 = vcombine.low %v16774_v63, %v16777_v12  ;;  %v10098_v26 = vrot.slane %v10090_v0, %v15013_v13 }
0x1af8   :  { %v16788_v49 = vpop.permute.xlu1 %9946  ;;  %v9666_v4 = vrot.slane %v9658_v28, %v15013_v13  ;;  %v9673_v39 = vrot.slane %v9659_v48, %v15013_v13  ;;  %v16810_v29 = vrot.slane %v10258_v17, %v15015_v19  ;;  %v16813_v59 = vrot.slane %v10274_v1, %v15015_v19 }
0x1af9   :  { %17438 = vst [vmem:[#allocation16_spill] sm:$0xff] %v16788_v49  ;;  %v10106_v3 = vcombine.low %v16747_v57, %v16788_v49  ;;  %v10107_v5 = vcombine.high %v16747_v57, %v16788_v49  ;;  %v16802_v14 = vpop.permute.xlu0 %9936  ;;  %v10105_v21 = vrot.slane %v10091_v62, %v15013_v13 }
0x1afa   :  { %v9674_v7 = vcombine.low %v9650_v15, %v9666_v4  ;;  %v9675_v10 = vcombine.high %v9650_v15, %v9666_v4  ;;  %v9690_v56 = vcombine.low %v9657_v18, %v9673_v39  ;;  %v9691_v46 = vcombine.high %v9657_v18, %v9673_v39 }
0x1afb   :  { %v10114_v11 = vrot.slane %v10106_v3, %v15013_v13  ;;  %v10121_v30 = vrot.slane %v10107_v5, %v15013_v13  ;;  %v10158_v25 = vcombine.low %v16680_v61, %v16802_v14  ;;  %v10159_v6 = vcombine.high %v16680_v61, %v16802_v14 }
0x1afc   :  { %v9682_v54 = vrot.slane %v9674_v7, %v15015_v19  ;;  %v9689_v27 = vrot.slane %v9675_v10, %v15015_v19  ;;  %v9698_v44 = vrot.slane %v9690_v56, %v15015_v19  ;;  %v9705_v55 = vrot.slane %v9691_v46, %v15015_v19  ;;  %v9627_v28 = vpop.permute.xlu1 %9626 }
0x1afd   :  { %v10122_v53 = vcombine.low %v10098_v26, %v10114_v11  ;;  %v10123_v60 = vcombine.high %v10098_v26, %v10114_v11  ;;  %v10138_v36 = vcombine.low %v10105_v21, %v10121_v30  ;;  %v10139_v9 = vcombine.high %v10105_v21, %v10121_v30  ;;  %v16827_v48 = vpop.permute.xlu0 %9948 }
0x1afe   :  { %v9778_v17 = vcombine.low %v9682_v54, %v9689_v27  ;;  %v13352_v1 = vcombine.high %v9682_v54, %v9689_v27  ;;  %17439 = vst [vmem:[#allocation18_spill] sm:$0xff] %v16827_v48  ;;  %v9794_v15 = vcombine.low %v9698_v44, %v9705_v55  ;;  %v13353_v18 = vcombine.high %v9698_v44, %v9705_v55 }
0x1aff   :  { %v16830_v0 = vrot.slane %v10122_v53, %v15015_v19  ;;  %v16833_v62 = vrot.slane %v10123_v60, %v15015_v19  ;;  %v10342_v39 = vcombine.low %v16786_v23, %v16805_v34  ;;  %v10146_v10 = vrot.slane %v10138_v36, %v15015_v19 }
0x1b00   :  { %v16842_v5 = vrot.slane %v9778_v17, %v15013_v13  ;;  %v16845_v7 = vrot.slane %v13352_v1, %v15013_v13  ;;  %v10153_v56 = vrot.slane %v10139_v9, %v15015_v19  ;;  %v10166_v26 = vrot.slane %v10158_v25, %v15013_v13  ;;  %v9639_v36 = vpop.permute.xlu1 %9638 }
0x1b01   :  { %v10290_v21 = vcombine.low %v16810_v29, %v16813_v59  ;;  %v10334_v11 = vrot.slane %v10326_v47, %v15015_v19  ;;  %v16856_v30 = vrot.slane %v9794_v15, %v15013_v13  ;;  %v16859_v54 = vrot.slane %v13353_v18, %v15013_v13  ;;  %v9633_v9 = vpop.permute.xlu0 %9632 }
0x1b02   :  { %v10362_v27 = vcombine.low %v16830_v0, %v16833_v62  ;;  %v10173_v44 = vrot.slane %v10159_v6, %v15013_v13  ;;  %v13360_v55 = vcombine.high %v16830_v0, %v16833_v62  ;;  %v10174_v53 = vcombine.low %v16749_v2, %v16827_v48 }
0x1b03   :  { %v10175_v47 = vcombine.high %v16749_v2, %v16827_v48  ;;  %v10350_v60 = vrot.slane %v10342_v39, %v15015_v19  ;;  %v9810_v17 = vcombine.low %v16842_v5, %v16845_v7  ;;  %v10378_v1 = vcombine.low %v10146_v10, %v10153_v56 }
0x1b04   :  { %v13361_v25 = vcombine.high %v10146_v10, %v10153_v56  ;;  %v10291_v6 = vcombine.high %v16810_v29, %v16813_v59  ;;  %v10182_v15 = vrot.slane %v10174_v53, %v15013_v13  ;;  %v9726_v4 = vcombine.low %v9627_v28, %v9639_v36 }
0x1b05   :  { %v10189_v18 = vrot.slane %v10175_v47, %v15013_v13  ;;  %v10358_v0 = vcombine.low %v10334_v11, %v10350_v60  ;;  %v10359_v62 = vcombine.high %v10334_v11, %v10350_v60  ;;  %v9727_v46 = vcombine.high %v9627_v28, %v9639_v36 }
0x1b06   :  { %v9710_v39 = vcombine.low %v16701_v51, %v9633_v9  ;;  %v9711_v3 = vcombine.high %v16701_v51, %v9633_v9  ;;  %v10190_v41 = vcombine.low %v10166_v26, %v10182_v15  ;;  %v10191_v32 = vcombine.high %v10166_v26, %v10182_v15 }
0x1b07   :  { %v10206_v48 = vcombine.low %v10173_v44, %v10189_v18  ;;  %v10207_v49 = vcombine.high %v10173_v44, %v10189_v18  ;;  %v14390_v10 = vpack.c.bf16 %v10358_v0, %v10290_v21  ;;  %v14394_v56 = vpack.c.bf16 %v10359_v62, %v10291_v6 }
0x1b08   :  { %v9734_v29 = vrot.slane %v9726_v4, %v15013_v13  ;;  %v9741_v59 = vrot.slane %v9727_v46, %v15013_v13  ;;  %v10198_v53 = vrot.slane %v10190_v41, %v15015_v19  ;;  %v10205_v11 = vrot.slane %v10191_v32, %v15015_v19 }
0x1b09   :  { %v10214_v28 = vrot.slane %v10206_v48, %v15015_v19  ;;  %v10221_v47 = vrot.slane %v10207_v49, %v15015_v19  ;;  %v9826_v51 = vcombine.low %v16856_v30, %v16859_v54  ;;  %14392 = vmatpush3.bf16.xpose.msk.msra.mxu1 %vm15708_vm5, %v14390_v10  ;;  %14396 = vmatpush3.bf16.xpose.msk.msra.mxu0 %vm15708_vm5, %v14394_v56 }
0x1b0a   :  { %v9718_v4 = vrot.slane %v9710_v39, %v15013_v13  ;;  %v9725_v46 = vrot.slane %v9711_v3, %v15013_v13  ;;  %v10430_v41 = vcombine.low %v10198_v53, %v10205_v11  ;;  %v13362_v26 = vcombine.high %v10198_v53, %v10205_v11  ;;  %14397 = vmatprep.subr.bf16.mxu1 %v17424_v31 }
0x1b0b   :  { %v10446_v32 = vcombine.low %v10214_v28, %v10221_v47  ;;  %v13363_v21 = vcombine.high %v10214_v28, %v10221_v47  ;;  %14401 = vmatprep.subr.bf16.mxu0 %v17424_v31  ;;  %v16896_v36 = vrot.slane %v10362_v27, %v15013_v13  ;;  %v16899_v9 = vrot.slane %v13360_v55, %v15013_v13 }
0x1b0c   :  { %v9742_v49 = vcombine.low %v9718_v4, %v9734_v29  ;;  %v9743_v48 = vcombine.high %v9718_v4, %v9734_v29  ;;  %v9758_v44 = vcombine.low %v9725_v46, %v9741_v59  ;;  %v9759_v60 = vcombine.high %v9725_v46, %v9741_v59 }
0x1b0d   :  { %v16902_v3 = vrot.slane %v10378_v1, %v15013_v13  ;;  %v16905_v6 = vrot.slane %v13361_v25, %v15013_v13  ;;  %v16908_v15 = vrot.slane %v10430_v41, %v15013_v13  ;;  %v16911_v18 = vrot.slane %v13362_v26, %v15013_v13 }
0x1b0e   :  { %v16914_v0 = vrot.slane %v10446_v32, %v15013_v13  ;;  %v16917_v27 = vrot.slane %v13363_v21, %v15013_v13  ;;  %v10343_v55 = vcombine.high %v16786_v23, %v16805_v34  ;;  %v9811_v1 = vcombine.high %v16842_v5, %v16845_v7 }
0x1b0f   :  { %v9818_v25 = vrot.slane %v9810_v17, %v15015_v19  ;;  %v9750_v62 = vrot.slane %v9742_v49, %v15015_v19  ;;  %v9757_v39 = vrot.slane %v9743_v48, %v15015_v19  ;;  %v9766_v10 = vrot.slane %v9758_v44, %v15015_v19 }
0x1b10   :  { %v9773_v56 = vrot.slane %v9759_v60, %v15015_v19  ;;  %v9834_v29 = vrot.slane %v9826_v51, %v15015_v19  ;;  %v17440_v59 = vcombine.high %v16760_v16, %v16763_v38  ;;  %v17441_v34 = vcombine.high %v16766_v40, %v16769_v45 }
0x1b11   :  { %v17442_v7 = vcombine.high %v16774_v63, %v16777_v12  ;;  %v10394_v53 = vcombine.low %v16896_v36, %v16899_v9  ;;  %v10410_v11 = vcombine.low %v16902_v3, %v16905_v6  ;;  %v10462_v16 = vcombine.low %v16908_v15, %v16911_v18 }
0x1b12   :  { %v10273_v23 = vrot.slane %v17440_v59, %v15015_v19  ;;  %v10289_v5 = vrot.slane %v17441_v34, %v15015_v19  ;;  %v10478_v38 = vcombine.low %v16914_v0, %v16917_v27  ;;  %v9842_v28 = vcombine.low %v9818_v25, %v9834_v29 }
0x1b13   :  { %v10341_v17 = vrot.slane %v17442_v7, %v15015_v19  ;;  %v9843_v40 = vcombine.high %v9818_v25, %v9834_v29  ;;  %v10357_v47 = vrot.slane %v10343_v55, %v15015_v19  ;;  %v9846_v51 = vcombine.low %v9750_v62, %v9757_v39 }
0x1b14   :  { %v10292_v45 = vcombine.low %v10273_v23, %v10289_v5  ;;  %v13354_v63 = vcombine.high %v9750_v62, %v9757_v39  ;;  %v9862_v12 = vcombine.low %v9766_v10, %v9773_v56  ;;  %v13355_v4 = vcombine.high %v9766_v10, %v9773_v56  ;;  %14089 = vmatmul.mubr.msk.f32.vlgmr.msra.gmra.mrb[64].mxu1 %vm1323_vm2, %v9842_v28 }
0x1b15   :  { %14096 = vmatmul.mubr.msk.f32.vlgmr.msra.gmra.mrb[58].mxu0 %vm1323_vm2, %v9843_v40  ;;  %v10360_v46 = vcombine.low %v10341_v17, %v10357_v47  ;;  %v10293_v41 = vcombine.high %v10273_v23, %v10289_v5  ;;  %v10361_v26 = vcombine.high %v10341_v17, %v10357_v47  ;;  %v9827_v32 = vcombine.high %v16856_v30, %v16859_v54 }
0x1b16   :  { %14102 = vmatprep.mubr.msk.f32.mxu1 %vm14828_vm1, %v17428_v35  ;;  %14109 = vmatprep.mubr.msk.f32.mxu0 %vm14828_vm1, %v17428_v35  ;;  %v10402_v21 = vrot.slane %v10394_v53, %v15015_v19  ;;  %v10418_v44 = vrot.slane %v10410_v11, %v15015_v19  ;;  %v10470_v60 = vrot.slane %v10462_v16, %v15015_v19 }
0x1b17   :  { %v14398_v49 = vpack.c.bf16 %v10360_v46, %v10292_v45  ;;  %v14402_v48 = vpack.c.bf16 %v10361_v26, %v10293_v41  ;;  %v9853_v55 = vrot.slane %v9846_v51, %v15013_v13  ;;  %v9861_v25 = vrot.slane %v13354_v63, %v15013_v13 }
0x1b18   :  { %v10486_v30 = vrot.slane %v10478_v38, %v15015_v19  ;;  %v9869_v54 = vrot.slane %v9862_v12, %v15013_v13  ;;  %v9877_v62 = vrot.slane %v13355_v4, %v15013_v13  ;;  %v9825_v39 = vrot.slane %v9811_v1, %v15015_v19 }
0x1b19   :  { %14400 = vmatpush3.bf16.xpose.msk.msra.mxu1 %vm15708_vm5, %v14398_v49  ;;  %14404 = vmatpush3.bf16.xpose.msk.msra.mxu0 %vm15708_vm5, %v14402_v48  ;;  %v9841_v10 = vrot.slane %v9827_v32, %v15015_v19  ;;  %v10463_v59 = vcombine.high %v16908_v15, %v16911_v18  ;;  %v10479_v23 = vcombine.high %v16914_v0, %v16917_v27 }
0x1b1a   :  { %14405 = vmatprep.subr.bf16.mxu1 %v17424_v31  ;;  %14409 = vmatprep.subr.bf16.mxu0 %v17424_v31  ;;  %v10494_v56 = vcombine.low %v10470_v60, %v10486_v30  ;;  %v10495_v29 = vcombine.high %v10470_v60, %v10486_v30  ;;  %v10426_v34 = vcombine.low %v10402_v21, %v10418_v44 }
0x1b1b   :  { %v10427_v5 = vcombine.high %v10402_v21, %v10418_v44  ;;  %v10395_v7 = vcombine.high %v16896_v36, %v16899_v9  ;;  %v10411_v1 = vcombine.high %v16902_v3, %v16905_v6  ;;  %v9878_v11 = vcombine.low %v9853_v55, %v9861_v25 }
0x1b1c   :  { %v14406_v17 = vpack.c.bf16 %v10494_v56, %v10426_v34  ;;  %v9894_v16 = vcombine.low %v9869_v54, %v9877_v62  ;;  %v9844_v38 = vcombine.low %v9825_v39, %v9841_v10  ;;  %v9845_v28 = vcombine.high %v9825_v39, %v9841_v10 }
0x1b1d   :  { %v14410_v53 = vpack.c.bf16 %v10495_v29, %v10427_v5  ;;  %v10477_v40 = vrot.slane %v10463_v59, %v15015_v19  ;;  %v10493_v15 = vrot.slane %v10479_v23, %v15015_v19  ;;  %v10409_v36 = vrot.slane %v10395_v7, %v15015_v19 }
0x1b1e   :  { %v10425_v9 = vrot.slane %v10411_v1, %v15015_v19  ;;  %v9886_v3 = vrot.slane %v9878_v11, %v15015_v19  ;;  %v9902_v6 = vrot.slane %v9894_v16, %v15015_v19  ;;  %v9879_v47 = vcombine.high %v9853_v55, %v9861_v25 }
0x1b1f   :  { %v10496_v18 = vcombine.low %v10477_v40, %v10493_v15  ;;  %v10497_v0 = vcombine.high %v10477_v40, %v10493_v15  ;;  %v9895_v51 = vcombine.high %v9869_v54, %v9877_v62 }
0x1b20   :  { %14103 = vmatmul.mubr.msk.f32.vlgmr.msra.gmra.mrb[66].mxu1 %vm1323_vm2, %v9844_v38  ;;  %14110 = vmatmul.mubr.msk.f32.vlgmr.msra.gmra.mrb[60].mxu0 %vm1323_vm2, %v9845_v28  ;;  %v10428_v27 = vcombine.low %v10409_v36, %v10425_v9  ;;  %v10429_v45 = vcombine.high %v10409_v36, %v10425_v9  ;;  %v9910_v63 = vcombine.low %v9886_v3, %v9902_v6 }
0x1b21   :  { %14408 = vmatpush3.bf16.xpose.msk.msra.mxu1 %vm15708_vm5, %v14406_v17  ;;  %14412 = vmatpush3.bf16.xpose.msk.msra.mxu0 %vm15708_vm5, %v14410_v53  ;;  %v9911_v12 = vcombine.high %v9886_v3, %v9902_v6  ;;  %v9893_v41 = vrot.slane %v9879_v47, %v15015_v19  ;;  %v9909_v26 = vrot.slane %v9895_v51, %v15015_v19 }
0x1b22   :  { %14116 = vmatprep.mubr.msk.f32.mxu1 %vm14828_vm1, %v17428_v35  ;;  %14123 = vmatprep.mubr.msk.f32.mxu0 %vm14828_vm1, %v17428_v35  ;;  %v14414_v4 = vpack.c.bf16 %v10496_v18, %v10428_v27  ;;  %v14418_v46 = vpack.c.bf16 %v10497_v0, %v10429_v45 }
0x1b23   :  { %14413 = vmatprep.subr.bf16.mxu1 %v17424_v31  ;;  %14417 = vmatprep.subr.bf16.mxu0 %v17424_v31  ;;  %v9912_v32 = vcombine.low %v9893_v41, %v9909_v26  ;;  %v9913_v21 = vcombine.high %v9893_v41, %v9909_v26 }
0x1b28   :  { %14117 = vmatmul.mubr.msk.f32.vlgmr.msra.gmra.mrb[68].mxu1 %vm1323_vm2, %v9910_v63  ;;  %14124 = vmatmul.mubr.msk.f32.vlgmr.msra.gmra.mrb[62].mxu0 %vm1323_vm2, %v9911_v12 }
0x1b29   :  { %14416 = vmatpush3.bf16.xpose.msk.msra.mxu1 %vm15708_vm5, %v14414_v4  ;;  %14420 = vmatpush3.bf16.xpose.msk.msra.mxu0 %vm15708_vm5, %v14418_v46 }
0x1b2a   :  { %14130 = vmatprep.mubr.msk.f32.mxu1 %vm14828_vm1, %v17428_v35  ;;  %14137 = vmatprep.mubr.msk.f32.mxu0 %vm14828_vm1, %v17428_v35 }
0x1b2b   :  { %14421 = vmatprep.subr.bf16.mxu1 %v17424_v31  ;;  %14427 = vmatprep.subr.bf16.mxu0 %v17424_v31 }
0x1b30   :  { %14131 = vmatmul.mubr.msk.f32.vlgmr.msra.gmra.mrb[70].mxu1 %vm1323_vm2, %v9912_v32  ;;  %14138 = vmatmul.mubr.msk.f32.vlgmr.msra.gmra.mrb[64].mxu0 %vm1323_vm2, %v9913_v21 }
0x1b31   :  { %14144 = vmatprep.mubr.msk.f32.mxu1 %vm14828_vm1, %v17428_v35  ;;  %14158 = vmatprep.mubr.msk.f32.mxu0 %vm14828_vm1, %v17428_v35 }
0x1be7   :  { %v11165_v43 = vpop.f32.mrb[64].mxu1 }
0x1be8   :  { %v11244_v49 = vpop.f32.mrb[58].mxu0  ;;  %v14090_v48 = vpop.f32.mrb[65].mxu1  ;;  %v11722_v55 = vsel %vm2902_vm3, %v11165_v43, -inf }
0x1be9   :  { %v14097_v44 = vpop.f32.mrb[59].mxu0  ;;  %v11725_v60 = vsel %vm2902_vm3, %v11244_v49, -inf  ;;  %11723 = vmax.xlane.f32.xlu0 %v11722_v55 }
0x1bea   :  { %11726 = vmax.xlane.f32.xlu1 %v11725_v60 }
0x1bf3   :  { %v11323_v25 = vpop.f32.mrb[66].mxu1  ;;  %v11402_v30 = vpop.f32.mrb[60].mxu0 }
0x1bf4   :  { %v14104_v54 = vpop.f32.mrb[67].mxu1  ;;  %v14111_v62 = vpop.f32.mrb[61].mxu0  ;;  %v11728_v39 = vsel %vm2902_vm3, %v11323_v25, -inf  ;;  %v11731_v10 = vsel %vm2902_vm3, %v11402_v30, -inf }
0x1bf5   :  { %11729 = vmax.xlane.f32.xlu0 %v11728_v39 }
0x1bf9   :  { %11732 = vmax.xlane.f32.xlu0 %v11731_v10 }
0x1bfb   :  { %v17024_v56 = vpop.f32.mrb[68].mxu1  ;;  %v11560_v29 = vpop.f32.mrb[62].mxu0 }
0x1bfc   :  { %v14118_v59 = vpop.f32.mrb[69].mxu1  ;;  %v14125_v23 = vpop.f32.mrb[63].mxu0  ;;  %v11737_v34 = vsel %vm2902_vm3, %v11560_v29, -inf  ;;  %v11734_v5 = vsel %vm2902_vm3, %v17024_v56, -inf }
0x1bfd   :  { %11738 = vmax.xlane.f32.xlu0 %v11737_v34  ;;  %11735 = vmax.xlane.f32.xlu1 %v11734_v5 }
0x1c03   :  { %v11639_v7 = vpop.f32.mrb[70].mxu1  ;;  %v17029_v1 = vpop.f32.mrb[64].mxu0 }
0x1c04   :  { %v14132_v17 = vpop.f32.mrb[71].mxu1  ;;  %v14139_v53 = vpop.f32.mrb[65].mxu0  ;;  %v11743_v11 = vsel %vm2902_vm3, %v17029_v1, -inf  ;;  %v11740_v16 = vsel %vm2902_vm3, %v11639_v7, -inf }
0x1c05   :  { %11744 = vmax.xlane.f32.xlu0 %v11743_v11  ;;  %11741 = vmax.xlane.f32.xlu1 %v11740_v16 }
0x1c16   :  { %10500 = vrot.lane.b32.xlu1 %v16661_v22, %s14825_s23  ;;  %v17443_v22 = vld [vmem:[#allocation16_spill] sm:$0xff] }
0x1c1a   :  { %10506 = vrot.lane.b32.xlu1 %v16713_v20, %s14825_s23 }
0x1c1b   :  { %10498 = vrot.lane.b32.xlu0 %v16663_v24, %s14825_s23 }
0x1c1e   :  { %10514 = vrot.lane.b32.xlu1 %v16717_v8, %s14825_s23 }
0x1c1f   :  { %10508 = vrot.lane.b32.xlu0 %v16711_v50, %s14825_s23 }
0x1c22   :  { %10522 = vrot.lane.b32.xlu1 %v16733_v52, %s14825_s23 }
0x1c23   :  { %10516 = vrot.lane.b32.xlu0 %v16715_v42, %s14825_s23 }
0x1c26   :  { %10502 = vrot.lane.b32.xlu1 %v16677_v58, %s14825_s23 }
0x1c27   :  { %10524 = vrot.lane.b32.xlu0 %v16727_v37, %s14825_s23 }
0x1c2a   :  { %10510 = vrot.lane.b32.xlu1 %v16747_v57, %s14825_s23 }
0x1c2b   :  { %10504 = vrot.lane.b32.xlu0 %v16680_v61, %s14825_s23 }
0x1c2e   :  { %10512 = vrot.lane.b32.xlu1 %v16749_v2, %s14825_s23 }
0x1c2f   :  { %10518 = vrot.lane.b32.xlu0 %v16771_v33, %s14825_s23 }
0x1c32   :  { %10520 = vrot.lane.b32.xlu1 %v16802_v14, %s14825_s23 }
0x1c33   :  { %10526 = vrot.lane.b32.xlu0 %v17443_v22, %s14825_s23 }
0x1c76   :  { %v11724_v58 = vpop.xlane.xlu0 %11723 }
0x1c77   :  { %v11727_v24 = vpop.xlane.xlu1 %11726  ;;  %v11746_v20 = vsub.f32 %v11165_v43, %v11724_v58 }
0x1c78   :  { %v11747_v50 = vsub.f32 %v11244_v49, %v11727_v24  ;;  %v17444_v49 = vld [vmem:[#allocation18_spill] sm:$0xff] }
0x1c79   :  { %v11754_v42 = vmul.f32 1.442695, %v11746_v20 }
0x1c7a   :  { %v11756_v8 = vmul.f32 1.442695, %v11747_v50 }
0x1c7b   :  { %14642 = vpow2.f32 %v11754_v42 }
0x1c7c   :  { %14644 = vpow2.f32 %v11756_v8 }
0x1c82   :  { %v11730_v61 = vpop.xlane.xlu0 %11729 }
0x1c83   :  { %v11748_v37 = vsub.f32 %v11323_v25, %v11730_v61 }
0x1c85   :  { %v11758_v52 = vmul.f32 1.442695, %v11748_v37  ;;  %v17064_v2 = vpop.eup %14642 }
0x1c86   :  { %v11733_v57 = vpop.xlane.xlu0 %11732  ;;  %v11770_v14 = vsel %vm2902_vm3, %v17064_v2, 0.0  ;;  %v17068_v38 = vpop.eup %14644 }
0x1c87   :  { %14646 = vpow2.f32 %v11758_v52  ;;  %v11749_v33 = vsub.f32 %v11402_v30, %v11733_v57  ;;  %11771 = vadd.xlane.f32.xlu1 %v11770_v14  ;;  %v11773_v36 = vsel %vm2902_vm3, %v17068_v38, 0.0 }
0x1c89   :  { %v11760_v28 = vmul.f32 1.442695, %v11749_v33 }
0x1c8a   :  { %v11739_v40 = vpop.xlane.xlu0 %11738  ;;  %v17072_v3 = vpop.xlane.xlu1 %11735 }
0x1c8b   :  { %14648 = vpow2.f32 %v11760_v28  ;;  %v11751_v15 = vsub.f32 %v11560_v29, %v11739_v40  ;;  %11774 = vadd.xlane.f32.xlu1 %v11773_v36  ;;  %v11750_v11 = vsub.f32 %v17024_v56, %v17072_v3 }
0x1c8d   :  { %v11764_v9 = vmul.f32 1.442695, %v11751_v15 }
0x1c8f   :  { %14650 = vpow2.f32 %v11764_v9 }
0x1c91   :  { %v17074_v6 = vpop.eup %14646 }
0x1c92   :  { %v11776_v18 = vsel %vm2902_vm3, %v17074_v6, 0.0  ;;  %v11742_v0 = vpop.xlane.xlu1 %11741  ;;  %v17078_v27 = vpop.xlane.xlu0 %11744 }
0x1c93   :  { %11777 = vadd.xlane.f32.xlu0 %v11776_v18  ;;  %v11752_v45 = vsub.f32 %v11639_v7, %v11742_v0 }
0x1c95   :  { %v17080_v47 = vpop.eup %14648  ;;  %v11766_v51 = vmul.f32 1.442695, %v11752_v45 }
0x1c96   :  { %v11779_v63 = vsel %vm2902_vm3, %v17080_v47, 0.0  ;;  %v10501_v12 = vpop.permute.xlu1 %10500  ;;  %v10499_v4 = vpop.permute.xlu0 %10498 }
0x1c97   :  { %14652 = vpow2.f32 %v11766_v51  ;;  %11780 = vadd.xlane.f32.xlu0 %v11779_v63 }
0x1c99   :  { %v17084_v46 = vpop.eup %14650 }
0x1c9a   :  { %v10507_v41 = vpop.permute.xlu1 %10506  ;;  %v10509_v26 = vpop.permute.xlu0 %10508  ;;  %v11785_v32 = vsel %vm2902_vm3, %v17084_v46, 0.0 }
0x1c9b   :  { %11786 = vadd.xlane.f32.xlu0 %v11785_v32 }
0x1c9c   :  { %10528 = vrot.lane.b32.xlu1 %v17444_v49, %s14825_s23 }
0x1c9e   :  { %v10515_v21 = vpop.permute.xlu1 %10514  ;;  %v10517_v43 = vpop.permute.xlu0 %10516 }
0x1c9f   :  { %v10546_v48 = vcombine.low %v10499_v4, %v10515_v21  ;;  %v10547_v44 = vcombine.high %v10499_v4, %v10515_v21  ;;  %v10614_v55 = vcombine.low %v10501_v12, %v10517_v43  ;;  %v10615_v25 = vcombine.high %v10501_v12, %v10517_v43 }
0x1ca1   :  { %v17090_v60 = vpop.eup %14652  ;;  %v10554_v23 = vrot.slane %v10546_v48, %v15013_v13  ;;  %v10561_v34 = vrot.slane %v10547_v44, %v15013_v13  ;;  %v10622_v16 = vrot.slane %v10614_v55, %v15013_v13  ;;  %v10629_v22 = vrot.slane %v10615_v25, %v15013_v13 }
0x1ca2   :  { %v10523_v30 = vpop.permute.xlu1 %10522  ;;  %v10525_v54 = vpop.permute.xlu0 %10524  ;;  %v11788_v62 = vsel %vm2902_vm3, %v17090_v60, 0.0  ;;  %v11762_v48 = vmul.f32 1.442695, %v11750_v11  ;;  %v11753_v44 = vsub.f32 %v17029_v1, %v17078_v27 }
0x1ca3   :  { %v10562_v39 = vcombine.low %v10507_v41, %v10523_v30  ;;  %v10563_v10 = vcombine.high %v10507_v41, %v10523_v30  ;;  %v10630_v29 = vcombine.low %v10509_v26, %v10525_v54  ;;  %v10631_v59 = vcombine.high %v10509_v26, %v10525_v54  ;;  %11789 = vadd.xlane.f32.xlu0 %v11788_v62 }
0x1ca4   :  { %14654 = vpow2.f32 %v11762_v48 }
0x1ca5   :  { %v10570_v5 = vrot.slane %v10562_v39, %v15013_v13  ;;  %v10577_v7 = vrot.slane %v10563_v10, %v15013_v13  ;;  %v10638_v17 = vrot.slane %v10630_v29, %v15013_v13  ;;  %v10645_v53 = vrot.slane %v10631_v59, %v15013_v13 }
0x1ca6   :  { %v11768_v59 = vmul.f32 1.442695, %v11753_v44 }
0x1ca7   :  { %v10578_v24 = vcombine.low %v10554_v23, %v10570_v5  ;;  %v10579_v58 = vcombine.high %v10554_v23, %v10570_v5  ;;  %v10594_v50 = vcombine.low %v10561_v34, %v10577_v7  ;;  %v10595_v20 = vcombine.high %v10561_v34, %v10577_v7 }
0x1ca8   :  { %v10646_v42 = vcombine.low %v10622_v16, %v10638_v17  ;;  %v10647_v8 = vcombine.high %v10622_v16, %v10638_v17  ;;  %v10662_v61 = vcombine.low %v10629_v22, %v10645_v53  ;;  %v10663_v37 = vcombine.high %v10629_v22, %v10645_v53 }
0x1ca9   :  { %v10586_v52 = vrot.slane %v10578_v24, %v15015_v19  ;;  %v10593_v57 = vrot.slane %v10579_v58, %v15015_v19  ;;  %v10602_v33 = vrot.slane %v10594_v50, %v15015_v19  ;;  %v10609_v56 = vrot.slane %v10595_v20, %v15015_v19 }
0x1caa   :  { %v10654_v14 = vrot.slane %v10646_v42, %v15015_v19  ;;  %v10661_v28 = vrot.slane %v10647_v8, %v15015_v19  ;;  %v10670_v40 = vrot.slane %v10662_v61, %v15015_v19  ;;  %v10677_v15 = vrot.slane %v10663_v37, %v15015_v19 }
0x1cab   :  { %v10818_v36 = vcombine.low %v10586_v52, %v10593_v57  ;;  %v13364_v9 = vcombine.high %v10586_v52, %v10593_v57  ;;  %v10834_v3 = vcombine.low %v10602_v33, %v10609_v56  ;;  %v13365_v18 = vcombine.high %v10602_v33, %v10609_v56 }
0x1cac   :  { %v10886_v0 = vcombine.low %v10654_v14, %v10661_v28  ;;  %v13366_v45 = vcombine.high %v10654_v14, %v10661_v28  ;;  %v10902_v51 = vcombine.low %v10670_v40, %v10677_v15  ;;  %v13367_v63 = vcombine.high %v10670_v40, %v10677_v15  ;;  %v10505_v28 = vpop.permute.xlu0 %10504  ;;  %v10503_v40 = vpop.permute.xlu1 %10502 }
0x1cad   :  { %v10825_v12 = vrot.slane %v10818_v36, %v15013_v13  ;;  %v10833_v4 = vrot.slane %v13364_v9, %v15013_v13  ;;  %v10841_v41 = vrot.slane %v10834_v3, %v15013_v13  ;;  %v10849_v26 = vrot.slane %v13365_v18, %v15013_v13 }
0x1cae   :  { %v10893_v32 = vrot.slane %v10886_v0, %v15013_v13  ;;  %v10901_v21 = vrot.slane %v13366_v45, %v15013_v13  ;;  %v10909_v43 = vrot.slane %v10902_v51, %v15013_v13  ;;  %v10917_v49 = vrot.slane %v13367_v63, %v15013_v13  ;;  %v17133_v37 = vpop.eup %14654 }
0x1caf   :  { %v10850_v55 = vcombine.low %v10825_v12, %v10833_v4  ;;  %v10866_v25 = vcombine.low %v10841_v41, %v10849_v26  ;;  %v10851_v7 = vcombine.high %v10825_v12, %v10833_v4  ;;  %14656 = vpow2.f32 %v11768_v59 }
0x1cb0   :  { %v10918_v30 = vcombine.low %v10893_v32, %v10901_v21  ;;  %v10934_v54 = vcombine.low %v10909_v43, %v10917_v49  ;;  %v10867_v27 = vcombine.high %v10841_v41, %v10849_v26  ;;  %v10919_v17 = vcombine.high %v10893_v32, %v10901_v21  ;;  %v10519_v15 = vpop.permute.xlu0 %10518  ;;  %v10511_v36 = vpop.permute.xlu1 %10510 }
0x1cb1   :  { %v10858_v62 = vrot.slane %v10850_v55, %v15015_v19  ;;  %v10874_v39 = vrot.slane %v10866_v25, %v15015_v19  ;;  %v10865_v1 = vrot.slane %v10851_v7, %v15015_v19  ;;  %v10935_v53 = vcombine.high %v10909_v43, %v10917_v49 }
0x1cb2   :  { %v10926_v10 = vrot.slane %v10918_v30, %v15015_v19  ;;  %v10942_v29 = vrot.slane %v10934_v54, %v15015_v19  ;;  %v10881_v11 = vrot.slane %v10867_v27, %v15015_v19  ;;  %v10933_v16 = vrot.slane %v10919_v17, %v15015_v19 }
0x1cb3   :  { %v10882_v23 = vcombine.low %v10858_v62, %v10874_v39  ;;  %v10949_v22 = vrot.slane %v10935_v53, %v15015_v19  ;;  %v10883_v24 = vcombine.high %v10858_v62, %v10874_v39  ;;  %v11782_v56 = vsel %vm2902_vm3, %v17133_v37, 0.0 }
0x1cb4   :  { %v10950_v34 = vcombine.low %v10926_v10, %v10942_v29  ;;  %v10951_v58 = vcombine.high %v10926_v10, %v10942_v29  ;;  %v10884_v50 = vcombine.low %v10865_v1, %v10881_v11  ;;  %v10885_v42 = vcombine.high %v10865_v1, %v10881_v11  ;;  %v10527_v9 = vpop.permute.xlu0 %10526  ;;  %v10513_v3 = vpop.permute.xlu1 %10512 }
0x1cb5   :  { %v10952_v20 = vcombine.low %v10933_v16, %v10949_v22  ;;  %v10953_v8 = vcombine.high %v10933_v16, %v10949_v22  ;;  %v10698_v18 = vcombine.low %v10511_v36, %v10527_v9  ;;  %v10699_v0 = vcombine.high %v10511_v36, %v10527_v9 }
0x1cb6   :  { %v14422_v5 = vpack.c.bf16 %v10950_v34, %v10882_v23  ;;  %v17131_v61 = vpack.c.bf16 %v10951_v58, %v10883_v24  ;;  %v10682_v45 = vcombine.low %v10503_v40, %v10519_v15  ;;  %v10683_v51 = vcombine.high %v10503_v40, %v10519_v15 }
0x1cb7   :  { %v14428_v52 = vpack.c.bf16 %v10952_v20, %v10884_v50  ;;  %v17135_v57 = vpack.c.bf16 %v10953_v8, %v10885_v42  ;;  %v10706_v63 = vrot.slane %v10698_v18, %v15013_v13  ;;  %v10713_v12 = vrot.slane %v10699_v0, %v15013_v13 }
0x1cb8   :  { %14423 = vmatpush3.bf16.msra.mxu1 %v14422_v5  ;;  %v10521_v4 = vpop.permute.xlu1 %10520  ;;  %v10690_v41 = vrot.slane %v10682_v45, %v15013_v13  ;;  %v10697_v26 = vrot.slane %v10683_v51, %v15013_v13 }
0x1cb9   :  { %14424 = vmatprep.subr.bf16.mxu1 %v17424_v31  ;;  %14429 = vmatpush3.bf16.msra.mxu0 %v14428_v52  ;;  %v17137_v33 = vpop.eup %14656  ;;  %v10750_v62 = vcombine.low %v10505_v28, %v10521_v4  ;;  %v10751_v39 = vcombine.high %v10505_v28, %v10521_v4 }
0x1cba   :  { %14433 = vmatprep.subr.bf16.mxu0 %v17424_v31  ;;  %v11791_v14 = vsel %vm2902_vm3, %v17137_v33, 0.0  ;;  %v10714_v32 = vcombine.low %v10690_v41, %v10706_v63  ;;  %v10715_v21 = vcombine.high %v10690_v41, %v10706_v63  ;;  %v10730_v43 = vcombine.low %v10697_v26, %v10713_v12 }
0x1cbb   :  { %v10731_v49 = vcombine.high %v10697_v26, %v10713_v12  ;;  %v10758_v1 = vrot.slane %v10750_v62, %v15013_v13  ;;  %v10765_v27 = vrot.slane %v10751_v39, %v15013_v13 }
0x1cbc   :  { %v10722_v44 = vrot.slane %v10714_v32, %v15015_v19  ;;  %v10729_v55 = vrot.slane %v10715_v21, %v15015_v19  ;;  %v10738_v25 = vrot.slane %v10730_v43, %v15015_v19 }
0x1cbd   :  { %v10745_v30 = vrot.slane %v10731_v49, %v15015_v19 }
0x1cbe   :  { %v10954_v10 = vcombine.low %v10722_v44, %v10729_v55  ;;  %v13368_v29 = vcombine.high %v10722_v44, %v10729_v55 }
0x1cbf   :  { %v10970_v59 = vcombine.low %v10738_v25, %v10745_v30  ;;  %v13369_v23 = vcombine.high %v10738_v25, %v10745_v30 }
0x1cc0   :  { %11783 = vadd.xlane.f32.xlu1 %v11782_v56  ;;  %v10961_v11 = vrot.slane %v10954_v10, %v15013_v13  ;;  %v10969_v24 = vrot.slane %v13368_v29, %v15013_v13 }
0x1cc1   :  { %v10977_v58 = vrot.slane %v10970_v59, %v15013_v13  ;;  %v10985_v50 = vrot.slane %v13369_v23, %v15013_v13 }
0x1cc2   :  { %v10987_v25 = vcombine.high %v10961_v11, %v10969_v24 }
0x1cc3   :  { %v11002_v18 = vcombine.low %v10977_v58, %v10985_v50  ;;  %v11003_v30 = vcombine.high %v10977_v58, %v10985_v50 }
0x1cc4   :  { %11792 = vadd.xlane.f32.xlu1 %v11791_v14 }
0x1cc5   :  { %v11010_v32 = vrot.slane %v11002_v18, %v15015_v19 }
0x1d14   :  { %v11772_v48 = vpop.xlane.xlu1 %11771 }
0x1d15   :  { %14658 = vrcp.f32 %v11772_v48 }
0x1d18   :  { %v11775_v54 = vpop.xlane.xlu1 %11774 }
0x1d19   :  { %14660 = vrcp.f32 %v11775_v54 }
0x1d1c   :  { %v10529_v34 = vpop.permute.xlu1 %10528 }
0x1d1d   :  { %v10766_v5 = vcombine.low %v10513_v3, %v10529_v34  ;;  %v10767_v7 = vcombine.high %v10513_v3, %v10529_v34  ;;  %v10986_v3 = vcombine.low %v10961_v11, %v10969_v24  ;;  %v11001_v34 = vrot.slane %v10987_v25, %v15015_v19 }
0x1d1f   :  { %v14659_v53 = vpop.eup %14658  ;;  %v10774_v16 = vrot.slane %v10766_v5, %v15013_v13  ;;  %v10781_v22 = vrot.slane %v10767_v7, %v15013_v13  ;;  %v10994_v26 = vrot.slane %v10986_v3, %v15015_v19  ;;  %v11017_v5 = vrot.slane %v11003_v30, %v15015_v19 }
0x1d20   :  { %v11778_v17 = vpop.xlane.xlu0 %11777  ;;  %v11802_v20 = vmul.f32 %v14659_v53, %v17064_v2 }
0x1d21   :  { %14662 = vrcp.f32 %v11778_v17  ;;  %v10782_v42 = vcombine.low %v10758_v1, %v10774_v16  ;;  %v10783_v8 = vcombine.high %v10758_v1, %v10774_v16  ;;  %v10798_v52 = vcombine.low %v10765_v27, %v10781_v22 }
0x1d22   :  { %v10799_v56 = vcombine.high %v10765_v27, %v10781_v22  ;;  %14145 = vmatmul.mubr.msk.f32.vlgmr.msra.gmra.mrb[72].mxu1 %vm2902_vm3, %v11802_v20  ;;  %v11018_v10 = vcombine.low %v10994_v26, %v11010_v32  ;;  %v11019_v59 = vcombine.high %v10994_v26, %v11010_v32  ;;  %v11021_v11 = vcombine.high %v11001_v34, %v11017_v5 }
0x1d23   :  { %v14661_v28 = vpop.eup %14660  ;;  %v10790_v40 = vrot.slane %v10782_v42, %v15015_v19  ;;  %v10797_v15 = vrot.slane %v10783_v8, %v15015_v19  ;;  %v10806_v36 = vrot.slane %v10798_v52, %v15015_v19  ;;  %14426 = vmatpush3.bf16.msra.mxu1 %v17131_v61  ;;  %14151 = vmatprep.mubr.msk.f32.mxu1 %vm14828_vm1, %v17428_v35 }
0x1d24   :  { %v11781_v14 = vpop.xlane.xlu0 %11780  ;;  %v10813_v9 = vrot.slane %v10799_v56, %v15015_v19  ;;  %v11803_v2 = vmul.f32 %v14661_v28, %v17068_v38  ;;  %14430 = vmatprep.subr.bf16.mxu1 %v17424_v31 }
0x1d25   :  { %14664 = vrcp.f32 %v11781_v14  ;;  %v11022_v0 = vcombine.low %v10790_v40, %v10797_v15  ;;  %v13370_v45 = vcombine.high %v10790_v40, %v10797_v15 }
0x1d26   :  { %v11038_v51 = vcombine.low %v10806_v36, %v10813_v9  ;;  %v13371_v63 = vcombine.high %v10806_v36, %v10813_v9  ;;  %14152 = vmatmul.mubr.msk.f32.vlgmr.msra.gmra.mrb[74].mxu1 %vm2902_vm3, %v11803_v2 }
0x1d27   :  { %v11029_v12 = vrot.slane %v11022_v0, %v15013_v13  ;;  %v11037_v61 = vrot.slane %v13370_v45, %v15013_v13  ;;  %14432 = vmatpush3.bf16.msra.mxu1 %v17135_v57  ;;  %14165 = vmatprep.mubr.msk.f32.mxu1 %vm14828_vm1, %v17428_v35 }
0x1d28   :  { %v11045_v38 = vrot.slane %v11038_v51, %v15013_v13  ;;  %v11053_v4 = vrot.slane %v13371_v63, %v15013_v13  ;;  %v11787_v41 = vpop.xlane.xlu0 %11786  ;;  %14436 = vmatprep.subr.bf16.mxu1 %v17424_v31 }
0x1d29   :  { %14666 = vrcp.f32 %v11787_v41  ;;  %v11054_v43 = vcombine.low %v11029_v12, %v11037_v61  ;;  %v11055_v48 = vcombine.high %v11029_v12, %v11037_v61 }
0x1d2a   :  { %v11070_v49 = vcombine.low %v11045_v38, %v11053_v4  ;;  %v11071_v44 = vcombine.high %v11045_v38, %v11053_v4 }
0x1d2b   :  { %v14663_v21 = vpop.eup %14662  ;;  %v11062_v57 = vrot.slane %v11054_v43, %v15015_v19  ;;  %v11069_v62 = vrot.slane %v11055_v48, %v15015_v19 }
0x1d2c   :  { %v11804_v55 = vmul.f32 %v14663_v21, %v17074_v6  ;;  %v11078_v54 = vrot.slane %v11070_v49, %v15015_v19  ;;  %v11085_v39 = vrot.slane %v11071_v44, %v15015_v19 }
0x1d2e   :  { %14159 = vmatmul.mubr.msk.f32.vlgmr.msra.gmra.mrb[66].mxu0 %vm2902_vm3, %v11804_v55  ;;  %v11086_v29 = vcombine.low %v11062_v57, %v11078_v54  ;;  %v11087_v23 = vcombine.high %v11062_v57, %v11078_v54  ;;  %v11089_v17 = vcombine.high %v11069_v62, %v11085_v39  ;;  %v11088_v50 = vcombine.low %v11069_v62, %v11085_v39 }
0x1d2f   :  { %14172 = vmatprep.mubr.msk.f32.mxu0 %vm14828_vm1, %v17428_v35  ;;  %v14665_v6 = vpop.eup %14664 }
0x1d30   :  { %v11805_v7 = vmul.f32 %v14665_v6, %v17080_v47  ;;  %v14434_v1 = vpack.c.bf16 %v11086_v29, %v11018_v10  ;;  %v14437_v27 = vpack.c.bf16 %v11087_v23, %v11019_v59  ;;  %v14443_v22 = vpack.c.bf16 %v11089_v17, %v11021_v11  ;;  %v11790_v47 = vpop.xlane.xlu0 %11789 }
0x1d32   :  { %14166 = vmatmul.mubr.msk.f32.vlgmr.msra.gmra.mrb[76].mxu1 %vm2902_vm3, %v11805_v7  ;;  %14435 = vmatpush3.bf16.msra.mxu0 %v14434_v1 }
0x1d33   :  { %v14667_v53 = vpop.eup %14666  ;;  %14438 = vmatpush3.bf16.msra.mxu1 %v14437_v27  ;;  %14179 = vmatprep.mubr.msk.f32.mxu1 %vm14828_vm1, %v17428_v35 }
0x1d34   :  { %v11807_v16 = vmul.f32 %v14667_v53, %v17084_v46  ;;  %14442 = vmatprep.subr.bf16.mxu1 %v17424_v31  ;;  %14439 = vmatprep.subr.bf16.mxu0 %v17424_v31  ;;  %v11020_v46 = vcombine.low %v11001_v34, %v11017_v5 }
0x1d36   :  { %14180 = vmatmul.mubr.msk.f32.vlgmr.msra.gmra.mrb[78].mxu1 %vm2902_vm3, %v11807_v16  ;;  %v14440_v31 = vpack.c.bf16 %v11088_v50, %v11020_v46 }
0x1d37   :  { %14444 = vmatpush3.bf16.msra.mxu1 %v14443_v22  ;;  %14193 = vmatprep.mubr.msk.f32.mxu1 %vm14828_vm1, %v17428_v35 }
0x1d4d   :  { %v11784_v24 = vpop.xlane.xlu1 %11783 }
0x1d4e   :  { %14668 = vrcp.f32 %v11784_v24 }
0x1d4f   :  { %14670 = vrcp.f32 %v11790_v47 }
0x1d51   :  { %v11793_v58 = vpop.xlane.xlu1 %11792 }
0x1d52   :  { %14672 = vrcp.f32 %v11793_v58 }
0x1d58   :  { %v14669_v20 = vpop.eup %14668 }
0x1d59   :  { %v11806_v42 = vmul.f32 %v14669_v20, %v17133_v37  ;;  %v14671_v8 = vpop.eup %14670 }
0x1d5a   :  { %v11808_v56 = vmul.f32 %v14671_v8, %v17090_v60 }
0x1d5b   :  { %14173 = vmatmul.mubr.msk.f32.vlgmr.msra.gmra.mrb[68].mxu0 %vm2902_vm3, %v11806_v42 }
0x1d5c   :  { %v14673_v52 = vpop.eup %14672  ;;  %14441 = vmatpush3.bf16.msra.mxu0 %v14440_v31  ;;  %14186 = vmatprep.mubr.msk.f32.mxu0 %vm14828_vm1, %v17428_v35 }
0x1d5d   :  { %v11809_v14 = vmul.f32 %v14673_v52, %v17137_v33 }
0x1d5f   :  { %14187 = vmatmul.mubr.msk.f32.vlgmr.msra.gmra.mrb[70].mxu0 %vm2902_vm3, %v11808_v56  ;;  %14194 = vmatmul.mubr.msk.f32.vlgmr.msra.gmra.mrb[80].mxu1 %vm2902_vm3, %v11809_v14 }
0x1df5   :  { %v11879_v28 = vpop.f32.mrb[72].mxu1 }
0x1df6   :  { %v14146_v40 = vpop.f32.mrb[73].mxu1 }
0x1df9   :  { %v11952_v37 = vpop.f32.mrb[74].mxu1 }
0x1dfa   :  { %v14153_v15 = vpop.f32.mrb[75].mxu1 }
0x1dfb   :  { %v6693_v15 = vld [vmem:[#allocation7 + $0x20] sm:$0xff] }
0x1e01   :  { %v12025_v36 = vpop.f32.mrb[66].mxu0 }
0x1e02   :  { %v12394_v9 = vcombine.low %v11879_v28, %v12025_v36  ;;  %v12395_v2 = vcombine.high %v11879_v28, %v12025_v36  ;;  %v14160_v3 = vpop.f32.mrb[67].mxu0  ;;  %v6694_v36 = vld [vmem:[#allocation7 + $0x28] sm:$0xff] }
0x1e04   :  { %v12402_v60 = vrot.slane %v12394_v9, %v15013_v13  ;;  %v12409_v33 = vrot.slane %v12395_v2, %v15013_v13 }
0x1e05   :  { %v12098_v18 = vpop.f32.mrb[76].mxu1 }
0x1e06   :  { %v12410_v0 = vcombine.low %v11952_v37, %v12098_v18  ;;  %v12411_v45 = vcombine.high %v11952_v37, %v12098_v18  ;;  %v14167_v51 = vpop.f32.mrb[77].mxu1 }
0x1e08   :  { %v12418_v63 = vrot.slane %v12410_v0, %v15013_v13  ;;  %v12425_v12 = vrot.slane %v12411_v45, %v15013_v13  ;;  %v14445_v0 = vpack.c.bf16 %v6694_v36, %v6693_v15 }
0x1e09   :  { %v12244_v61 = vpop.f32.mrb[78].mxu1 }
0x1e0a   :  { %v12426_v38 = vcombine.low %v12402_v60, %v12418_v63  ;;  %v12427_v4 = vcombine.high %v12402_v60, %v12418_v63  ;;  %v12442_v41 = vcombine.low %v12409_v33, %v12425_v12  ;;  %v12443_v26 = vcombine.high %v12409_v33, %v12425_v12  ;;  %v14181_v32 = vpop.f32.mrb[79].mxu1  ;;  %14446 = vmatprep.subr.bf16.mxu0 %v14445_v0  ;;  %v6695_v63 = vld [vmem:[#allocation7 + $0x30] sm:$0xff]  ;;  %v6696_v12 = vld [vmem:[#allocation7 + $0x38] sm:$0xff] }
0x1e0b   :  { %14448 = vmatpush3.bf16.msra.mxu0 %v14445_v0  ;;  %v6703_v0 = vld [vmem:[#allocation8 + $0x38] sm:$0xff] }
0x1e0c   :  { %v12434_v21 = vrot.slane %v12426_v38, %v15015_v19  ;;  %v12441_v43 = vrot.slane %v12427_v4, %v15015_v19  ;;  %v12450_v49 = vrot.slane %v12442_v41, %v15015_v19  ;;  %v12457_v48 = vrot.slane %v12443_v26, %v15015_v19 }
0x1e0d   :  { %v14449_v26 = vpack.c.bf16 %v6696_v12, %v6695_v63  ;;  %v13285_v12 = vld [vmem:[%s17372_s12 + $0x58] sm:$0xff] }
0x1e0e   :  { %v12530_v44 = vcombine.low %v12434_v21, %v12441_v43  ;;  %v13404_v55 = vcombine.high %v12434_v21, %v12441_v43  ;;  %v12546_v25 = vcombine.low %v12450_v49, %v12457_v48  ;;  %v13405_v30 = vcombine.high %v12450_v49, %v12457_v48 }
0x1e0f   :  { %14450 = vmatprep.subr.bf16.mxu0 %v14449_v26 }
0x1e10   :  { %v12537_v57 = vrot.slane %v12530_v44, %v15013_v13  ;;  %v12545_v54 = vrot.slane %v13404_v55, %v15013_v13  ;;  %v12553_v62 = vrot.slane %v12546_v25, %v15013_v13  ;;  %v12561_v39 = vrot.slane %v13405_v30, %v15013_v13  ;;  %14452 = vmatpush3.bf16.msra.mxu0 %v14449_v26 }
0x1e12   :  { %v12562_v10 = vcombine.low %v12537_v57, %v12545_v54  ;;  %v12578_v29 = vcombine.low %v12553_v62, %v12561_v39  ;;  %v12563_v59 = vcombine.high %v12537_v57, %v12545_v54  ;;  %v12579_v23 = vcombine.high %v12553_v62, %v12561_v39 }
0x1e14   :  { %v17223_v6 = vrot.slane %v12562_v10, %v15015_v19  ;;  %v17226_v34 = vrot.slane %v12578_v29, %v15015_v19  ;;  %v12577_v5 = vrot.slane %v12563_v59, %v15015_v19  ;;  %v12593_v7 = vrot.slane %v12579_v23, %v15015_v19 }
0x1e16   :  { %v12595_v1 = vcombine.high %v17223_v6, %v17226_v34  ;;  %v12596_v27 = vcombine.low %v12577_v5, %v12593_v7  ;;  %v12597_v17 = vcombine.high %v12577_v5, %v12593_v7  ;;  %v12594_v53 = vcombine.low %v17223_v6, %v17226_v34 }
0x1e18   :  { %12668 = vrot.lane.b32.xlu0 %v12595_v1, %s17429_s4 }
0x1e1c   :  { %12676 = vrot.lane.b32.xlu0 %v12596_v27, %s17430_s0 }
0x1e20   :  { %12684 = vrot.lane.b32.xlu0 %v12597_v17, %s17431_s27 }
0x1e2e   :  { %v12171_v11 = vpop.f32.mrb[68].mxu0 }
0x1e2f   :  { %v14174_v16 = vpop.f32.mrb[69].mxu0 }
0x1e32   :  { %v12317_v22 = vpop.f32.mrb[70].mxu0  ;;  %v12390_v47 = vpop.f32.mrb[80].mxu1 }
0x1e33   :  { %v12462_v24 = vcombine.low %v12171_v11, %v12317_v22  ;;  %v12463_v58 = vcombine.high %v12171_v11, %v12317_v22  ;;  %v12478_v50 = vcombine.low %v12244_v61, %v12390_v47  ;;  %v12479_v20 = vcombine.high %v12244_v61, %v12390_v47  ;;  %v14188_v46 = vpop.f32.mrb[71].mxu0  ;;  %v14195_v42 = vpop.f32.mrb[81].mxu1 }
0x1e35   :  { %v12470_v8 = vrot.slane %v12462_v24, %v15013_v13  ;;  %v12477_v31 = vrot.slane %v12463_v58, %v15013_v13  ;;  %v12486_v52 = vrot.slane %v12478_v50, %v15013_v13  ;;  %v12493_v56 = vrot.slane %v12479_v20, %v15013_v13  ;;  %v17445_v24 = vld [vmem:[#allocation17_spill] sm:$0xff]  ;;  %v17446_v50 = vld [vmem:[#allocation15_spill] sm:$0xff] }
0x1e37   :  { %v12494_v14 = vcombine.low %v12470_v8, %v12486_v52  ;;  %v12495_v28 = vcombine.high %v12470_v8, %v12486_v52  ;;  %v12510_v40 = vcombine.low %v12477_v31, %v12493_v56  ;;  %v12511_v37 = vcombine.high %v12477_v31, %v12493_v56 }
0x1e39   :  { %v12502_v9 = vrot.slane %v12494_v14, %v15015_v19  ;;  %v12509_v2 = vrot.slane %v12495_v28, %v15015_v19  ;;  %v12518_v3 = vrot.slane %v12510_v40, %v15015_v19  ;;  %v12525_v18 = vrot.slane %v12511_v37, %v15015_v19 }
0x1e3b   :  { %v12598_v45 = vcombine.low %v12502_v9, %v12509_v2  ;;  %v13406_v51 = vcombine.high %v12502_v9, %v12509_v2  ;;  %v12614_v60 = vcombine.low %v12518_v3, %v12525_v18  ;;  %v13407_v33 = vcombine.high %v12518_v3, %v12525_v18  ;;  %v6700_v9 = vld [vmem:[#allocation8 + $0x20] sm:$0xff]  ;;  %v6701_v2 = vld [vmem:[#allocation8 + $0x28] sm:$0xff]  ;;  %v6702_v3 = vld [vmem:[#allocation8 + $0x30] sm:$0xff] }
0x1e3c   :  { %v14453_v18 = vpack.c.bf16 %v6701_v2, %v6700_v9 }
0x1e3d   :  { %v12605_v61 = vrot.slane %v12598_v45, %v15013_v13  ;;  %v12613_v38 = vrot.slane %v13406_v51, %v15013_v13  ;;  %v12621_v4 = vrot.slane %v12614_v60, %v15013_v13  ;;  %v12629_v41 = vrot.slane %v13407_v33, %v15013_v13  ;;  %v13282_v51 = vld [vmem:[%s17372_s12 + $0x40] sm:$0xff]  ;;  %v13283_v60 = vld [vmem:[%s17372_s12 + $0x48] sm:$0xff]  ;;  %v13284_v33 = vld [vmem:[%s17372_s12 + $0x50] sm:$0xff] }
0x1e3e   :  { %v14457_v45 = vpack.c.bf16 %v6703_v0, %v6702_v3  ;;  %14454 = vmatprep.subr.bf16.mxu1 %v14453_v18  ;;  %v14461_v63 = vpack.c.bf16 %v13283_v60, %v13282_v51  ;;  %v13419_v51 = vld [vmem:[%s17378_s18 + $0x1] ss:$0 sm:$0xff]  ;;  %s14832_s18 = smov [#allocation10]  }
0x1e3f   :  { %v12630_v32 = vcombine.low %v12605_v61, %v12613_v38  ;;  %v12646_v21 = vcombine.low %v12621_v4, %v12629_v41  ;;  %v12631_v43 = vcombine.high %v12605_v61, %v12613_v38  ;;  %v12647_v49 = vcombine.high %v12621_v4, %v12629_v41  ;;  %14456 = vmatpush3.bf16.msra.mxu1 %v14453_v18  ;;  %v13286_v38 = vld [vmem:[%s17372_s12 + $0x60] sm:$0xff]  ;;  %v13287_v4 = vld [vmem:[%s17372_s12 + $0x68] sm:$0xff] }
0x1e40   :  { %14458 = vmatprep.subr.bf16.mxu1 %v14457_v45  ;;  %v14465_v61 = vpack.c.bf16 %v13285_v12, %v13284_v33  ;;  %14462 = vmatprep.subr.bf16.mxu0 %v14461_v63  ;;  %v14469_v41 = vpack.c.bf16 %v13287_v4, %v13286_v38 }
0x1e41   :  { %v12638_v48 = vrot.slane %v12630_v32, %v15015_v19  ;;  %v12654_v44 = vrot.slane %v12646_v21, %v15015_v19  ;;  %v12645_v55 = vrot.slane %v12631_v43, %v15015_v19  ;;  %v12661_v25 = vrot.slane %v12647_v49, %v15015_v19 }
0x1e43   :  { %v12663_v30 = vcombine.high %v12638_v48, %v12654_v44  ;;  %v12664_v57 = vcombine.low %v12645_v55, %v12661_v25  ;;  %v12665_v54 = vcombine.high %v12645_v55, %v12661_v25  ;;  %v12662_v62 = vcombine.low %v12638_v48, %v12654_v44  ;;  %14460 = vmatpush3.bf16.msra.mxu1 %v14457_v45  ;;  %v13411_v55 = vld [vmem:[%s17376_s16 + $0x1] ss:$0 sm:$0xff] }
0x1e45   :  { %12670 = vrot.lane.b32.xlu1 %v12663_v30, %s17429_s4  ;;  %v13412_v30 = vld [vmem:[%s17377_s17 + $0x1] ss:$0 sm:$0xff] }
0x1e49   :  { %12678 = vrot.lane.b32.xlu1 %v12664_v57, %s17430_s0 }
0x1e4d   :  { %12686 = vrot.lane.b32.xlu1 %v12665_v54, %s17431_s27 }
0x1e8a   :  { %v12669_v39 = vpop.permute.xlu0 %12668 }
0x1e8b   :  { %v12690_v29 = vsel %vm1323_vm2, %v12594_v53, %v12669_v39  ;;  %v13408_v53 = vld [vmem:[%s17369_s9 + $0x1] ss:$0 sm:$0xff] }
0x1e8e   :  { %v12677_v10 = vpop.permute.xlu0 %12676 }
0x1e8f   :  { %v12692_v59 = vsel %vm2902_vm3, %v12690_v29, %v12677_v10 }
0x1e92   :  { %v12685_v23 = vpop.permute.xlu0 %12684 }
0x1e93   :  { %v12694_v6 = vsel %vm2905_vm4, %v12692_v59, %v12685_v23  ;;  %v13288_v59 = vld [vmem:[%s17372_s12 + $0x70] sm:$0xff]  ;;  %v13289_v23 = vld [vmem:[%s17372_s12 + $0x78] sm:$0xff] }
0x1e94   :  { %14204 = vmatprep.mubr.msk.f32.mxu0 %vm341_vm0, %v12694_v6  ;;  %v14473_v6 = vpack.c.bf16 %v13289_v23, %v13288_v59 }
0x1eb7   :  { %v12671_v34 = vpop.permute.xlu1 %12670 }
0x1eb8   :  { %v12691_v7 = vsel %vm1323_vm2, %v12662_v62, %v12671_v34  ;;  %v13413_v34 = vld [vmem:[%s17371_s11 + $0x1] ss:$0 sm:$0xff] }
0x1ebb   :  { %v12679_v5 = vpop.permute.xlu1 %12678 }
0x1ebc   :  { %v12693_v1 = vsel %vm2902_vm3, %v12691_v7, %v12679_v5 }
0x1ebf   :  { %v12687_v27 = vpop.permute.xlu1 %12686 }
0x1ec0   :  { %v12695_v17 = vsel %vm2905_vm4, %v12693_v1, %v12687_v27 }
0x1ec1   :  { %14205 = vmatmul.mubr.msk.f32.vlgmr.msra.gmra.mrb[72].mxu0 %vm341_vm0, %v12695_v17 }
0x1ec2   :  { %14464 = vmatpush3.bf16.msra.mxu0 %v14461_v63  ;;  %v13420_v63 = vld [vmem:[%s17379_s19 + $0x1] ss:$0 sm:$0xff]  ;;  %s13127_s19 = sshll.u32 %s14832_s18, 4  ;;  %s13128_s19 = int_to_ptr.vmem [resolvable:$true] %s13127_s19 }
0x1ec3   :  { %14466 = vmatprep.subr.bf16.mxu0 %v14465_v61  ;;  %s14782_s15 = scalar_lea.vmem %s13128_s19, 256  ;;  %p14787_p5 = scmp.lt.s32.totalorder %s13128_s19, %s13128_s19 }
0x1ec4   :  { %p14783_p4 = scmp.ne.s32.totalorder %s13128_s19, %s14782_s15  ;;  %p14788_p6 = scmp.lt.s32.totalorder %s14782_s15, %s14782_s15 }
0x1ec6   :  { %14468 = vmatpush3.bf16.msra.mxu0 %v14465_v61  ;;  %p14789_p7 = por %p14788_p6, %p14787_p5 }
0x1ec7   :  { %14470 = vmatprep.subr.bf16.mxu0 %v14469_v41 }
0x1ec8   :  { %p14790_p8 = pnand %p14789_p7, %p14783_p4 }
0x1eca   :  { %14472 = vmatpush3.bf16.msra.mxu0 %v14469_v41 }
0x1ecb   :  { %14474 = vmatprep.subr.bf16.mxu0 %v14473_v6 }
0x1ece   :  { %14476 = vmatpush3.bf16.msra.mxu0 %v14473_v6 }
0x1f94   :  { %v14206_v11 = vpop.f32.mrb[72].mxu0 }
0x1f95   :  { %v12780_v16 = vadd.f32 %v14206_v11, %v13408_v53  ;;  %v12774_v22 = vpop.f32.mrb[73].mxu0  ;;  %v13416_v11 = vld [vmem:[%s17373_s13 + $0x1] ss:$0 sm:$0xff] }
0x1f96   :  { %v12775_v47 = vadd.f32 %v13408_v53, %v12774_v22 }
0x1f97   :  { %v12784_v58 = vadd.f32 %v12780_v16, %v17445_v24 }
0x1f98   :  { %v12783_v20 = vadd.f32 %v12775_v47, %v17446_v50 }
0x1f99   :  { %v12788_v46 = vsel %vm341_vm0, %v12784_v58, 0.0 }
0x1f9a   :  { %12789 = vadd.xlane.f32.xlu1 %v12788_v46  ;;  %v12785_v42 = vsel %vm341_vm0, %v12783_v20, 0.0 }
0x1f9b   :  { %12786 = vadd.xlane.f32.xlu0 %v12785_v42 }
0x2027   :  { %v12790_v8 = vpop.xlane.xlu1 %12789 }
0x2028   :  { %v12792_v31 = vmul.f32 0.03125, %v12790_v8  ;;  %v12787_v52 = vpop.xlane.xlu0 %12786 }
0x2029   :  { %v12791_v56 = vmul.f32 0.03125, %v12787_v52 }
0x202a   :  { %v12794_v14 = vsub.f32 %v12784_v58, %v12792_v31 }
0x202b   :  { %v12793_v28 = vsub.f32 %v12783_v20, %v12791_v56 }
0x202c   :  { %v12796_v15 = vmul.f32 %v12794_v14, %v12794_v14 }
0x202d   :  { %v12795_v40 = vmul.f32 %v12793_v28, %v12793_v28 }
0x202e   :  { %v12800_v36 = vsel %vm341_vm0, %v12796_v15, 0.0 }
0x202f   :  { %v12797_v37 = vsel %vm341_vm0, %v12795_v40, 0.0 }
0x2030   :  { %12798 = vadd.xlane.f32.xlu0 %v12797_v37 }
0x2034   :  { %12801 = vadd.xlane.f32.xlu0 %v12800_v36 }
0x20bd   :  { %v12799_v26 = vpop.xlane.xlu0 %12798 }
0x20be   :  { %v12803_v32 = vmul.f32 0.03125, %v12799_v26 }
0x20c0   :  { %v12805_v21 = vadd.f32 1e-05, %v12803_v32 }
0x20c1   :  { %v12802_v43 = vpop.xlane.xlu0 %12801 }
0x20c2   :  { %14674 = vrsqrt.f32 %v12805_v21  ;;  %v12804_v49 = vmul.f32 0.03125, %v12802_v43 }
0x20c4   :  { %v12806_v48 = vadd.f32 1e-05, %v12804_v49 }
0x20c6   :  { %14676 = vrsqrt.f32 %v12806_v48 }
0x20cc   :  { %v14675_v44 = vpop.eup %14674 }
0x20cd   :  { %v12809_v25 = vmul.f32 %v14675_v44, %v12793_v28 }
0x20cf   :  { %v12817_v57 = vmul.f32 %v13411_v55, %v12809_v25 }
0x20d0   :  { %v14677_v54 = vpop.eup %14676 }
0x20d1   :  { %v12810_v62 = vmul.f32 %v14677_v54, %v12794_v14  ;;  %v12825_v39 = vadd.f32 %v13412_v30, %v12817_v57 }
0x20d3   :  { %v12818_v10 = vmul.f32 %v13411_v55, %v12810_v62  ;;  %14215 = vmatprep.mubr.msk.f32.mxu1 %vm341_vm0, %v12825_v39 }
0x20d5   :  { %v12826_v29 = vadd.f32 %v13412_v30, %v12818_v10 }
0x20d7   :  { %14216 = vmatmul.mubr.msk.f32.vlgmr.msra.gmra.mrb[82].mxu1 %vm341_vm0, %v12826_v29 }
0x21aa   :  { %v14217_v5 = vpop.f32.mrb[82].mxu1 }
0x21ab   :  { %v12911_v7 = vadd.f32 %v14217_v5, %v13413_v34  ;;  %v12905_v1 = vpop.f32.mrb[83].mxu1 }
0x21ac   :  { %v12906_v27 = vadd.f32 %v13413_v34, %v12905_v1 }
0x21ad   :  { %v12915_v53 = vmax.f32 %v12911_v7, 0.0 }
0x21ae   :  { %v12914_v17 = vmax.f32 %v12906_v27, 0.0 }
0x21b0   :  { %14234 = vmatprep.mubr.msk.f32.mxu0 %vm6545_vm6, %v12914_v17 }
0x21b1   :  { %14235 = vmatmul.mubr.msk.f32.vlgmr.msra.gmra.mrb[74].mxu0 %vm6545_vm6, %v12915_v53 }
0x2284   :  { %v14236_v16 = vpop.f32.mrb[74].mxu0 }
0x2285   :  { %v13000_v22 = vadd.f32 %v14236_v16, %v13416_v11  ;;  %v12994_v47 = vpop.f32.mrb[75].mxu0 }
0x2286   :  { %v12995_v24 = vadd.f32 %v13416_v11, %v12994_v47 }
0x2287   :  { %v13004_v58 = vadd.f32 %v13000_v22, %v12826_v29 }
0x2288   :  { %v13003_v50 = vadd.f32 %v12995_v24, %v12825_v39 }
0x2289   :  { %v13008_v20 = vsel %vm341_vm0, %v13004_v58, 0.0 }
0x228a   :  { %13009 = vadd.xlane.f32.xlu0 %v13008_v20  ;;  %v13005_v46 = vsel %vm341_vm0, %v13003_v50, 0.0 }
0x228b   :  { %13006 = vadd.xlane.f32.xlu1 %v13005_v46 }
0x2317   :  { %v13010_v42 = vpop.xlane.xlu0 %13009 }
0x2318   :  { %v13012_v8 = vmul.f32 0.03125, %v13010_v42  ;;  %v13007_v31 = vpop.xlane.xlu1 %13006 }
0x2319   :  { %v13011_v52 = vmul.f32 0.03125, %v13007_v31 }
0x231a   :  { %v13014_v56 = vsub.f32 %v13004_v58, %v13012_v8 }
0x231b   :  { %v13013_v14 = vsub.f32 %v13003_v50, %v13011_v52 }
0x231c   :  { %v13016_v28 = vmul.f32 %v13014_v56, %v13014_v56 }
0x231d   :  { %v13015_v40 = vmul.f32 %v13013_v14, %v13013_v14 }
0x231e   :  { %v13020_v37 = vsel %vm341_vm0, %v13016_v28, 0.0 }
0x231f   :  { %13021 = vadd.xlane.f32.xlu0 %v13020_v37  ;;  %v13017_v15 = vsel %vm341_vm0, %v13015_v40, 0.0 }
0x2320   :  { %13018 = vadd.xlane.f32.xlu1 %v13017_v15 }
0x23ac   :  { %v13022_v36 = vpop.xlane.xlu0 %13021 }
0x23ad   :  { %v13024_v9 = vmul.f32 0.03125, %v13022_v36  ;;  %v13019_v2 = vpop.xlane.xlu1 %13018 }
0x23ae   :  { %v13023_v3 = vmul.f32 0.03125, %v13019_v2 }
0x23af   :  { %v13026_v18 = vadd.f32 1e-05, %v13024_v9 }
0x23b0   :  { %v13025_v0 = vadd.f32 1e-05, %v13023_v3 }
0x23b1   :  { %14678 = vrsqrt.f32 %v13026_v18 }
0x23b2   :  { %14680 = vrsqrt.f32 %v13025_v0 }
0x23bb   :  { %v14679_v45 = vpop.eup %14678 }
0x23bc   :  { %v14681_v60 = vpop.eup %14680  ;;  %v13030_v33 = vmul.f32 %v14679_v45, %v13014_v56 }
0x23bd   :  { %v13029_v12 = vmul.f32 %v14681_v60, %v13013_v14 }
0x23be   :  { %v13038_v61 = vmul.f32 %v13419_v51, %v13030_v33 }
0x23bf   :  { %v13037_v38 = vmul.f32 %v13419_v51, %v13029_v12 }
0x23c0   :  { %v13046_v4 = vadd.f32 %v13420_v63, %v13038_v61 }
0x23c1   :  { %v13045_v41 = vadd.f32 %v13420_v63, %v13037_v38 }
0x23c2   :  { %v13062_v26 = vcombine.high %v13046_v4, %v17428_v35  ;;  %v13069_v32 = vrot.slane %v13046_v4, %v15013_v13 }
0x23c3   :  { %v13047_v21 = vcombine.high %v13045_v41, %v17428_v35  ;;  %v13054_v43 = vrot.slane %v13045_v41, %v15013_v13 }
0x23c4   :  { %v13076_v49 = vrot.slane %v13062_v26, %v15013_v13 }
0x23c5   :  { %v13061_v48 = vrot.slane %v13047_v21, %v15013_v13  ;;  %v13077_v44 = vcombine.low %v13054_v43, %v13069_v32  ;;  %v13078_v55 = vcombine.high %v13054_v43, %v13069_v32 }
0x23c7   :  { %v13085_v25 = vrot.slane %v13077_v44, %v15015_v19  ;;  %v13092_v30 = vrot.slane %v13078_v55, %v15015_v19  ;;  %v13093_v57 = vcombine.low %v13061_v48, %v13076_v49  ;;  %v13094_v54 = vcombine.high %v13061_v48, %v13076_v49 }
0x23c9   :  { %v13101_v62 = vrot.slane %v13093_v57, %v15015_v19  ;;  %v13108_v39 = vrot.slane %v13094_v54, %v15015_v19  ;;  %v13109_v10 = vcombine.high %v13085_v25, %v17428_v35  ;;  %v13110_v29 = vcombine.high %v13092_v30, %v17428_v35  ;;  %13114 = vst.msk [vmem:[#allocation10] sm:$0x3] %vm13113_vm7, %v13085_v25 }
0x23ca   :  { %13116 = vst.msk [vmem:[#allocation10 + $0x4] sm:$0x3] %vm13113_vm7, %v13092_v30 }
0x23cb   :  { %v13111_v13 = vcombine.high %v13101_v62, %v17428_v35  ;;  %v13112_v59 = vcombine.high %v13108_v39, %v17428_v35  ;;  %13115 = vst.msk [vmem:[#allocation10 + $0x2] sm:$0x3] %vm13113_vm7, %v13109_v10  ;;  %13117 = vst.msk [vmem:[#allocation10 + $0x6] sm:$0x3] %vm13113_vm7, %v13110_v29 }
0x23cc   :  { %13118 = vst.msk [vmem:[#allocation10 + $0x8] sm:$0x3] %vm13113_vm7, %v13101_v62  ;;  %13120 = vst.msk [vmem:[#allocation10 + $0xc] sm:$0x3] %vm13113_vm7, %v13108_v39 }
0x23cd   :  { %13119 = vst.msk [vmem:[#allocation10 + $0xa] sm:$0x3] %vm13113_vm7, %v13111_v13  ;;  %13121 = vst.msk [vmem:[#allocation10 + $0xe] sm:$0x3] %vm13113_vm7, %v13112_v59 }
0x23ce   :  { %14793 = shalt.err (!%p14790_p8)
}
0x23cf   :  { %s17447_s30 = sld [smem:[#allocation24_spill]] }
0x23d5   :  { %s14794_s8 = scalar_lea.hbm %s17447_s30, 256 }
0x23d6   :  { %p14795_p9 = scmp.ne.s32.totalorder %s17447_s30, %s14794_s8  ;;  %p14798_p10 = scmp.lt.u32.totalorder %s14794_s8, %s17447_s30 }
0x23d8   :  { %p14800_p11 = pnand %p14798_p10, %p14795_p9 }
0x23da   :  { %14803 = shalt.err (!%p14800_p11)
}
0x23db   :  { %s17448_s5 = smov 2   ;;  %s17449_s28 = smov 32  }
0x23dc   :  { %13133 = dma.vmem_to_hbm [thread:$0]  %s13128_s19, 256, %s17447_s30, [#allocation4], %s17449_s28, %s17449_s28, %s17448_s5  }
0x23dd   :  { %14810 = dma.done.wait [#allocation4], 256  }
0x23de   :  { %14811 = vsyncadd [#allocation4], 4294967040 }
0x23df   :  { %13137 = vsyncpa [#allocation3], 1 }
0x23e0   :  { %13138 = vsyncpa [#allocation6], 1 }
0x23e1   :  { %13139 = vsyncpa [#allocation9], 1 }
0x23e2   :  { %13140 = vsyncpa [#allocation4], 1 }

</bundles_post_ra>
